<compile_context>
chip_gen: v7x
topology: tpu7x:2x2x1
jax: 0.10.0
libtpu: 0.0.40
codegen_flags: <defaults>
</compile_context>

<pallas_src>
import functools

import numpy as np
import jax
import jax.numpy as jnp
from jax import lax
from jax.experimental import pallas as pl
from jax.experimental.pallas import tpu as pltpu


def _round_up(x, m):
    return (x + m - 1) // m * m


# ---------------------------------------------------------------------------
# One-time parameter packing: fold every conv into a dense (K_in, K_out) matmul
# ---------------------------------------------------------------------------
def _conv_to_dense(w, b, hp, wp, stride, out_pad):
    """Dense matrix of a Conv2d acting on a zero-padded (hp, wp, Cin) input
    (flattened h-major, then w, then channel), producing a zero-embedded
    (ho + 2*out_pad, wo + 2*out_pad, Cout) output in the same flattening
    (the next layer's zero padding is pre-applied).  Bias lands only at the
    interior (real) output positions, so padding rows stay exactly zero."""
    cout, cin, kh, kw = w.shape
    ho = (hp - kh) // stride + 1
    wo = (wp - kw) // stride + 1
    hop, wop = ho + 2 * out_pad, wo + 2 * out_pad

    oh, ow, ki, kj = np.meshgrid(np.arange(ho), np.arange(wo),
                                 np.arange(kh), np.arange(kw), indexing="ij")
    in_h, in_w = stride * oh + ki, stride * ow + kj
    out_h, out_w = oh + out_pad, ow + out_pad

    wt = jnp.transpose(w, (2, 3, 1, 0)).astype(jnp.float32)   # (kh, kw, cin, cout)
    vals = jnp.broadcast_to(wt[None, None], (ho, wo, kh, kw, cin, cout))
    dense = jnp.zeros((hp, wp, hop, wop, cin, cout), jnp.float32)
    dense = dense.at[in_h, in_w, out_h, out_w].set(vals)       # unique indices
    dense = jnp.transpose(dense, (0, 1, 4, 2, 3, 5))           # (hp,wp,cin,hop,wop,cout)
    dense = dense.reshape(hp * wp * cin, hop * wop * cout)

    bias = jnp.zeros((hop, wop, cout), jnp.float32)
    if b is not None:
        bias = bias.at[out_pad:out_pad + ho, out_pad:out_pad + wo, :].set(
            jnp.broadcast_to(b.astype(jnp.float32), (ho, wo, cout)))
    return dense, bias.reshape(1, hop * wop * cout)


def _full_window_to_dense(w, hp, wp, off):
    """Dense matrix of a full-window (no-pad, stride-1) conv that reads the
    interior of a zero-padded (hp, wp, Cin) input starting at offset `off`."""
    cout, cin, kh, kw = w.shape
    wt = jnp.transpose(w, (2, 3, 1, 0)).astype(jnp.float32)    # (kh, kw, cin, cout)
    canvas = jnp.zeros((hp, wp, cin, cout), jnp.float32)
    canvas = canvas.at[off:off + kh, off:off + kw].set(wt)
    return canvas.reshape(hp * wp * cin, cout)


def _pad2d(m, rows, cols):
    return jnp.pad(m, ((0, rows - m.shape[0]), (0, cols - m.shape[1])))


def pack_params(params, image_size=16):
    """Hoisted, one-time weight prep (run once, outside the per-step forward)."""
    main = params["main"]

    mats, biases = [], []
    h = image_size
    for li, (w, b) in enumerate(main):                 # k=4, s=2, p=1 convs
        hp = h + 2                                     # zero-padded input extent
        dense, bdense = _conv_to_dense(w, b, hp, hp, stride=2, out_pad=1)
        if li == 0:
            # Rewrite rows from padded-NHWC-flat to the caller's raw NCHW-flat
            # order; dropping the padding rows is exact (they multiply zeros).
            cin = w.shape[1]
            dense = dense.reshape(hp, hp, cin, dense.shape[1])[1:1 + h, 1:1 + h]
            dense = jnp.transpose(dense, (2, 0, 1, 3)).reshape(cin * h * h, -1)
        mats.append(dense)
        biases.append(bdense)
        h = h // 2

    # Heads read the zero-padded (h+2, h+2, Cf) final feature map; fuse all 3.
    hp = h + 2
    d_src, _ = _conv_to_dense(params["conv1"], None, hp, hp, stride=1, out_pad=0)
    d_cls = _full_window_to_dense(params["conv2"], hp, hp, off=1)
    d_exp = _full_window_to_dense(params["conv3"], hp, hp, off=1)
    d_heads = jnp.concatenate([d_src, d_cls, d_exp], axis=1)

    # Pad every matrix dim once to a multiple of 128 (lane-dense, unmasked MXU
    # operands); weights bf16, biases f32 (f32 accumulation in the kernel).
    ws, bs = [], []
    prev = _round_up(mats[0].shape[0], 128)
    for m, bv in zip(mats, biases):
        wd = _round_up(m.shape[1], 128)
        ws.append(_pad2d(m, prev, wd).astype(jnp.bfloat16))
        bs.append(_pad2d(bv, 1, wd).astype(jnp.float32))
        prev = wd
    wh = _pad2d(d_heads, prev, _round_up(d_heads.shape[1], 128)).astype(jnp.bfloat16)
    return {"w": tuple(ws), "b": tuple(bs), "wh": wh}


# ---------------------------------------------------------------------------
# Fused Pallas kernel: whole forward pass, everything VMEM-resident
# ---------------------------------------------------------------------------
def _fused_kernel(*refs, alpha, n_layers):
    x_ref = refs[0]
    wh_ref = refs[1 + 2 * n_layers]
    o_ref = refs[2 + 2 * n_layers]

    h = x_ref[...]
    for i in range(n_layers):
        w_ref, b_ref = refs[1 + 2 * i], refs[2 + 2 * i]
        y = jnp.dot(h.astype(jnp.bfloat16), w_ref[...],
                    preferred_element_type=jnp.float32)        # MXU, f32 acc
        y = y + b_ref[...]                                     # (1, W) broadcast
        h = jnp.where(y >= 0.0, y, alpha * y)                  # LeakyReLU (VPU)
    o_ref[...] = jnp.dot(h.astype(jnp.bfloat16), wh_ref[...],
                         preferred_element_type=jnp.float32)   # fused heads


def discriminator_forward(packed, x_nchw, *, c_dim, src_hw):
    n = x_nchw.shape[0]
    n_layers = len(packed["w"])
    # Layer-0's matrix absorbs NCHW->NHWC + spatial padding: only a reshape here.
    x_flat = x_nchw.reshape(n, -1)

    operands = [x_flat]
    for w, b in zip(packed["w"], packed["b"]):
        operands += [w, b]
    operands.append(packed["wh"])

    vspec = pl.BlockSpec(memory_space=pltpu.MemorySpace.VMEM)
    heads = pl.pallas_call(
        functools.partial(_fused_kernel, alpha=0.01, n_layers=n_layers),
        out_shape=jax.ShapeDtypeStruct((n, packed["wh"].shape[1]), jnp.float32),
        in_specs=[vspec] * len(operands),
        out_specs=vspec,
        compiler_params=pltpu.CompilerParams(vmem_limit_bytes=32 * 1024 * 1024),
    )(*operands)

    n_src = src_hw * src_hw
    out_src = heads[:, :n_src].reshape(n, 1, src_hw, src_hw)   # NCHW (n,1,2,2)
    out_cls = heads[:, n_src:n_src + c_dim]                    # (n, c_dim)
    out_expr = heads[:, n_src + c_dim:n_src + c_dim + 2]       # (n, 2)
    return out_src, out_cls, out_expr


# ---------------------------------------------------------------------------
# Deterministic parameter init (PyTorch Conv2d default: U(-1/sqrt(fan_in), .))
# ---------------------------------------------------------------------------
def init_params(key, image_size=16, conv_dim=8, c_dim=5, repeat_num=3):
    keys = jax.random.split(key, repeat_num + 3)
    layers = []
    cin, cout = 3, conv_dim
    for i in range(repeat_num):
        kw_, kb_ = jax.random.split(keys[i])
        bound = 1.0 / float(cin * 4 * 4) ** 0.5
        w = jax.random.uniform(kw_, (cout, cin, 4, 4), jnp.float32, -bound, bound)
        b = jax.random.uniform(kb_, (cout,), jnp.float32, -bound, bound)
        layers.append((w, b))
        cin, cout = cout, cout * 2
    curr_dim = cin
    k_final = image_size // (2 ** repeat_num)
    b1 = 1.0 / float(curr_dim * 3 * 3) ** 0.5
    b2 = 1.0 / float(curr_dim * k_final * k_final) ** 0.5
    w1 = jax.random.uniform(keys[repeat_num], (1, curr_dim, 3, 3), jnp.float32, -b1, b1)
    w2 = jax.random.uniform(keys[repeat_num + 1], (c_dim, curr_dim, k_final, k_final),
                            jnp.float32, -b2, b2)
    w3 = jax.random.uniform(keys[repeat_num + 2], (2, curr_dim, k_final, k_final),
                            jnp.float32, -b2, b2)
    return {"main": layers, "conv1": w1, "conv2": w2, "conv3": w3}


# Pure-JAX reference (lax.conv), bf16 per-layer like the Pallas path, for checks.
def reference_forward(params, x):
    dn = ("NCHW", "OIHW", "NCHW")
    h = x
    for (w, b) in params["main"]:
        h = lax.conv_general_dilated(
            h.astype(jnp.bfloat16), w.astype(jnp.bfloat16), (2, 2),
            ((1, 1), (1, 1)), dimension_numbers=dn,
            preferred_element_type=jnp.float32)
        h = h + b[None, :, None, None]
        h = jnp.where(h >= 0, h, 0.01 * h)
    hb = h.astype(jnp.bfloat16)
    out_src = lax.conv_general_dilated(
        hb, params["conv1"].astype(jnp.bfloat16), (1, 1), ((1, 1), (1, 1)),
        dimension_numbers=dn, preferred_element_type=jnp.float32)
    out_cls = lax.conv_general_dilated(
        hb, params["conv2"].astype(jnp.bfloat16), (1, 1), ((0, 0), (0, 0)),
        dimension_numbers=dn, preferred_element_type=jnp.float32)
    out_expr = lax.conv_general_dilated(
        hb, params["conv3"].astype(jnp.bfloat16), (1, 1), ((0, 0), (0, 0)),
        dimension_numbers=dn, preferred_element_type=jnp.float32)
    return (out_src,
            out_cls.reshape(out_cls.shape[0], -1),
            out_expr.reshape(out_expr.shape[0], 2))


if __name__ == "__main__":
    # Small config consistent with the module: image_size=16, conv_dim=8,
    # c_dim=5, repeat_num=3  ->  final feature map 2x2 with 32 channels.
    key = jax.random.PRNGKey(0)
    pkey, xkey = jax.random.split(key)
    params = init_params(pkey, image_size=16, conv_dim=8, c_dim=5, repeat_num=3)
    x = jax.random.normal(xkey, (2, 3, 16, 16), jnp.float32)   # NCHW like PyTorch

    packed = pack_params(params, image_size=16)                # one-time weight prep
    fwd = jax.jit(functools.partial(discriminator_forward, c_dim=5, src_hw=2))
    out_src, out_cls, out_expr = fwd(packed, x)
    jax.block_until_ready((out_src, out_cls, out_expr))

    # Sanity checks: shapes + numerical match vs. plain-JAX conv reference.
    assert out_src.shape == (2, 1, 2, 2), out_src.shape
    assert out_cls.shape == (2, 5), out_cls.shape
    assert out_expr.shape == (2, 2), out_expr.shape
    ref_src, ref_cls, ref_expr = reference_forward(params, x)
    assert jnp.allclose(out_src, ref_src, atol=5e-3, rtol=5e-3)
    assert jnp.allclose(out_cls, ref_cls, atol=5e-3, rtol=5e-3)
    assert jnp.allclose(out_expr, ref_expr, atol=5e-3, rtol=5e-3)

    print("KERNEL_OK")
</pallas_src>

<mosaic_0001>
module attributes {stable_mosaic.version = 11 : i64} {
  func.func @_fused_kernel(%arg0: memref<2x768xf32, #tpu.memory_space<vmem>>, %arg1: memref<768x896xbf16, #tpu.memory_space<vmem>>, %arg2: memref<1x896xf32, #tpu.memory_space<vmem>>, %arg3: memref<896x640xbf16, #tpu.memory_space<vmem>>, %arg4: memref<1x640xf32, #tpu.memory_space<vmem>>, %arg5: memref<640x512xbf16, #tpu.memory_space<vmem>>, %arg6: memref<1x512xf32, #tpu.memory_space<vmem>>, %arg7: memref<512x128xbf16, #tpu.memory_space<vmem>>, %arg8: memref<2x128xf32, #tpu.memory_space<vmem>>) attributes {dimension_semantics = [], scalar_prefetch = 0 : i64, scratch_operands = 0 : i64, tpu.core_type = #tpu.core_type<tc>} {
    %c0 = arith.constant 0 : index
    %c0_0 = arith.constant 0 : index
    %0 = vector.load %arg0[%c0, %c0_0] : memref<2x768xf32, #tpu.memory_space<vmem>>, vector<2x768xf32>
    %1 = arith.truncf %0 : vector<2x768xf32> to vector<2x768xbf16>
    %c0_1 = arith.constant 0 : index
    %c0_2 = arith.constant 0 : index
    %2 = vector.load %arg1[%c0_1, %c0_2] : memref<768x896xbf16, #tpu.memory_space<vmem>>, vector<768x896xbf16>
    %cst = arith.constant dense<0.000000e+00> : vector<2x896xf32>
    %3 = tpu.matmul %1, %2, %cst {dimension_numbers = #tpu.dot_dimension_numbers<[1], [0], [0], [1], [0, 0, 1, 1], [], []>} : vector<2x768xbf16>, vector<768x896xbf16>, vector<2x896xf32> -> vector<2x896xf32>
    %c0_3 = arith.constant 0 : index
    %c0_4 = arith.constant 0 : index
    %4 = vector.load %arg2[%c0_3, %c0_4] : memref<1x896xf32, #tpu.memory_space<vmem>>, vector<1x896xf32>
    %5 = vector.broadcast %4 : vector<1x896xf32> to vector<2x896xf32>
    %6 = arith.addf %3, %5 : vector<2x896xf32>
    %cst_5 = arith.constant 0.000000e+00 : f32
    %7 = vector.broadcast %cst_5 : f32 to vector<2x896xf32>
    %8 = arith.cmpf oge, %6, %7 : vector<2x896xf32>
    %cst_6 = arith.constant 0.00999999977 : f32
    %9 = vector.broadcast %cst_6 : f32 to vector<2x896xf32>
    %10 = arith.mulf %9, %6 : vector<2x896xf32>
    %11 = arith.select %8, %6, %10 : vector<2x896xi1>, vector<2x896xf32>
    %12 = arith.truncf %11 : vector<2x896xf32> to vector<2x896xbf16>
    %c0_7 = arith.constant 0 : index
    %c0_8 = arith.constant 0 : index
    %13 = vector.load %arg3[%c0_7, %c0_8] : memref<896x640xbf16, #tpu.memory_space<vmem>>, vector<896x640xbf16>
    %cst_9 = arith.constant dense<0.000000e+00> : vector<2x640xf32>
    %14 = tpu.matmul %12, %13, %cst_9 {dimension_numbers = #tpu.dot_dimension_numbers<[1], [0], [0], [1], [0, 0, 1, 1], [], []>} : vector<2x896xbf16>, vector<896x640xbf16>, vector<2x640xf32> -> vector<2x640xf32>
    %c0_10 = arith.constant 0 : index
    %c0_11 = arith.constant 0 : index
    %15 = vector.load %arg4[%c0_10, %c0_11] : memref<1x640xf32, #tpu.memory_space<vmem>>, vector<1x640xf32>
    %16 = vector.broadcast %15 : vector<1x640xf32> to vector<2x640xf32>
    %17 = arith.addf %14, %16 : vector<2x640xf32>
    %cst_12 = arith.constant 0.000000e+00 : f32
    %18 = vector.broadcast %cst_12 : f32 to vector<2x640xf32>
    %19 = arith.cmpf oge, %17, %18 : vector<2x640xf32>
    %cst_13 = arith.constant 0.00999999977 : f32
    %20 = vector.broadcast %cst_13 : f32 to vector<2x640xf32>
    %21 = arith.mulf %20, %17 : vector<2x640xf32>
    %22 = arith.select %19, %17, %21 : vector<2x640xi1>, vector<2x640xf32>
    %23 = arith.truncf %22 : vector<2x640xf32> to vector<2x640xbf16>
    %c0_14 = arith.constant 0 : index
    %c0_15 = arith.constant 0 : index
    %24 = vector.load %arg5[%c0_14, %c0_15] : memref<640x512xbf16, #tpu.memory_space<vmem>>, vector<640x512xbf16>
    %cst_16 = arith.constant dense<0.000000e+00> : vector<2x512xf32>
    %25 = tpu.matmul %23, %24, %cst_16 {dimension_numbers = #tpu.dot_dimension_numbers<[1], [0], [0], [1], [0, 0, 1, 1], [], []>} : vector<2x640xbf16>, vector<640x512xbf16>, vector<2x512xf32> -> vector<2x512xf32>
    %c0_17 = arith.constant 0 : index
    %c0_18 = arith.constant 0 : index
    %26 = vector.load %arg6[%c0_17, %c0_18] : memref<1x512xf32, #tpu.memory_space<vmem>>, vector<1x512xf32>
    %27 = vector.broadcast %26 : vector<1x512xf32> to vector<2x512xf32>
    %28 = arith.addf %25, %27 : vector<2x512xf32>
    %cst_19 = arith.constant 0.000000e+00 : f32
    %29 = vector.broadcast %cst_19 : f32 to vector<2x512xf32>
    %30 = arith.cmpf oge, %28, %29 : vector<2x512xf32>
    %cst_20 = arith.constant 0.00999999977 : f32
    %31 = vector.broadcast %cst_20 : f32 to vector<2x512xf32>
    %32 = arith.mulf %31, %28 : vector<2x512xf32>
    %33 = arith.select %30, %28, %32 : vector<2x512xi1>, vector<2x512xf32>
    %34 = arith.truncf %33 : vector<2x512xf32> to vector<2x512xbf16>
    %c0_21 = arith.constant 0 : index
    %c0_22 = arith.constant 0 : index
    %35 = vector.load %arg7[%c0_21, %c0_22] : memref<512x128xbf16, #tpu.memory_space<vmem>>, vector<512x128xbf16>
    %cst_23 = arith.constant dense<0.000000e+00> : vector<2x128xf32>
    %36 = tpu.matmul %34, %35, %cst_23 {dimension_numbers = #tpu.dot_dimension_numbers<[1], [0], [0], [1], [0, 0, 1, 1], [], []>} : vector<2x512xbf16>, vector<512x128xbf16>, vector<2x128xf32> -> vector<2x128xf32>
    %c0_24 = arith.constant 0 : index
    %c0_25 = arith.constant 0 : index
    %37 = vector.load %arg8[%c0_24, %c0_25] : memref<2x128xf32, #tpu.memory_space<vmem>>, vector<2x128xf32>
    tpu.vector_store %arg8[%c0_24, %c0_25], %36 {strides = array<i32>} : memref<2x128xf32, #tpu.memory_space<vmem>>, vector<2x128xf32>,
    return
  }
}

</mosaic_0001>

<bundles_post_ra>
// kernel: discriminator_forward.1
= control target key start
LH: loop header
LB: loop body
LE: loop exit
PB: predicated region body
PF: predicated region fallthrough
CT: control target
= control target key end

     0   :  { %13 = vsyncpa [#allocation3], 0  ;;  %s9486_s0 = inlined_call_operand.vmem [shape: f32[2,768], index: 0, kind: input, shape index: {}]   ;;  %s9487_s1 = inlined_call_operand.hbm [shape: bf16[768,896], index: 1, kind: input, shape index: {}]   ;;  %s9488_s2 = inlined_call_operand.hbm [shape: f32[1,896], index: 2, kind: input, shape index: {}]   ;;  %s9489_s3 = inlined_call_operand.hbm [shape: bf16[896,640], index: 3, kind: input, shape index: {}]   ;;  %s9490_s4 = inlined_call_operand.hbm [shape: f32[1,640], index: 4, kind: input, shape index: {}]   ;;  %s9491_s5 = inlined_call_operand.hbm [shape: bf16[640,512], index: 5, kind: input, shape index: {}]   ;;  %s9492_s6 = inlined_call_operand.hbm [shape: f32[1,512], index: 6, kind: input, shape index: {}]   ;;  %s9493_s7 = inlined_call_operand.hbm [shape: bf16[512,128], index: 7, kind: input, shape index: {}]   ;;  %s9494_s8 = inlined_call_operand.vmem [shape: f32[2,128], index: 8, kind: output, shape index: {}]  }
   0x1   :  { %14 = vsyncpa [#allocation5], 0 }
   0x2   :  { %15 = vsyncpa [#allocation8], 0 }
   0x3   :  { %16 = vsyncpa [#allocation11], 0  ;;  %s9161_s27 = smov [#allocation4]   ;;  %s9162_s29 = smov [#allocation7]  }
   0x4   :  { %s37_s28 = sshll.u32 %s9161_s27, 4  ;;  %s59_s30 = sshll.u32 %s9162_s29, 4  ;;  %s38_s28 = int_to_ptr.vmem [resolvable:$true] %s37_s28  ;;  %s60_s30 = int_to_ptr.vmem [resolvable:$true] %s59_s30 }
   0x5   :  { %s8999_s11 = scalar_lea.hbm %s9488_s2, 112 }
   0x6   :  { %p9000_p0 = scmp.ne.s32.totalorder %s9488_s2, %s8999_s11  ;;  %p9003_p1 = scmp.lt.u32.totalorder %s8999_s11, %s9488_s2 }
   0x8   :  { %p9005_p2 = pnand %p9003_p1, %p9000_p0 }
   0xa   :  { %9008 = shalt.err (!%p9005_p2)
}
   0xb   :  { %s9009_s16 = scalar_lea.vmem %s38_s28, 112  ;;  %s9013_s17 = scalar_lea.vmem %s38_s28, 128 }
   0xc   :  { %p9010_p3 = scmp.ne.s32.totalorder %s38_s28, %s9009_s16  ;;  %p9014_p4 = scmp.lt.s32.totalorder %s38_s28, %s38_s28 }
   0xd   :  { %p9015_p5 = scmp.lt.s32.totalorder %s9013_s17, %s9009_s16 }
   0xf   :  { %p9016_p6 = por %p9015_p5, %p9014_p4 }
  0x11   :  { %p9017_p7 = pnand %p9016_p6, %p9010_p3 }
  0x13   :  { %9020 = shalt.err (!%p9017_p7)
}
  0x14   :  { %40 = dma.hbm_to_vmem [thread:$0]  %s9488_s2, 112, %s38_s28, [#allocation5]  }
  0x15   :  { %s9021_s22 = scalar_lea.hbm %s9490_s4, 80 }
  0x16   :  { %p9022_p8 = scmp.ne.s32.totalorder %s9490_s4, %s9021_s22  ;;  %p9025_p9 = scmp.lt.u32.totalorder %s9021_s22, %s9490_s4 }
  0x18   :  { %p9027_p10 = pnand %p9025_p9, %p9022_p8 }
  0x1a   :  { %9030 = shalt.err (!%p9027_p10)
}
  0x1b   :  { %s9031_s27 = scalar_lea.vmem %s60_s30, 80  ;;  %s9035_s29 = scalar_lea.vmem %s60_s30, 96 }
  0x1c   :  { %p9032_p11 = scmp.ne.s32.totalorder %s60_s30, %s9031_s27  ;;  %p9036_p12 = scmp.lt.s32.totalorder %s60_s30, %s60_s30 }
  0x1d   :  { %p9037_p13 = scmp.lt.s32.totalorder %s9035_s29, %s9031_s27 }
  0x1f   :  { %p9038_p0 = por %p9037_p13, %p9036_p12 }
  0x21   :  { %p9039_p1 = pnand %p9038_p0, %p9032_p11 }
  0x23   :  { %9042 = shalt.err (!%p9039_p1)
}
  0x24   :  { %62 = dma.hbm_to_vmem [thread:$0]  %s9490_s4, 80, %s60_s30, [#allocation8]  }
  0x25   :  { %s9163_s9 = smov [#allocation10]   ;;  %s9164_s11 = smov [#allocation2]  }
  0x26   :  { %s81_s10 = sshll.u32 %s9163_s9, 4  ;;  %s24_s12 = sshll.u32 %s9164_s11, 4  ;;  %s82_s10 = int_to_ptr.vmem [resolvable:$true] %s81_s10  ;;  %s9249_s12 = int_to_ptr.vmem [resolvable:$true] %s24_s12 }
  0x27   :  { %s9043_s15 = scalar_lea.hbm %s9492_s6, 64 }
  0x28   :  { %p9044_p2 = scmp.ne.s32.totalorder %s9492_s6, %s9043_s15  ;;  %p9047_p3 = scmp.lt.u32.totalorder %s9043_s15, %s9492_s6 }
  0x2a   :  { %p9049_p4 = pnand %p9047_p3, %p9044_p2 }
  0x2c   :  { %9052 = shalt.err (!%p9049_p4)
}
  0x2d   :  { %s9053_s4 = scalar_lea.vmem %s82_s10, 64  ;;  %p9058_p6 = scmp.lt.s32.totalorder %s82_s10, %s82_s10 }
  0x2e   :  { %p9054_p5 = scmp.ne.s32.totalorder %s82_s10, %s9053_s4  ;;  %p9059_p7 = scmp.lt.s32.totalorder %s9053_s4, %s9053_s4 }
  0x30   :  { %p9060_p8 = por %p9059_p7, %p9058_p6 }
  0x32   :  { %p9061_p9 = pnand %p9060_p8, %p9054_p5 }
  0x34   :  { %9064 = shalt.err (!%p9061_p9)
}
  0x35   :  { %84 = dma.hbm_to_vmem [thread:$0]  %s9492_s6, 64, %s82_s10, [#allocation11]  }
  0x36   :  { %s9065_s23 = scalar_lea.hbm %s9487_s1, 43008 }
  0x37   :  { %p9066_p10 = scmp.ne.s32.totalorder %s9487_s1, %s9065_s23  ;;  %p9069_p11 = scmp.lt.u32.totalorder %s9065_s23, %s9487_s1 }
  0x39   :  { %p9071_p12 = pnand %p9069_p11, %p9066_p10 }
  0x3b   :  { %9074 = shalt.err (!%p9071_p12)
}
  0x3c   :  { %s9075_s29 = scalar_lea.vmem %s9249_s12, 43008  ;;  %p9080_p0 = scmp.lt.s32.totalorder %s9249_s12, %s9249_s12 }
  0x3d   :  { %p9076_p13 = scmp.ne.s32.totalorder %s9249_s12, %s9075_s29  ;;  %p9081_p1 = scmp.lt.s32.totalorder %s9075_s29, %s9075_s29 }
  0x3f   :  { %p9082_p2 = por %p9081_p1, %p9080_p0 }
  0x41   :  { %p9083_p3 = pnand %p9082_p2, %p9076_p13 }
  0x43   :  { %9086 = shalt.err (!%p9083_p3)
}
  0x44   :  { %s9165_s6 = smov 448   ;;  %s9166_s2 = smov 28  }
  0x45   :  { %30 = dma.hbm_to_vmem [thread:$0]  %s9487_s1, 43008, %s9249_s12, [#allocation3], %s9165_s6, %s9165_s6, %s9166_s2  }
  0x46   :  { %s9167_s10 = smov [#allocation6]   ;;  %s9087_s15 = scalar_lea.hbm %s9489_s3, 35840 }
  0x47   :  { %s46_s11 = sshll.u32 %s9167_s10, 4  ;;  %p9088_p4 = scmp.ne.s32.totalorder %s9489_s3, %s9087_s15  ;;  %s47_s11 = int_to_ptr.vmem [resolvable:$true] %s46_s11 }
  0x48   :  { %p9091_p5 = scmp.lt.u32.totalorder %s9087_s15, %s9489_s3 }
  0x4a   :  { %p9093_p6 = pnand %p9091_p5, %p9088_p4 }
  0x4c   :  { %9096 = shalt.err (!%p9093_p6)
}
  0x4d   :  { %s9097_s4 = scalar_lea.vmem %s47_s11, 35840  ;;  %p9102_p8 = scmp.lt.s32.totalorder %s47_s11, %s47_s11 }
  0x4e   :  { %p9098_p7 = scmp.ne.s32.totalorder %s47_s11, %s9097_s4  ;;  %p9103_p9 = scmp.lt.s32.totalorder %s9097_s4, %s9097_s4 }
  0x50   :  { %p9104_p10 = por %p9103_p9, %p9102_p8 }
  0x52   :  { %p9105_p11 = pnand %p9104_p10, %p9098_p7 }
  0x54   :  { %9108 = shalt.err (!%p9105_p11)
}
  0x55   :  { %s9168_s1 = smov 320   ;;  %s9169_s12 = smov 20  }
  0x56   :  { %52 = dma.hbm_to_vmem [thread:$0]  %s9489_s3, 35840, %s47_s11, [#allocation5], %s9168_s1, %s9168_s1, %s9169_s12  }
  0x57   :  { %s9170_s21 = smov [#allocation9]   ;;  %s9109_s25 = scalar_lea.hbm %s9491_s5, 20480 }
  0x58   :  { %s68_s22 = sshll.u32 %s9170_s21, 4  ;;  %p9110_p12 = scmp.ne.s32.totalorder %s9491_s5, %s9109_s25  ;;  %s69_s22 = int_to_ptr.vmem [resolvable:$true] %s68_s22 }
  0x59   :  { %p9113_p13 = scmp.lt.u32.totalorder %s9109_s25, %s9491_s5 }
  0x5b   :  { %p9115_p0 = pnand %p9113_p13, %p9110_p12 }
  0x5d   :  { %9118 = shalt.err (!%p9115_p0)
}
  0x5e   :  { %s9119_s2 = scalar_lea.vmem %s69_s22, 20480  ;;  %p9124_p2 = scmp.lt.s32.totalorder %s69_s22, %s69_s22 }
  0x5f   :  { %p9120_p1 = scmp.ne.s32.totalorder %s69_s22, %s9119_s2  ;;  %p9125_p3 = scmp.lt.s32.totalorder %s9119_s2, %s9119_s2 }
  0x61   :  { %p9126_p4 = por %p9125_p3, %p9124_p2 }
  0x63   :  { %p9127_p5 = pnand %p9126_p4, %p9120_p1 }
  0x65   :  { %9130 = shalt.err (!%p9127_p5)
}
  0x66   :  { %s9171_s3 = smov 256   ;;  %s9172_s28 = smov 16  }
  0x67   :  { %74 = dma.hbm_to_vmem [thread:$0]  %s9491_s5, 20480, %s69_s22, [#allocation8], %s9171_s3, %s9171_s3, %s9172_s28  }
  0x68   :  { %s9173_s11 = smov [#allocation12]   ;;  %s9131_s16 = scalar_lea.hbm %s9493_s7, 4096 }
  0x69   :  { %s90_s13 = sshll.u32 %s9173_s11, 4  ;;  %p9132_p6 = scmp.ne.s32.totalorder %s9493_s7, %s9131_s16  ;;  %s91_s13 = int_to_ptr.vmem [resolvable:$true] %s90_s13 }
  0x6a   :  { %p9135_p7 = scmp.lt.u32.totalorder %s9131_s16, %s9493_s7 }
  0x6c   :  { %p9137_p8 = pnand %p9135_p7, %p9132_p6 }
  0x6e   :  { %9140 = shalt.err (!%p9137_p8)
}
  0x6f   :  { %s9141_s1 = scalar_lea.vmem %s91_s13, 4096  ;;  %p9146_p10 = scmp.lt.s32.totalorder %s91_s13, %s91_s13 }
  0x70   :  { %p9142_p9 = scmp.ne.s32.totalorder %s91_s13, %s9141_s1  ;;  %p9147_p11 = scmp.lt.s32.totalorder %s9141_s1, %s9141_s1 }
  0x72   :  { %p9148_p12 = por %p9147_p11, %p9146_p10 }
  0x74   :  { %p9149_p13 = pnand %p9148_p12, %p9142_p9 }
  0x76   :  { %9152 = shalt.err (!%p9149_p13)
}
  0x77   :  { %s9174_s5 = smov 64   ;;  %s9175_s12 = smov 4  }
  0x78   :  { %96 = dma.hbm_to_vmem [thread:$0]  %s9493_s7, 4096, %s91_s13, [#allocation11], %s9174_s5, %s9174_s5, %s9175_s12  }
  0x79   :  { %9153 = dma.done.wait [#allocation3], 43008  }
  0x7a   :  { %9154 = vsyncadd [#allocation3], 4294924288 }
  0x7b   :  { %9155 = dma.done.wait [#allocation5], 35952  }
  0x7c   :  { %9156 = vsyncadd [#allocation5], 4294931344 }
  0x7d   :  { %9157 = dma.done.wait [#allocation8], 20560  }
  0x7e   :  { %9158 = vsyncadd [#allocation8], 4294946736 }
  0x7f   :  { %9159 = dma.done.wait [#allocation11], 4160  }
  0x80   :  { %9160 = vsyncadd [#allocation11], 4294963136  ;;  %v7853_v0 = vld [vmem:[#allocation2 + $0x4] ss:$28 sps:$4 sm:$0xff]   ;;  %v7855_v1 = vld [vmem:[#allocation2 + $0xc] ss:$28 sps:$4 sm:$0xff]   ;;  %v127_v38 = vlaneseq }
  0x81   :  { %2309 = vmatprep.subr.bf16.mxu0 %v7853_v0  ;;  %v7857_v2 = vld [vmem:[#allocation2] ss:$28 sps:$4 sm:$0xff]   ;;  %v7858_v3 = vld [vmem:[#allocation2 + $0x8] ss:$28 sps:$4 sm:$0xff]   ;;  %2432 = vmatprep.subr.bf16.mxu1 %v7855_v1  ;;  %v7863_v6 = vld [vmem:[#allocation2 + $0x38] ss:$28 sps:$4 sm:$0xff]  }
  0x82   :  { %v7859_v4 = vld [vmem:[#allocation2 + $0x3c] ss:$28 sps:$4 sm:$0xff]   ;;  %2310 = vmatpush1.bf16.msra.mxu0 %v7857_v2  ;;  %2433 = vmatpush1.bf16.msra.mxu1 %v7858_v3  ;;  %v7861_v5 = vld [vmem:[#allocation2 + $0x44] ss:$28 sps:$4 sm:$0xff]   ;;  %v7865_v8 = vld [vmem:[#allocation2 + $0x74] ss:$28 sps:$4 sm:$0xff]  }
  0x83   :  { %2311 = vmatprep.subr.bf16.mxu0 %v7859_v4  ;;  %v7864_v7 = vld [vmem:[#allocation2 + $0x40] ss:$28 sps:$4 sm:$0xff]   ;;  %2434 = vmatprep.subr.bf16.mxu1 %v7861_v5  ;;  %v7869_v10 = vld [vmem:[#allocation2 + $0x70] ss:$28 sps:$4 sm:$0xff]   ;;  %v7870_v11 = vld [vmem:[#allocation2 + $0x78] ss:$28 sps:$4 sm:$0xff]  }
  0x84   :  { %v7867_v9 = vld [vmem:[#allocation2 + $0x7c] ss:$28 sps:$4 sm:$0xff]   ;;  %v7871_v12 = vld [vmem:[#allocation2 + $0xac] ss:$28 sps:$4 sm:$0xff]   ;;  %v7873_v13 = vld [vmem:[#allocation2 + $0xb4] ss:$28 sps:$4 sm:$0xff]  }
  0x85   :  { %v7875_v14 = vld [vmem:[#allocation2 + $0xa8] ss:$28 sps:$4 sm:$0xff]   ;;  %v7876_v15 = vld [vmem:[#allocation2 + $0xb0] ss:$28 sps:$4 sm:$0xff]   ;;  %v7881_v18 = vld [vmem:[#allocation2 + $0xe0] ss:$28 sps:$4 sm:$0xff]  }
  0x86   :  { %2312 = vmatpush1.bf16.msra.mxu0 %v7863_v6  ;;  %2435 = vmatpush1.bf16.msra.mxu1 %v7864_v7  ;;  %v7877_v16 = vld [vmem:[#allocation2 + $0xe4] ss:$28 sps:$4 sm:$0xff]   ;;  %v7879_v17 = vld [vmem:[#allocation2 + $0xec] ss:$28 sps:$4 sm:$0xff]   ;;  %v7883_v20 = vld [vmem:[#allocation2 + $0x11c] ss:$28 sps:$4 sm:$0xff]  }
  0x87   :  { %2313 = vmatprep.subr.bf16.mxu0 %v7865_v8  ;;  %2436 = vmatprep.subr.bf16.mxu1 %v7867_v9  ;;  %v7882_v19 = vld [vmem:[#allocation2 + $0xe8] ss:$28 sps:$4 sm:$0xff]   ;;  %v7887_v22 = vld [vmem:[#allocation2 + $0x118] ss:$28 sps:$4 sm:$0xff]   ;;  %v7888_v23 = vld [vmem:[#allocation2 + $0x120] ss:$28 sps:$4 sm:$0xff]  }
  0x88   :  { %v7885_v21 = vld [vmem:[#allocation2 + $0x124] ss:$28 sps:$4 sm:$0xff]   ;;  %v7889_v24 = vld [vmem:[#allocation2 + $0x154] ss:$28 sps:$4 sm:$0xff]   ;;  %v7891_v25 = vld [vmem:[#allocation2 + $0x15c] ss:$28 sps:$4 sm:$0xff]  }
  0x89   :  { %v7893_v26 = vld [vmem:[#allocation2 + $0x150] ss:$28 sps:$4 sm:$0xff]   ;;  %v7894_v27 = vld [vmem:[#allocation2 + $0x158] ss:$28 sps:$4 sm:$0xff]   ;;  %v7899_v30 = vld [vmem:[#allocation2 + $0x188] ss:$28 sps:$4 sm:$0xff]  }
  0x8a   :  { %2314 = vmatpush1.bf16.msra.mxu0 %v7869_v10  ;;  %2437 = vmatpush1.bf16.msra.mxu1 %v7870_v11  ;;  %v7895_v28 = vld [vmem:[#allocation2 + $0x18c] ss:$28 sps:$4 sm:$0xff]   ;;  %v7897_v29 = vld [vmem:[#allocation2 + $0x194] ss:$28 sps:$4 sm:$0xff]   ;;  %v7901_v32 = vld [vmem:[#allocation2 + $0x1c4] ss:$28 sps:$4 sm:$0xff]  }
  0x8b   :  { %2315 = vmatprep.subr.bf16.mxu0 %v7871_v12  ;;  %2438 = vmatprep.subr.bf16.mxu1 %v7873_v13  ;;  %v7900_v31 = vld [vmem:[#allocation2 + $0x190] ss:$28 sps:$4 sm:$0xff]   ;;  %v7905_v34 = vld [vmem:[#allocation2 + $0x1c0] ss:$28 sps:$4 sm:$0xff]   ;;  %v7906_v35 = vld [vmem:[#allocation2 + $0x1c8] ss:$28 sps:$4 sm:$0xff]  }
  0x8c   :  { %v7903_v33 = vld [vmem:[#allocation2 + $0x1cc] ss:$28 sps:$4 sm:$0xff]   ;;  %v9176_v36 = vmov 1983009808   ;;  %v7907_v39 = vld [vmem:[#allocation2 + $0x1fc] ss:$28 sps:$4 sm:$0xff]  }
  0x8d   :  { %v125_v37 = vunpack.c.l.s4 %v9176_v36  ;;  %v7909_v40 = vld [vmem:[#allocation2 + $0x204] ss:$28 sps:$4 sm:$0xff]   ;;  %v7911_v41 = vld [vmem:[#allocation2 + $0x1f8] ss:$28 sps:$4 sm:$0xff]   ;;  %v9316_v43 = vshrl.u32 %v127_v38, 7  ;;  %vm9179_vm7 = vmmov 0  }
  0x8e   :  { %2316 = vmatpush1.bf16.msra.mxu0 %v7875_v14  ;;  %2439 = vmatpush1.bf16.msra.mxu1 %v7876_v15  ;;  %v7912_v44 = vld [vmem:[#allocation2 + $0x200] ss:$28 sps:$4 sm:$0xff]   ;;  %v7913_v45 = vld [vmem:[#allocation2 + $0x234] ss:$28 sps:$4 sm:$0xff]   ;;  %v7919_v50 = vld [vmem:[#allocation2 + $0x26c] ss:$28 sps:$4 sm:$0xff]  }
  0x8f   :  { %2317 = vmatprep.subr.bf16.mxu0 %v7877_v16  ;;  %2440 = vmatprep.subr.bf16.mxu1 %v7879_v17  ;;  %v126_v42 = vunpack.c.0.s8 %v125_v37  ;;  %v7915_v46 = vld [vmem:[#allocation2 + $0x23c] ss:$28 sps:$4 sm:$0xff]   ;;  %v7917_v47 = vld [vmem:[#allocation2 + $0x230] ss:$28 sps:$4 sm:$0xff]   ;;  %v119_v52 = vld [vmem:[%s9486_s0] sm:$0xff] }
  0x90   :  { %v7918_v48 = vld [vmem:[#allocation2 + $0x238] ss:$28 sps:$4 sm:$0xff]   ;;  %v7923_v53 = vld [vmem:[#allocation2 + $0x268] ss:$28 sps:$4 sm:$0xff]   ;;  %v7924_v55 = vld [vmem:[#allocation2 + $0x270] ss:$28 sps:$4 sm:$0xff]   ;;  %v123_v4 = vcombine.high %v119_v52, %v119_v52 }
  0x91   :  { %v129_v49 = vsub.s32 %v126_v42, %v9316_v43  ;;  %v7921_v51 = vld [vmem:[#allocation2 + $0x274] ss:$28 sps:$4 sm:$0xff]   ;;  %v7925_v56 = vld [vmem:[#allocation2 + $0x2a4] ss:$28 sps:$4 sm:$0xff]   ;;  %v7927_v57 = vld [vmem:[#allocation2 + $0x2ac] ss:$28 sps:$4 sm:$0xff]  }
  0x92   :  { %2318 = vmatpush1.bf16.msra.mxu0 %v7881_v18  ;;  %2441 = vmatpush1.bf16.msra.mxu1 %v7882_v19  ;;  %v7929_v59 = vld [vmem:[#allocation2 + $0x2a0] ss:$28 sps:$4 sm:$0xff]   ;;  %v7930_v61 = vld [vmem:[#allocation2 + $0x2a8] ss:$28 sps:$4 sm:$0xff]   ;;  %v7935_v0 = vld [vmem:[#allocation2 + $0x2d8] ss:$28 sps:$4 sm:$0xff]  }
  0x93   :  { %2319 = vmatprep.subr.bf16.mxu0 %v7883_v20  ;;  %2442 = vmatprep.subr.bf16.mxu1 %v7885_v21  ;;  %v130_v54 = vrot.slane %v119_v52, %v129_v49  ;;  %v7931_v62 = vld [vmem:[#allocation2 + $0x2dc] ss:$28 sps:$4 sm:$0xff]   ;;  %v7933_v63 = vld [vmem:[#allocation2 + $0x2e4] ss:$28 sps:$4 sm:$0xff]   ;;  %v7937_v2 = vld [vmem:[#allocation2 + $0x314] ss:$28 sps:$4 sm:$0xff]   ;;  %v9326_v9 = vrot.slane %v123_v4, %v129_v49 }
  0x94   :  { %v7936_v1 = vld [vmem:[#allocation2 + $0x2e0] ss:$28 sps:$4 sm:$0xff]   ;;  %v7941_v5 = vld [vmem:[#allocation2 + $0x310] ss:$28 sps:$4 sm:$0xff]   ;;  %v7942_v6 = vld [vmem:[#allocation2 + $0x318] ss:$28 sps:$4 sm:$0xff]  }
  0x95   :  { %v138_v58 = vcombine.high %v130_v54, %v130_v54  ;;  %v7939_v3 = vld [vmem:[#allocation2 + $0x31c] ss:$28 sps:$4 sm:$0xff]   ;;  %v7943_v7 = vld [vmem:[#allocation2 + $0x34c] ss:$28 sps:$4 sm:$0xff]   ;;  %v7945_v8 = vld [vmem:[#allocation2 + $0x354] ss:$28 sps:$4 sm:$0xff]   ;;  %v139_v14 = vcombine.high %v9326_v9, %v9326_v9  ;;  %v9330_v16 = vpack.c.bf16 %v130_v54, %v130_v54 }
  0x96   :  { %2320 = vmatpush1.bf16.msra.mxu0 %v7887_v22  ;;  %2443 = vmatpush1.bf16.msra.mxu1 %v7888_v23  ;;  %v7947_v10 = vld [vmem:[#allocation2 + $0x348] ss:$28 sps:$4 sm:$0xff]   ;;  %v7948_v11 = vld [vmem:[#allocation2 + $0x350] ss:$28 sps:$4 sm:$0xff]   ;;  %v7949_v15 = vld [vmem:[#allocation2 + $0x380] ss:$28 sps:$4 sm:$0xff]  }
  0x97   :  { %2321 = vmatprep.subr.bf16.mxu0 %v7889_v24  ;;  %2444 = vmatprep.subr.bf16.mxu1 %v7891_v25  ;;  %v9322_v60 = vpack.c.bf16 %v138_v58, %v138_v58  ;;  %v7951_v12 = vld [vmem:[#allocation2 + $0x384] ss:$28 sps:$4 sm:$0xff]   ;;  %v7954_v13 = vld [vmem:[#allocation2 + $0x38c] ss:$28 sps:$4 sm:$0xff]   ;;  %v7957_v18 = vld [vmem:[#allocation2 + $0x3bc] ss:$28 sps:$4 sm:$0xff]   ;;  %v9332_v20 = vpack.c.bf16 %v139_v14, %v139_v14 }
  0x98   :  { %v7952_v17 = vld [vmem:[#allocation2 + $0x388] ss:$28 sps:$4 sm:$0xff]   ;;  %v7955_v21 = vld [vmem:[#allocation2 + $0x3b8] ss:$28 sps:$4 sm:$0xff]   ;;  %v7958_v22 = vld [vmem:[#allocation2 + $0x3c0] ss:$28 sps:$4 sm:$0xff]  }
  0x99   :  { %2341 = vmatprep.mubr.bf16.mxu0 %v9322_v60  ;;  %2464 = vmatprep.mubr.bf16.mxu1 %v9322_v60  ;;  %v7960_v19 = vld [vmem:[#allocation2 + $0x3c4] ss:$28 sps:$4 sm:$0xff]   ;;  %v7963_v23 = vld [vmem:[#allocation2 + $0x3f4] ss:$28 sps:$4 sm:$0xff]   ;;  %v7966_v24 = vld [vmem:[#allocation2 + $0x3fc] ss:$28 sps:$4 sm:$0xff]  }
  0x9a   :  { %2322 = vmatpush1.bf16.msra.mxu0 %v7893_v26  ;;  %2445 = vmatpush1.bf16.msra.mxu1 %v7894_v27  ;;  %v7961_v25 = vld [vmem:[#allocation2 + $0x3f0] ss:$28 sps:$4 sm:$0xff]   ;;  %v7964_v26 = vld [vmem:[#allocation2 + $0x3f8] ss:$28 sps:$4 sm:$0xff]   ;;  %v7984_v36 = vld [vmem:[#allocation2 + $0x4a4] ss:$28 sps:$4 sm:$0xff]  }
  0x9b   :  { %2323 = vmatprep.subr.bf16.mxu0 %v7895_v28  ;;  %2446 = vmatprep.subr.bf16.mxu1 %v7897_v29  ;;  %v7969_v27 = vld [vmem:[#allocation2 + $0x42c] ss:$28 sps:$4 sm:$0xff]   ;;  %v7972_v28 = vld [vmem:[#allocation2 + $0x434] ss:$28 sps:$4 sm:$0xff]   ;;  %v7982_v38 = vld [vmem:[#allocation2 + $0x4a0] ss:$28 sps:$4 sm:$0xff]  }
  0x9c   :  { %v7967_v29 = vld [vmem:[#allocation2 + $0x428] ss:$28 sps:$4 sm:$0xff]   ;;  %v7979_v37 = vld [vmem:[#allocation2 + $0x498] ss:$28 sps:$4 sm:$0xff]   ;;  %v8009_v58 = vld [vmem:[#allocation2 + $0x5b0] ss:$28 sps:$4 sm:$0xff]  }
  0x9d   :  { %v7988_v42 = vld [vmem:[#allocation2 + $0x4d8] ss:$28 sps:$4 sm:$0xff]   ;;  %v8002_v49 = vld [vmem:[#allocation2 + $0x54c] ss:$28 sps:$4 sm:$0xff]  }
  0x9e   :  { %2324 = vmatpush1.bf16.msra.mxu0 %v7899_v30  ;;  %2447 = vmatpush1.bf16.msra.mxu1 %v7900_v31  ;;  %v7970_v30 = vld [vmem:[#allocation2 + $0x430] ss:$28 sps:$4 sm:$0xff]   ;;  %v7975_v31 = vld [vmem:[#allocation2 + $0x464] ss:$28 sps:$4 sm:$0xff]   ;;  %v8005_v52 = vld [vmem:[#allocation2 + $0x57c] ss:$28 sps:$4 sm:$0xff]  }
  0x9f   :  { %2325 = vmatprep.subr.bf16.mxu0 %v7901_v32  ;;  %2448 = vmatprep.subr.bf16.mxu1 %v7903_v33  ;;  %v7978_v32 = vld [vmem:[#allocation2 + $0x46c] ss:$28 sps:$4 sm:$0xff]   ;;  %v7973_v33 = vld [vmem:[#allocation2 + $0x460] ss:$28 sps:$4 sm:$0xff]   ;;  %v8003_v54 = vld [vmem:[#allocation2 + $0x578] ss:$28 sps:$4 sm:$0xff]  }
  0xa0   :  { %v8024_v4 = vld [vmem:[#allocation2 + $0x628] ss:$28 sps:$4 sm:$0xff]  }
  0xa1   :  { %v8041_v14 = vld [vmem:[#allocation2 + $0x6cc] ss:$28 sps:$4 sm:$0xff]  }
  0xa2   :  { %2326 = vmatpush1.bf16.msra.mxu0 %v7905_v34  ;;  %2449 = vmatpush1.bf16.msra.mxu1 %v7906_v35  ;;  %v7976_v34 = vld [vmem:[#allocation2 + $0x468] ss:$28 sps:$4 sm:$0xff]   ;;  %v7981_v35 = vld [vmem:[#allocation2 + $0x49c] ss:$28 sps:$4 sm:$0xff]  }
  0xa3   :  { %2327 = vmatprep.subr.bf16.mxu0 %v7907_v39  ;;  %2450 = vmatprep.subr.bf16.mxu1 %v7909_v40  ;;  %v7987_v39 = vld [vmem:[#allocation2 + $0x4d4] ss:$28 sps:$4 sm:$0xff]   ;;  %v7990_v40 = vld [vmem:[#allocation2 + $0x4dc] ss:$28 sps:$4 sm:$0xff]  }
  0xa6   :  { %2328 = vmatpush1.bf16.msra.mxu0 %v7911_v41  ;;  %2451 = vmatpush1.bf16.msra.mxu1 %v7912_v44  ;;  %v7985_v41 = vld [vmem:[#allocation2 + $0x4d0] ss:$28 sps:$4 sm:$0xff]  }
  0xa7   :  { %2329 = vmatprep.subr.bf16.mxu0 %v7913_v45  ;;  %2452 = vmatprep.subr.bf16.mxu1 %v7915_v46  ;;  %v7993_v44 = vld [vmem:[#allocation2 + $0x50c] ss:$28 sps:$4 sm:$0xff]   ;;  %v7996_v45 = vld [vmem:[#allocation2 + $0x514] ss:$28 sps:$4 sm:$0xff]  }
  0xa8   :  { %v7991_v46 = vld [vmem:[#allocation2 + $0x508] ss:$28 sps:$4 sm:$0xff]  }
  0xaa   :  { %2330 = vmatpush1.bf16.msra.mxu0 %v7917_v47  ;;  %2453 = vmatpush1.bf16.msra.mxu1 %v7918_v48  ;;  %v7994_v47 = vld [vmem:[#allocation2 + $0x510] ss:$28 sps:$4 sm:$0xff]   ;;  %v7999_v48 = vld [vmem:[#allocation2 + $0x544] ss:$28 sps:$4 sm:$0xff]  }
  0xab   :  { %2331 = vmatprep.subr.bf16.mxu0 %v7919_v50  ;;  %2454 = vmatprep.subr.bf16.mxu1 %v7921_v51  ;;  %v7997_v50 = vld [vmem:[#allocation2 + $0x540] ss:$28 sps:$4 sm:$0xff]   ;;  %v8000_v51 = vld [vmem:[#allocation2 + $0x548] ss:$28 sps:$4 sm:$0xff]  }
  0xae   :  { %2332 = vmatpush1.bf16.msra.mxu0 %v7923_v53  ;;  %2455 = vmatpush1.bf16.msra.mxu1 %v7924_v55  ;;  %v8008_v53 = vld [vmem:[#allocation2 + $0x584] ss:$28 sps:$4 sm:$0xff]  }
  0xaf   :  { %2333 = vmatprep.subr.bf16.mxu0 %v7925_v56  ;;  %2456 = vmatprep.subr.bf16.mxu1 %v7927_v57  ;;  %v8006_v55 = vld [vmem:[#allocation2 + $0x580] ss:$28 sps:$4 sm:$0xff]   ;;  %v8011_v56 = vld [vmem:[#allocation2 + $0x5b4] ss:$28 sps:$4 sm:$0xff]  }
  0xb0   :  { %v8014_v57 = vld [vmem:[#allocation2 + $0x5bc] ss:$28 sps:$4 sm:$0xff]  }
  0xb2   :  { %2334 = vmatpush1.bf16.msra.mxu0 %v7929_v59  ;;  %2457 = vmatpush1.bf16.msra.mxu1 %v7930_v61  ;;  %v8012_v59 = vld [vmem:[#allocation2 + $0x5b8] ss:$28 sps:$4 sm:$0xff]   ;;  %v8017_v61 = vld [vmem:[#allocation2 + $0x5ec] ss:$28 sps:$4 sm:$0xff]  }
  0xb3   :  { %2335 = vmatprep.subr.bf16.mxu0 %v7931_v62  ;;  %2458 = vmatprep.subr.bf16.mxu1 %v7933_v63  ;;  %v8020_v62 = vld [vmem:[#allocation2 + $0x5f4] ss:$28 sps:$4 sm:$0xff]   ;;  %v8015_v63 = vld [vmem:[#allocation2 + $0x5e8] ss:$28 sps:$4 sm:$0xff]  }
  0xb6   :  { %2336 = vmatpush1.bf16.msra.mxu0 %v7935_v0  ;;  %2459 = vmatpush1.bf16.msra.mxu1 %v7936_v1  ;;  %v8018_v0 = vld [vmem:[#allocation2 + $0x5f0] ss:$28 sps:$4 sm:$0xff]   ;;  %v8023_v1 = vld [vmem:[#allocation2 + $0x624] ss:$28 sps:$4 sm:$0xff]  }
  0xb7   :  { %2337 = vmatprep.subr.bf16.mxu0 %v7937_v2  ;;  %2460 = vmatprep.subr.bf16.mxu1 %v7939_v3  ;;  %v8026_v2 = vld [vmem:[#allocation2 + $0x62c] ss:$28 sps:$4 sm:$0xff]   ;;  %v8021_v3 = vld [vmem:[#allocation2 + $0x620] ss:$28 sps:$4 sm:$0xff]  }
  0xba   :  { %2338 = vmatpush1.bf16.msra.mxu0 %v7941_v5  ;;  %2461 = vmatpush1.bf16.msra.mxu1 %v7942_v6  ;;  %v8029_v5 = vld [vmem:[#allocation2 + $0x65c] ss:$28 sps:$4 sm:$0xff]   ;;  %v8032_v6 = vld [vmem:[#allocation2 + $0x664] ss:$28 sps:$4 sm:$0xff]  }
  0xbb   :  { %2339 = vmatprep.subr.bf16.mxu0 %v7943_v7  ;;  %2462 = vmatprep.subr.bf16.mxu1 %v7945_v8  ;;  %v8027_v7 = vld [vmem:[#allocation2 + $0x658] ss:$28 sps:$4 sm:$0xff]   ;;  %v8030_v8 = vld [vmem:[#allocation2 + $0x660] ss:$28 sps:$4 sm:$0xff]  }
  0xbe   :  { %2340 = vmatpush1.bf16.msra.mxu0 %v7947_v10  ;;  %2463 = vmatpush1.bf16.msra.mxu1 %v7948_v11  ;;  %v8035_v10 = vld [vmem:[#allocation2 + $0x694] ss:$28 sps:$4 sm:$0xff]   ;;  %v8038_v11 = vld [vmem:[#allocation2 + $0x69c] ss:$28 sps:$4 sm:$0xff]  }
  0xbf   :  { %2350 = vmatprep.subr.bf16.mxu0 %v7951_v12  ;;  %2473 = vmatprep.subr.bf16.mxu1 %v7954_v13  ;;  %v8033_v12 = vld [vmem:[#allocation2 + $0x690] ss:$28 sps:$4 sm:$0xff]   ;;  %v8036_v13 = vld [vmem:[#allocation2 + $0x698] ss:$28 sps:$4 sm:$0xff]  }
  0xc1   :  { %2342 = vmatmul.mubr.bf16.vlgmr.msra.gmra.mrb[0].mxu0 %v9330_v16  ;;  %2465 = vmatmul.mubr.bf16.vlgmr.msra.gmra.mrb[0].mxu1 %v9330_v16 }
  0xc2   :  { %2351 = vmatpush1.bf16.msra.mxu0 %v7949_v15  ;;  %2474 = vmatpush1.bf16.msra.mxu1 %v7952_v17  ;;  %v8044_v15 = vld [vmem:[#allocation2 + $0x6d4] ss:$28 sps:$4 sm:$0xff]   ;;  %v8039_v17 = vld [vmem:[#allocation2 + $0x6c8] ss:$28 sps:$4 sm:$0xff]  }
  0xc3   :  { %2352 = vmatprep.subr.bf16.mxu0 %v7957_v18  ;;  %2475 = vmatprep.subr.bf16.mxu1 %v7960_v19  ;;  %v8042_v18 = vld [vmem:[#allocation2 + $0x6d0] ss:$28 sps:$4 sm:$0xff]   ;;  %v8048_v19 = vld [vmem:[#allocation2 + $0x704] ss:$28 sps:$4 sm:$0xff]  }
  0xc4   :  { %2382 = vmatprep.mubr.bf16.mxu0 %v9332_v20  ;;  %2505 = vmatprep.mubr.bf16.mxu1 %v9332_v20 }
  0xc6   :  { %2353 = vmatpush1.bf16.msra.mxu0 %v7955_v21  ;;  %2476 = vmatpush1.bf16.msra.mxu1 %v7958_v22  ;;  %v8051_v21 = vld [vmem:[#allocation2 + $0x70c] ss:$28 sps:$4 sm:$0xff]   ;;  %v8046_v22 = vld [vmem:[#allocation2 + $0x700] ss:$28 sps:$4 sm:$0xff]  }
  0xc7   :  { %2354 = vmatprep.subr.bf16.mxu0 %v7963_v23  ;;  %2477 = vmatprep.subr.bf16.mxu1 %v7966_v24  ;;  %v8049_v23 = vld [vmem:[#allocation2 + $0x708] ss:$28 sps:$4 sm:$0xff]   ;;  %v9340_v24 = vpack.c.bf16 %v9326_v9, %v9326_v9  ;;  %v8052_v9 = vld [vmem:[#allocation2 + $0x738] ss:$28 sps:$4 sm:$0xff]  }
  0xca   :  { %2355 = vmatpush1.bf16.msra.mxu0 %v7961_v25  ;;  %2478 = vmatpush1.bf16.msra.mxu1 %v7964_v26  ;;  %v8054_v25 = vld [vmem:[#allocation2 + $0x73c] ss:$28 sps:$4 sm:$0xff]   ;;  %v9345_v26 = vld.sshfl [vmem:[%s9486_s0 + $0x8] sm:$0x33 pattern:$0x76325410] }
  0xcb   :  { %2356 = vmatprep.subr.bf16.mxu0 %v7969_v27  ;;  %2479 = vmatprep.subr.bf16.mxu1 %v7972_v28  ;;  %v8057_v27 = vld [vmem:[#allocation2 + $0x744] ss:$28 sps:$4 sm:$0xff]   ;;  %v147_v28 = vcombine.high %v9345_v26, %v9345_v26 }
  0xce   :  { %2357 = vmatpush1.bf16.msra.mxu0 %v7967_v29  ;;  %2480 = vmatpush1.bf16.msra.mxu1 %v7970_v30  ;;  %v9351_v29 = vpack.c.bf16 %v147_v28, %v147_v28  ;;  %v8055_v30 = vld [vmem:[#allocation2 + $0x740] ss:$28 sps:$4 sm:$0xff]   ;;  %v8136_v28 = vld [vmem:[#allocation2 + $0xa48] ss:$28 sps:$4 sm:$0xff]  }
  0xcf   :  { %2358 = vmatprep.subr.bf16.mxu0 %v7975_v31  ;;  %2481 = vmatprep.subr.bf16.mxu1 %v7978_v32  ;;  %v8060_v31 = vld [vmem:[#allocation2 + $0x774] ss:$28 sps:$4 sm:$0xff]   ;;  %v8063_v32 = vld [vmem:[#allocation2 + $0x77c] ss:$28 sps:$4 sm:$0xff]  }
  0xd2   :  { %2359 = vmatpush1.bf16.msra.mxu0 %v7973_v33  ;;  %2482 = vmatpush1.bf16.msra.mxu1 %v7976_v34  ;;  %v8058_v33 = vld [vmem:[#allocation2 + $0x770] ss:$28 sps:$4 sm:$0xff]   ;;  %v8061_v34 = vld [vmem:[#allocation2 + $0x778] ss:$28 sps:$4 sm:$0xff]  }
  0xd3   :  { %2360 = vmatprep.subr.bf16.mxu0 %v7981_v35  ;;  %2483 = vmatprep.subr.bf16.mxu1 %v7984_v36  ;;  %v8066_v35 = vld [vmem:[#allocation2 + $0x7ac] ss:$28 sps:$4 sm:$0xff]   ;;  %v8069_v36 = vld [vmem:[#allocation2 + $0x7b4] ss:$28 sps:$4 sm:$0xff]  }
  0xd6   :  { %2361 = vmatpush1.bf16.msra.mxu0 %v7979_v37  ;;  %2484 = vmatpush1.bf16.msra.mxu1 %v7982_v38  ;;  %v8064_v37 = vld [vmem:[#allocation2 + $0x7a8] ss:$28 sps:$4 sm:$0xff]   ;;  %v8067_v38 = vld [vmem:[#allocation2 + $0x7b0] ss:$28 sps:$4 sm:$0xff]  }
  0xd7   :  { %2362 = vmatprep.subr.bf16.mxu0 %v7987_v39  ;;  %2485 = vmatprep.subr.bf16.mxu1 %v7990_v40  ;;  %v8072_v39 = vld [vmem:[#allocation2 + $0x7e4] ss:$28 sps:$4 sm:$0xff]   ;;  %v8075_v40 = vld [vmem:[#allocation2 + $0x7ec] ss:$28 sps:$4 sm:$0xff]  }
  0xda   :  { %2363 = vmatpush1.bf16.msra.mxu0 %v7985_v41  ;;  %2486 = vmatpush1.bf16.msra.mxu1 %v7988_v42  ;;  %v8070_v41 = vld [vmem:[#allocation2 + $0x7e0] ss:$28 sps:$4 sm:$0xff]   ;;  %v8073_v42 = vld [vmem:[#allocation2 + $0x7e8] ss:$28 sps:$4 sm:$0xff]  }
  0xdb   :  { %2364 = vmatprep.subr.bf16.mxu0 %v7993_v44  ;;  %2487 = vmatprep.subr.bf16.mxu1 %v7996_v45  ;;  %v8078_v44 = vld [vmem:[#allocation2 + $0x81c] ss:$28 sps:$4 sm:$0xff]   ;;  %v8081_v45 = vld [vmem:[#allocation2 + $0x824] ss:$28 sps:$4 sm:$0xff]  }
  0xde   :  { %2365 = vmatpush1.bf16.msra.mxu0 %v7991_v46  ;;  %2488 = vmatpush1.bf16.msra.mxu1 %v7994_v47  ;;  %v8076_v46 = vld [vmem:[#allocation2 + $0x818] ss:$28 sps:$4 sm:$0xff]   ;;  %v8079_v47 = vld [vmem:[#allocation2 + $0x820] ss:$28 sps:$4 sm:$0xff]  }
  0xdf   :  { %2366 = vmatprep.subr.bf16.mxu0 %v7999_v48  ;;  %2489 = vmatprep.subr.bf16.mxu1 %v8002_v49  ;;  %v8084_v48 = vld [vmem:[#allocation2 + $0x854] ss:$28 sps:$4 sm:$0xff]   ;;  %v8087_v49 = vld [vmem:[#allocation2 + $0x85c] ss:$28 sps:$4 sm:$0xff]  }
  0xe2   :  { %2367 = vmatpush1.bf16.msra.mxu0 %v7997_v50  ;;  %2490 = vmatpush1.bf16.msra.mxu1 %v8000_v51  ;;  %v8082_v50 = vld [vmem:[#allocation2 + $0x850] ss:$28 sps:$4 sm:$0xff]   ;;  %v8085_v51 = vld [vmem:[#allocation2 + $0x858] ss:$28 sps:$4 sm:$0xff]  }
  0xe3   :  { %2368 = vmatprep.subr.bf16.mxu0 %v8005_v52  ;;  %2491 = vmatprep.subr.bf16.mxu1 %v8008_v53  ;;  %v8090_v52 = vld [vmem:[#allocation2 + $0x88c] ss:$28 sps:$4 sm:$0xff]   ;;  %v8093_v53 = vld [vmem:[#allocation2 + $0x894] ss:$28 sps:$4 sm:$0xff]  }
  0xe6   :  { %2369 = vmatpush1.bf16.msra.mxu0 %v8003_v54  ;;  %2492 = vmatpush1.bf16.msra.mxu1 %v8006_v55  ;;  %v8088_v54 = vld [vmem:[#allocation2 + $0x888] ss:$28 sps:$4 sm:$0xff]   ;;  %v8091_v55 = vld [vmem:[#allocation2 + $0x890] ss:$28 sps:$4 sm:$0xff]  }
  0xe7   :  { %2370 = vmatprep.subr.bf16.mxu0 %v8011_v56  ;;  %2493 = vmatprep.subr.bf16.mxu1 %v8014_v57  ;;  %v8096_v56 = vld [vmem:[#allocation2 + $0x8c4] ss:$28 sps:$4 sm:$0xff]   ;;  %v8099_v57 = vld [vmem:[#allocation2 + $0x8cc] ss:$28 sps:$4 sm:$0xff]  }
  0xea   :  { %2371 = vmatpush1.bf16.msra.mxu0 %v8009_v58  ;;  %2494 = vmatpush1.bf16.msra.mxu1 %v8012_v59  ;;  %v8094_v58 = vld [vmem:[#allocation2 + $0x8c0] ss:$28 sps:$4 sm:$0xff]   ;;  %v8097_v59 = vld [vmem:[#allocation2 + $0x8c8] ss:$28 sps:$4 sm:$0xff]  }
  0xeb   :  { %2372 = vmatprep.subr.bf16.mxu0 %v8017_v61  ;;  %2495 = vmatprep.subr.bf16.mxu1 %v8020_v62  ;;  %v8102_v61 = vld [vmem:[#allocation2 + $0x8fc] ss:$28 sps:$4 sm:$0xff]   ;;  %v8105_v62 = vld [vmem:[#allocation2 + $0x904] ss:$28 sps:$4 sm:$0xff]  }
  0xee   :  { %2373 = vmatpush1.bf16.msra.mxu0 %v8015_v63  ;;  %2496 = vmatpush1.bf16.msra.mxu1 %v8018_v0  ;;  %v8100_v63 = vld [vmem:[#allocation2 + $0x8f8] ss:$28 sps:$4 sm:$0xff]   ;;  %v8103_v0 = vld [vmem:[#allocation2 + $0x900] ss:$28 sps:$4 sm:$0xff]  }
  0xef   :  { %2374 = vmatprep.subr.bf16.mxu0 %v8023_v1  ;;  %2497 = vmatprep.subr.bf16.mxu1 %v8026_v2  ;;  %v8108_v1 = vld [vmem:[#allocation2 + $0x934] ss:$28 sps:$4 sm:$0xff]   ;;  %v8111_v2 = vld [vmem:[#allocation2 + $0x93c] ss:$28 sps:$4 sm:$0xff]  }
  0xf2   :  { %2375 = vmatpush1.bf16.msra.mxu0 %v8021_v3  ;;  %2498 = vmatpush1.bf16.msra.mxu1 %v8024_v4  ;;  %v8106_v3 = vld [vmem:[#allocation2 + $0x930] ss:$28 sps:$4 sm:$0xff]   ;;  %v8109_v4 = vld [vmem:[#allocation2 + $0x938] ss:$28 sps:$4 sm:$0xff]  }
  0xf3   :  { %2376 = vmatprep.subr.bf16.mxu0 %v8029_v5  ;;  %2499 = vmatprep.subr.bf16.mxu1 %v8032_v6  ;;  %v8114_v5 = vld [vmem:[#allocation2 + $0x96c] ss:$28 sps:$4 sm:$0xff]   ;;  %v8117_v6 = vld [vmem:[#allocation2 + $0x974] ss:$28 sps:$4 sm:$0xff]  }
  0xf6   :  { %2377 = vmatpush1.bf16.msra.mxu0 %v8027_v7  ;;  %2500 = vmatpush1.bf16.msra.mxu1 %v8030_v8  ;;  %v8112_v7 = vld [vmem:[#allocation2 + $0x968] ss:$28 sps:$4 sm:$0xff]   ;;  %v8115_v8 = vld [vmem:[#allocation2 + $0x970] ss:$28 sps:$4 sm:$0xff]  }
  0xf7   :  { %2378 = vmatprep.subr.bf16.mxu0 %v8035_v10  ;;  %2501 = vmatprep.subr.bf16.mxu1 %v8038_v11  ;;  %v8120_v10 = vld [vmem:[#allocation2 + $0x9a4] ss:$28 sps:$4 sm:$0xff]   ;;  %v8123_v11 = vld [vmem:[#allocation2 + $0x9ac] ss:$28 sps:$4 sm:$0xff]  }
  0xfa   :  { %2379 = vmatpush1.bf16.msra.mxu0 %v8033_v12  ;;  %2502 = vmatpush1.bf16.msra.mxu1 %v8036_v13  ;;  %v8118_v12 = vld [vmem:[#allocation2 + $0x9a0] ss:$28 sps:$4 sm:$0xff]   ;;  %v8121_v13 = vld [vmem:[#allocation2 + $0x9a8] ss:$28 sps:$4 sm:$0xff]  }
  0xfb   :  { %2380 = vmatprep.subr.bf16.mxu0 %v8041_v14  ;;  %2503 = vmatprep.subr.bf16.mxu1 %v8044_v15  ;;  %v8126_v14 = vld [vmem:[#allocation2 + $0x9dc] ss:$28 sps:$4 sm:$0xff]   ;;  %v8129_v15 = vld [vmem:[#allocation2 + $0x9e4] ss:$28 sps:$4 sm:$0xff]  }
  0xfe   :  { %2381 = vmatpush1.bf16.msra.mxu0 %v8039_v17  ;;  %2504 = vmatpush1.bf16.msra.mxu1 %v8042_v18  ;;  %v8124_v17 = vld [vmem:[#allocation2 + $0x9d8] ss:$28 sps:$4 sm:$0xff]   ;;  %v8127_v18 = vld [vmem:[#allocation2 + $0x9e0] ss:$28 sps:$4 sm:$0xff]  }
  0xff   :  { %2391 = vmatprep.subr.bf16.mxu0 %v8048_v19  ;;  %2514 = vmatprep.subr.bf16.mxu1 %v8051_v21  ;;  %v8132_v19 = vld [vmem:[#allocation2 + $0xa14] ss:$28 sps:$4 sm:$0xff]   ;;  %v8135_v21 = vld [vmem:[#allocation2 + $0xa1c] ss:$28 sps:$4 sm:$0xff]  }
 0x101   :  { %2383 = vmatmul.mubr.bf16.vlgmr.msra.gmra.mrb[0].mxu0 %v9340_v24  ;;  %2506 = vmatmul.mubr.bf16.vlgmr.msra.gmra.mrb[0].mxu1 %v9340_v24 }
 0x102   :  { %2392 = vmatpush1.bf16.msra.mxu0 %v8046_v22  ;;  %2515 = vmatpush1.bf16.msra.mxu1 %v8049_v23  ;;  %v8130_v22 = vld [vmem:[#allocation2 + $0xa10] ss:$28 sps:$4 sm:$0xff]   ;;  %v8133_v23 = vld [vmem:[#allocation2 + $0xa18] ss:$28 sps:$4 sm:$0xff]  }
 0x103   :  { %2393 = vmatprep.subr.bf16.mxu0 %v8054_v25  ;;  %2516 = vmatprep.subr.bf16.mxu1 %v8057_v27  ;;  %v8138_v25 = vld [vmem:[#allocation2 + $0xa4c] ss:$28 sps:$4 sm:$0xff]   ;;  %v8141_v27 = vld [vmem:[#allocation2 + $0xa54] ss:$28 sps:$4 sm:$0xff]  }
 0x104   :  { %2423 = vmatprep.mubr.bf16.mxu0 %v9351_v29  ;;  %2546 = vmatprep.mubr.bf16.mxu1 %v9351_v29 }
 0x106   :  { %2394 = vmatpush1.bf16.msra.mxu0 %v8052_v9  ;;  %2517 = vmatpush1.bf16.msra.mxu1 %v8055_v30  ;;  %v8139_v9 = vld [vmem:[#allocation2 + $0xa50] ss:$28 sps:$4 sm:$0xff]  }
 0x107   :  { %2395 = vmatprep.subr.bf16.mxu0 %v8060_v31  ;;  %2518 = vmatprep.subr.bf16.mxu1 %v8063_v32  ;;  %v8144_v30 = vld [vmem:[#allocation2 + $0x14] ss:$28 sps:$4 sm:$0xff]   ;;  %v9357_v32 = vpack.c.bf16 %v9345_v26, %v9345_v26  ;;  %v8200_v26 = vld [vmem:[#allocation2 + $0x248] ss:$28 sps:$4 sm:$0xff]  }
 0x108   :  { %v8190_v31 = vld [vmem:[#allocation2 + $0x1d8] ss:$28 sps:$4 sm:$0xff]  }
 0x10a   :  { %2396 = vmatpush1.bf16.msra.mxu0 %v8058_v33  ;;  %2519 = vmatpush1.bf16.msra.mxu1 %v8061_v34  ;;  %v8142_v33 = vld [vmem:[#allocation2 + $0x10] ss:$28 sps:$4 sm:$0xff]   ;;  %v8191_v34 = vld [vmem:[#allocation2 + $0x18] ss:$28 sps:$4 sm:$0xff]  }
 0x10b   :  { %2397 = vmatprep.subr.bf16.mxu0 %v8066_v35  ;;  %2520 = vmatprep.subr.bf16.mxu1 %v8069_v36  ;;  %v8147_v35 = vld [vmem:[#allocation2 + $0x4c] ss:$28 sps:$4 sm:$0xff]  }
 0x10c   :  { %v8195_v36 = vld [vmem:[#allocation2 + $0x210] ss:$28 sps:$4 sm:$0xff]  }
 0x10e   :  { %2398 = vmatpush1.bf16.msra.mxu0 %v8064_v37  ;;  %2521 = vmatpush1.bf16.msra.mxu1 %v8067_v38  ;;  %v8145_v37 = vld [vmem:[#allocation2 + $0x48] ss:$28 sps:$4 sm:$0xff]  }
 0x10f   :  { %2399 = vmatprep.subr.bf16.mxu0 %v8072_v39  ;;  %2522 = vmatprep.subr.bf16.mxu1 %v8075_v40  ;;  %v8150_v38 = vld [vmem:[#allocation2 + $0x84] ss:$28 sps:$4 sm:$0xff]   ;;  %v8196_v39 = vld [vmem:[#allocation2 + $0x50] ss:$28 sps:$4 sm:$0xff]  }
 0x110   :  { %v8148_v40 = vld [vmem:[#allocation2 + $0x80] ss:$28 sps:$4 sm:$0xff]  }
 0x112   :  { %2400 = vmatpush1.bf16.msra.mxu0 %v8070_v41  ;;  %2523 = vmatpush1.bf16.msra.mxu1 %v8073_v42  ;;  %v8153_v41 = vld [vmem:[#allocation2 + $0xbc] ss:$28 sps:$4 sm:$0xff]   ;;  %v8201_v42 = vld [vmem:[#allocation2 + $0x88] ss:$28 sps:$4 sm:$0xff]  }
 0x113   :  { %2401 = vmatprep.subr.bf16.mxu0 %v8078_v44  ;;  %2524 = vmatprep.subr.bf16.mxu1 %v8081_v45  ;;  %v8205_v44 = vld [vmem:[#allocation2 + $0x280] ss:$28 sps:$4 sm:$0xff]   ;;  %v8151_v45 = vld [vmem:[#allocation2 + $0xb8] ss:$28 sps:$4 sm:$0xff]  }
 0x116   :  { %2402 = vmatpush1.bf16.msra.mxu0 %v8076_v46  ;;  %2525 = vmatpush1.bf16.msra.mxu1 %v8079_v47  ;;  %v8156_v46 = vld [vmem:[#allocation2 + $0xf4] ss:$28 sps:$4 sm:$0xff]   ;;  %v8206_v47 = vld [vmem:[#allocation2 + $0xc0] ss:$28 sps:$4 sm:$0xff]  }
 0x117   :  { %2403 = vmatprep.subr.bf16.mxu0 %v8084_v48  ;;  %2526 = vmatprep.subr.bf16.mxu1 %v8087_v49  ;;  %v8210_v48 = vld [vmem:[#allocation2 + $0x2b8] ss:$28 sps:$4 sm:$0xff]   ;;  %v8154_v49 = vld [vmem:[#allocation2 + $0xf0] ss:$28 sps:$4 sm:$0xff]  }
 0x11a   :  { %2404 = vmatpush1.bf16.msra.mxu0 %v8082_v50  ;;  %2527 = vmatpush1.bf16.msra.mxu1 %v8085_v51  ;;  %v8159_v50 = vld [vmem:[#allocation2 + $0x12c] ss:$28 sps:$4 sm:$0xff]  }
 0x11b   :  { %2405 = vmatprep.subr.bf16.mxu0 %v8090_v52  ;;  %2528 = vmatprep.subr.bf16.mxu1 %v8093_v53  ;;  %v8215_v51 = vld [vmem:[#allocation2 + $0x2f0] ss:$28 sps:$4 sm:$0xff]   ;;  %v8157_v52 = vld [vmem:[#allocation2 + $0x128] ss:$28 sps:$4 sm:$0xff]  }
 0x11c   :  { %v8216_v53 = vld [vmem:[#allocation2 + $0x130] ss:$28 sps:$4 sm:$0xff]  }
 0x11e   :  { %2406 = vmatpush1.bf16.msra.mxu0 %v8088_v54  ;;  %2529 = vmatpush1.bf16.msra.mxu1 %v8091_v55  ;;  %v8162_v54 = vld [vmem:[#allocation2 + $0x164] ss:$28 sps:$4 sm:$0xff]  }
 0x11f   :  { %2407 = vmatprep.subr.bf16.mxu0 %v8096_v56  ;;  %2530 = vmatprep.subr.bf16.mxu1 %v8099_v57  ;;  %v8220_v55 = vld [vmem:[#allocation2 + $0x328] ss:$28 sps:$4 sm:$0xff]   ;;  %v8160_v56 = vld [vmem:[#allocation2 + $0x160] ss:$28 sps:$4 sm:$0xff]  }
 0x120   :  { %v8165_v57 = vld [vmem:[#allocation2 + $0x19c] ss:$28 sps:$4 sm:$0xff]  }
 0x122   :  { %2408 = vmatpush1.bf16.msra.mxu0 %v8094_v58  ;;  %2531 = vmatpush1.bf16.msra.mxu1 %v8097_v59  ;;  %v8221_v58 = vld [vmem:[#allocation2 + $0x168] ss:$28 sps:$4 sm:$0xff]   ;;  %v8225_v59 = vld [vmem:[#allocation2 + $0x360] ss:$28 sps:$4 sm:$0xff]  }
 0x123   :  { %2409 = vmatprep.subr.bf16.mxu0 %v8102_v61  ;;  %2532 = vmatprep.subr.bf16.mxu1 %v8105_v62  ;;  %v8163_v61 = vld [vmem:[#allocation2 + $0x198] ss:$28 sps:$4 sm:$0xff]  }
 0x124   :  { %v8168_v62 = vld [vmem:[#allocation2 + $0x1d4] ss:$28 sps:$4 sm:$0xff]  }
 0x126   :  { %2410 = vmatpush1.bf16.msra.mxu0 %v8100_v63  ;;  %2533 = vmatpush1.bf16.msra.mxu1 %v8103_v0  ;;  %v8226_v63 = vld [vmem:[#allocation2 + $0x1a0] ss:$28 sps:$4 sm:$0xff]   ;;  %v8230_v0 = vld [vmem:[#allocation2 + $0x558] ss:$28 sps:$4 sm:$0xff]  }
 0x127   :  { %2411 = vmatprep.subr.bf16.mxu0 %v8108_v1  ;;  %2534 = vmatprep.subr.bf16.mxu1 %v8111_v2  ;;  %v8166_v1 = vld [vmem:[#allocation2 + $0x1d0] ss:$28 sps:$4 sm:$0xff]  }
 0x128   :  { %v8171_v2 = vld [vmem:[#allocation2 + $0x20c] ss:$28 sps:$4 sm:$0xff]  }
 0x12a   :  { %2412 = vmatpush1.bf16.msra.mxu0 %v8106_v3  ;;  %2535 = vmatpush1.bf16.msra.mxu1 %v8109_v4  ;;  %v8231_v3 = vld [vmem:[#allocation2 + $0x398] ss:$28 sps:$4 sm:$0xff]   ;;  %v8235_v4 = vld [vmem:[#allocation2 + $0x590] ss:$28 sps:$4 sm:$0xff]  }
 0x12b   :  { %2413 = vmatprep.subr.bf16.mxu0 %v8114_v5  ;;  %2536 = vmatprep.subr.bf16.mxu1 %v8117_v6  ;;  %v8169_v5 = vld [vmem:[#allocation2 + $0x208] ss:$28 sps:$4 sm:$0xff]  }
 0x12c   :  { %v8174_v6 = vld [vmem:[#allocation2 + $0x244] ss:$28 sps:$4 sm:$0xff]  }
 0x12e   :  { %2414 = vmatpush1.bf16.msra.mxu0 %v8112_v7  ;;  %2537 = vmatpush1.bf16.msra.mxu1 %v8115_v8  ;;  %v8236_v7 = vld [vmem:[#allocation2 + $0x3d0] ss:$28 sps:$4 sm:$0xff]   ;;  %v8240_v8 = vld [vmem:[#allocation2 + $0x5c8] ss:$28 sps:$4 sm:$0xff]  }
 0x12f   :  { %2415 = vmatprep.subr.bf16.mxu0 %v8120_v10  ;;  %2538 = vmatprep.subr.bf16.mxu1 %v8123_v11  ;;  %v8172_v10 = vld [vmem:[#allocation2 + $0x240] ss:$28 sps:$4 sm:$0xff]  }
 0x130   :  { %v8177_v11 = vld [vmem:[#allocation2 + $0x27c] ss:$28 sps:$4 sm:$0xff]  }
 0x132   :  { %2416 = vmatpush1.bf16.msra.mxu0 %v8118_v12  ;;  %2539 = vmatpush1.bf16.msra.mxu1 %v8121_v13  ;;  %v8241_v12 = vld [vmem:[#allocation2 + $0x408] ss:$28 sps:$4 sm:$0xff]   ;;  %v8245_v13 = vld [vmem:[#allocation2 + $0x600] ss:$28 sps:$4 sm:$0xff]  }
 0x133   :  { %2417 = vmatprep.subr.bf16.mxu0 %v8126_v14  ;;  %2540 = vmatprep.subr.bf16.mxu1 %v8129_v15  ;;  %v8175_v14 = vld [vmem:[#allocation2 + $0x278] ss:$28 sps:$4 sm:$0xff]  }
 0x134   :  { %v8180_v15 = vld [vmem:[#allocation2 + $0x2b4] ss:$28 sps:$4 sm:$0xff]  }
 0x136   :  { %2418 = vmatpush1.bf16.msra.mxu0 %v8124_v17  ;;  %2541 = vmatpush1.bf16.msra.mxu1 %v8127_v18  ;;  %v8246_v17 = vld [vmem:[#allocation2 + $0x440] ss:$28 sps:$4 sm:$0xff]   ;;  %v8250_v18 = vld [vmem:[#allocation2 + $0x638] ss:$28 sps:$4 sm:$0xff]  }
 0x137   :  { %2419 = vmatprep.subr.bf16.mxu0 %v8132_v19  ;;  %2542 = vmatprep.subr.bf16.mxu1 %v8135_v21  ;;  %v8178_v19 = vld [vmem:[#allocation2 + $0x2b0] ss:$28 sps:$4 sm:$0xff]  }
 0x138   :  { %v8183_v21 = vld [vmem:[#allocation2 + $0x2ec] ss:$28 sps:$4 sm:$0xff]  }
 0x13a   :  { %2420 = vmatpush1.bf16.msra.mxu0 %v8130_v22  ;;  %2543 = vmatpush1.bf16.msra.mxu1 %v8133_v23  ;;  %v8251_v22 = vld [vmem:[#allocation2 + $0x478] ss:$28 sps:$4 sm:$0xff]   ;;  %v8255_v23 = vld [vmem:[#allocation2 + $0x670] ss:$28 sps:$4 sm:$0xff]  }
 0x13b   :  { %2421 = vmatprep.subr.bf16.mxu0 %v8138_v25  ;;  %2544 = vmatprep.subr.bf16.mxu1 %v8141_v27  ;;  %v8181_v25 = vld [vmem:[#allocation2 + $0x2e8] ss:$28 sps:$4 sm:$0xff]  }
 0x13c   :  { %v8186_v27 = vld [vmem:[#allocation2 + $0x324] ss:$28 sps:$4 sm:$0xff]  }
 0x13e   :  { %2422 = vmatpush1.bf16.msra.mxu0 %v8136_v28  ;;  %2545 = vmatpush1.bf16.msra.mxu1 %v8139_v9  ;;  %v8256_v28 = vld [vmem:[#allocation2 + $0x4b0] ss:$28 sps:$4 sm:$0xff]   ;;  %v8260_v9 = vld [vmem:[#allocation2 + $0x6a8] ss:$28 sps:$4 sm:$0xff]  }
 0x13f   :  { %2555 = vmatprep.subr.bf16.mxu0 %v8144_v30  ;;  %7551 = vmatprep.subr.bf16.mxu1 %v8190_v31  ;;  %v8184_v30 = vld [vmem:[#allocation2 + $0x320] ss:$28 sps:$4 sm:$0xff]  }
 0x140   :  { %v8189_v31 = vld [vmem:[#allocation2 + $0x35c] ss:$28 sps:$4 sm:$0xff]  }
 0x141   :  { %2424 = vmatmul.mubr.bf16.vlgmr.msra.gmra.mrb[0].mxu0 %v9357_v32  ;;  %2547 = vmatmul.mubr.bf16.vlgmr.msra.gmra.mrb[0].mxu1 %v9357_v32 }
 0x142   :  { %2556 = vmatpush1.bf16.msra.mxu0 %v8142_v33  ;;  %7552 = vmatpush3.bf16.msra.mxu1 %v8191_v34  ;;  %v8261_v33 = vld [vmem:[#allocation2 + $0x4e8] ss:$28 sps:$4 sm:$0xff]   ;;  %v8265_v34 = vld [vmem:[#allocation2 + $0x6e0] ss:$28 sps:$4 sm:$0xff]  }
 0x143   :  { %2557 = vmatprep.subr.bf16.mxu0 %v8147_v35  ;;  %2587 = vmatprep.mubr.bf16.mxu0 %v9322_v60  ;;  %v8187_v35 = vld [vmem:[#allocation2 + $0x358] ss:$28 sps:$4 sm:$0xff]  }
 0x144   :  { %7553 = vmatprep.subr.bf16.mxu1 %v8195_v36  ;;  %2710 = vmatprep.mubr.bf16.mxu1 %v9322_v60  ;;  %v8211_v60 = vld [vmem:[#allocation2 + $0xf8] ss:$28 sps:$4 sm:$0xff]   ;;  %v8266_v36 = vld [vmem:[#allocation2 + $0x520] ss:$28 sps:$4 sm:$0xff]  }
 0x146   :  { %2558 = vmatpush1.bf16.msra.mxu0 %v8145_v37  ;;  %7554 = vmatpush3.bf16.msra.mxu1 %v8196_v39  ;;  %v8194_v37 = vld [vmem:[#allocation2 + $0x394] ss:$28 sps:$4 sm:$0xff]  }
 0x147   :  { %2559 = vmatprep.subr.bf16.mxu0 %v8150_v38  ;;  %7555 = vmatprep.subr.bf16.mxu1 %v8200_v26  ;;  %v8270_v38 = vld [vmem:[#allocation2 + $0x8d8] ss:$28 sps:$4 sm:$0xff]   ;;  %v8192_v39 = vld [vmem:[#allocation2 + $0x390] ss:$28 sps:$4 sm:$0xff]  }
 0x148   :  { %v8271_v26 = vld [vmem:[#allocation2 + $0x718] ss:$28 sps:$4 sm:$0xff]  }
 0x14a   :  { %2560 = vmatpush1.bf16.msra.mxu0 %v8148_v40  ;;  %7556 = vmatpush3.bf16.msra.mxu1 %v8201_v42  ;;  %v8199_v40 = vld [vmem:[#allocation2 + $0x3cc] ss:$28 sps:$4 sm:$0xff]  }
 0x14b   :  { %2561 = vmatprep.subr.bf16.mxu0 %v8153_v41  ;;  %7557 = vmatprep.subr.bf16.mxu1 %v8205_v44  ;;  %v8275_v41 = vld [vmem:[#allocation2 + $0x910] ss:$28 sps:$4 sm:$0xff]   ;;  %v8197_v42 = vld [vmem:[#allocation2 + $0x3c8] ss:$28 sps:$4 sm:$0xff]  }
 0x14c   :  { %v8204_v44 = vld [vmem:[#allocation2 + $0x404] ss:$28 sps:$4 sm:$0xff]  }
 0x14e   :  { %2562 = vmatpush1.bf16.msra.mxu0 %v8151_v45  ;;  %7558 = vmatpush3.bf16.msra.mxu1 %v8206_v47  ;;  %v8276_v45 = vld [vmem:[#allocation2 + $0x750] ss:$28 sps:$4 sm:$0xff]   ;;  %v8202_v47 = vld [vmem:[#allocation2 + $0x400] ss:$28 sps:$4 sm:$0xff]  }
 0x14f   :  { %2563 = vmatprep.subr.bf16.mxu0 %v8156_v46  ;;  %7559 = vmatprep.subr.bf16.mxu1 %v8210_v48  ;;  %v8280_v46 = vld [vmem:[#allocation2 + $0x948] ss:$28 sps:$4 sm:$0xff]   ;;  %v8209_v48 = vld [vmem:[#allocation2 + $0x43c] ss:$28 sps:$4 sm:$0xff]  }
 0x152   :  { %2564 = vmatpush1.bf16.msra.mxu0 %v8154_v49  ;;  %7560 = vmatpush3.bf16.msra.mxu1 %v8211_v60  ;;  %v8281_v49 = vld [vmem:[#allocation2 + $0x788] ss:$28 sps:$4 sm:$0xff]   ;;  %v8214_v60 = vld [vmem:[#allocation2 + $0x474] ss:$28 sps:$4 sm:$0xff]  }
 0x153   :  { %2565 = vmatprep.subr.bf16.mxu0 %v8159_v50  ;;  %7561 = vmatprep.subr.bf16.mxu1 %v8215_v51  ;;  %v8207_v50 = vld [vmem:[#allocation2 + $0x438] ss:$28 sps:$4 sm:$0xff]   ;;  %v8286_v51 = vld [vmem:[#allocation2 + $0x7c0] ss:$28 sps:$4 sm:$0xff]  }
 0x156   :  { %2566 = vmatpush1.bf16.msra.mxu0 %v8157_v52  ;;  %7562 = vmatpush3.bf16.msra.mxu1 %v8216_v53  ;;  %v8212_v52 = vld [vmem:[#allocation2 + $0x470] ss:$28 sps:$4 sm:$0xff]  }
 0x157   :  { %2567 = vmatprep.subr.bf16.mxu0 %v8162_v54  ;;  %7563 = vmatprep.subr.bf16.mxu1 %v8220_v55  ;;  %v8219_v53 = vld [vmem:[#allocation2 + $0x4ac] ss:$28 sps:$4 sm:$0xff]   ;;  %v8291_v54 = vld [vmem:[#allocation2 + $0x7f8] ss:$28 sps:$4 sm:$0xff]  }
 0x158   :  { %v8295_v55 = vld [vmem:[#allocation2 + $0x9f0] ss:$28 sps:$4 sm:$0xff]  }
 0x15a   :  { %2568 = vmatpush1.bf16.msra.mxu0 %v8160_v56  ;;  %7564 = vmatpush3.bf16.msra.mxu1 %v8221_v58  ;;  %v8217_v56 = vld [vmem:[#allocation2 + $0x4a8] ss:$28 sps:$4 sm:$0xff]  }
 0x15b   :  { %2569 = vmatprep.subr.bf16.mxu0 %v8165_v57  ;;  %7565 = vmatprep.subr.bf16.mxu1 %v8225_v59  ;;  %v8296_v57 = vld [vmem:[#allocation2 + $0x830] ss:$28 sps:$4 sm:$0xff]   ;;  %v8224_v58 = vld [vmem:[#allocation2 + $0x4e4] ss:$28 sps:$4 sm:$0xff]  }
 0x15c   :  { %v8300_v59 = vld [vmem:[#allocation2 + $0xa28] ss:$28 sps:$4 sm:$0xff]  }
 0x15e   :  { %2570 = vmatpush1.bf16.msra.mxu0 %v8163_v61  ;;  %7566 = vmatpush3.bf16.msra.mxu1 %v8226_v63  ;;  %v8222_v61 = vld [vmem:[#allocation2 + $0x4e0] ss:$28 sps:$4 sm:$0xff]  }
 0x15f   :  { %2571 = vmatprep.subr.bf16.mxu0 %v8168_v62  ;;  %7573 = vmatprep.subr.bf16.mxu1 %v8230_v0  ;;  %v8301_v62 = vld [vmem:[#allocation2 + $0x868] ss:$28 sps:$4 sm:$0xff]   ;;  %v8229_v63 = vld [vmem:[#allocation2 + $0x51c] ss:$28 sps:$4 sm:$0xff]  }
 0x160   :  { %v8305_v0 = vld [vmem:[#allocation2 + $0xa60] ss:$28 sps:$4 sm:$0xff]  }
 0x161   :  { %2711 = vmatmul.mubr.bf16.vlgmr.msra.gmra.mrb[4].mxu1 %v9330_v16 }
 0x162   :  { %2572 = vmatpush1.bf16.msra.mxu0 %v8166_v1  ;;  %7574 = vmatpush3.bf16.msra.mxu1 %v8231_v3  ;;  %v8227_v1 = vld [vmem:[#allocation2 + $0x518] ss:$28 sps:$4 sm:$0xff]   ;;  %v8306_v3 = vld [vmem:[#allocation2 + $0x8a0] ss:$28 sps:$4 sm:$0xff]  }
 0x163   :  { %2573 = vmatprep.subr.bf16.mxu0 %v8171_v2  ;;  %7575 = vmatprep.subr.bf16.mxu1 %v8235_v4  ;;  %v8234_v2 = vld [vmem:[#allocation2 + $0x554] ss:$28 sps:$4 sm:$0xff]   ;;  %v8312_v4 = vld [vmem:[#allocation6 + $0x4] ss:$20 sps:$4 sm:$0xff]  }
 0x164   :  { %2750 = vmatprep.mubr.bf16.mxu1 %v9332_v20 }
 0x166   :  { %2574 = vmatpush1.bf16.msra.mxu0 %v8169_v5  ;;  %7576 = vmatpush3.bf16.msra.mxu1 %v8236_v7  ;;  %v8232_v5 = vld [vmem:[#allocation2 + $0x550] ss:$28 sps:$4 sm:$0xff]  }
 0x167   :  { %2575 = vmatprep.subr.bf16.mxu0 %v8174_v6  ;;  %7577 = vmatprep.subr.bf16.mxu1 %v8240_v8  ;;  %v8310_v6 = vld [vmem:[#allocation6] ss:$20 sps:$4 sm:$0xff]  }
 0x168   :  { %v8239_v7 = vld [vmem:[#allocation2 + $0x58c] ss:$28 sps:$4 sm:$0xff]  }
 0x169   :  { %v8318_v8 = vld [vmem:[#allocation6 + $0x2c] ss:$20 sps:$4 sm:$0xff]  }
 0x16a   :  { %2576 = vmatpush1.bf16.msra.mxu0 %v8172_v10  ;;  %7578 = vmatpush3.bf16.msra.mxu1 %v8241_v12  ;;  %v8237_v10 = vld [vmem:[#allocation2 + $0x588] ss:$28 sps:$4 sm:$0xff]  }
 0x16b   :  { %2577 = vmatprep.subr.bf16.mxu0 %v8177_v11  ;;  %7579 = vmatprep.subr.bf16.mxu1 %v8245_v13  ;;  %v8316_v11 = vld [vmem:[#allocation6 + $0x28] ss:$20 sps:$4 sm:$0xff]  }
 0x16c   :  { %v8244_v12 = vld [vmem:[#allocation2 + $0x5c4] ss:$28 sps:$4 sm:$0xff]   ;;  %v8324_v13 = vld [vmem:[#allocation6 + $0x54] ss:$20 sps:$4 sm:$0xff]  }
 0x16e   :  { %2578 = vmatpush1.bf16.msra.mxu0 %v8175_v14  ;;  %7580 = vmatpush3.bf16.msra.mxu1 %v8246_v17  ;;  %v8242_v14 = vld [vmem:[#allocation2 + $0x5c0] ss:$28 sps:$4 sm:$0xff]  }
 0x16f   :  { %2579 = vmatprep.subr.bf16.mxu0 %v8180_v15  ;;  %7581 = vmatprep.subr.bf16.mxu1 %v8250_v18  ;;  %v8322_v15 = vld [vmem:[#allocation6 + $0x50] ss:$20 sps:$4 sm:$0xff]  }
 0x170   :  { %v8249_v17 = vld [vmem:[#allocation2 + $0x5fc] ss:$28 sps:$4 sm:$0xff]  }
 0x171   :  { %v8330_v18 = vld [vmem:[#allocation6 + $0x7c] ss:$20 sps:$4 sm:$0xff]  }
 0x172   :  { %2580 = vmatpush1.bf16.msra.mxu0 %v8178_v19  ;;  %7582 = vmatpush3.bf16.msra.mxu1 %v8251_v22  ;;  %v8247_v19 = vld [vmem:[#allocation2 + $0x5f8] ss:$28 sps:$4 sm:$0xff]  }
 0x173   :  { %2581 = vmatprep.subr.bf16.mxu0 %v8183_v21  ;;  %7583 = vmatprep.subr.bf16.mxu1 %v8255_v23  ;;  %v8328_v21 = vld [vmem:[#allocation6 + $0x78] ss:$20 sps:$4 sm:$0xff]  }
 0x174   :  { %v8254_v22 = vld [vmem:[#allocation2 + $0x634] ss:$28 sps:$4 sm:$0xff]   ;;  %v8336_v23 = vld [vmem:[#allocation6 + $0xa4] ss:$20 sps:$4 sm:$0xff]  }
 0x176   :  { %2582 = vmatpush1.bf16.msra.mxu0 %v8181_v25  ;;  %7584 = vmatpush3.bf16.msra.mxu1 %v8256_v28  ;;  %v8252_v25 = vld [vmem:[#allocation2 + $0x630] ss:$28 sps:$4 sm:$0xff]  }
 0x177   :  { %2583 = vmatprep.subr.bf16.mxu0 %v8186_v27  ;;  %7585 = vmatprep.subr.bf16.mxu1 %v8260_v9  ;;  %v8334_v27 = vld [vmem:[#allocation6 + $0xa0] ss:$20 sps:$4 sm:$0xff]  }
 0x178   :  { %v8259_v28 = vld [vmem:[#allocation2 + $0x66c] ss:$28 sps:$4 sm:$0xff]  }
 0x179   :  { %v8342_v9 = vld [vmem:[#allocation6 + $0xcc] ss:$20 sps:$4 sm:$0xff]  }
 0x17a   :  { %2584 = vmatpush1.bf16.msra.mxu0 %v8184_v30  ;;  %7586 = vmatpush3.bf16.msra.mxu1 %v8261_v33  ;;  %v8257_v30 = vld [vmem:[#allocation2 + $0x668] ss:$28 sps:$4 sm:$0xff]  }
 0x17b   :  { %2585 = vmatprep.subr.bf16.mxu0 %v8189_v31  ;;  %7587 = vmatprep.subr.bf16.mxu1 %v8265_v34  ;;  %v8340_v31 = vld [vmem:[#allocation6 + $0xc8] ss:$20 sps:$4 sm:$0xff]  }
 0x17c   :  { %v8264_v33 = vld [vmem:[#allocation2 + $0x6a4] ss:$28 sps:$4 sm:$0xff]   ;;  %v8348_v34 = vld [vmem:[#allocation6 + $0xf4] ss:$20 sps:$4 sm:$0xff]  }
 0x17e   :  { %2586 = vmatpush1.bf16.msra.mxu0 %v8187_v35  ;;  %7588 = vmatpush3.bf16.msra.mxu1 %v8266_v36  ;;  %v8262_v35 = vld [vmem:[#allocation2 + $0x6a0] ss:$28 sps:$4 sm:$0xff]   ;;  %v8346_v36 = vld [vmem:[#allocation6 + $0xf0] ss:$20 sps:$4 sm:$0xff]  }
 0x17f   :  { %2596 = vmatprep.subr.bf16.mxu0 %v8194_v37  ;;  %7595 = vmatprep.subr.bf16.mxu1 %v8270_v38  ;;  %v8269_v37 = vld [vmem:[#allocation2 + $0x6dc] ss:$28 sps:$4 sm:$0xff]  }
 0x180   :  { %v8354_v38 = vld [vmem:[#allocation6 + $0x11c] ss:$20 sps:$4 sm:$0xff]  }
 0x181   :  { %2588 = vmatmul.mubr.bf16.vlgmr.msra.gmra.mrb[4].mxu0 %v9330_v16  ;;  %2751 = vmatmul.mubr.bf16.vlgmr.msra.gmra.mrb[8].mxu1 %v9340_v24  ;;  %v8285_v16 = vld [vmem:[#allocation2 + $0x980] ss:$28 sps:$4 sm:$0xff]  }
 0x182   :  { %2597 = vmatpush1.bf16.msra.mxu0 %v8192_v39  ;;  %7596 = vmatpush3.bf16.msra.mxu1 %v8271_v26  ;;  %v8267_v39 = vld [vmem:[#allocation2 + $0x6d8] ss:$28 sps:$4 sm:$0xff]  }
 0x183   :  { %2598 = vmatprep.subr.bf16.mxu0 %v8199_v40  ;;  %2628 = vmatprep.mubr.bf16.mxu0 %v9332_v20  ;;  %v8290_v20 = vld [vmem:[#allocation2 + $0x9b8] ss:$28 sps:$4 sm:$0xff]  }
 0x184   :  { %7597 = vmatprep.subr.bf16.mxu1 %v8275_v41  ;;  %2790 = vmatprep.mubr.bf16.mxu1 %v9351_v29  ;;  %v8352_v26 = vld [vmem:[#allocation6 + $0x118] ss:$20 sps:$4 sm:$0xff]  }
 0x185   :  { %v8274_v40 = vld [vmem:[#allocation2 + $0x714] ss:$28 sps:$4 sm:$0xff]   ;;  %v8360_v41 = vld [vmem:[#allocation6 + $0x144] ss:$20 sps:$4 sm:$0xff]  }
 0x186   :  { %2599 = vmatpush1.bf16.msra.mxu0 %v8197_v42  ;;  %7598 = vmatpush3.bf16.msra.mxu1 %v8276_v45  ;;  %v8272_v42 = vld [vmem:[#allocation2 + $0x710] ss:$28 sps:$4 sm:$0xff]  }
 0x187   :  { %2600 = vmatprep.subr.bf16.mxu0 %v8204_v44  ;;  %7599 = vmatprep.subr.bf16.mxu1 %v8280_v46  ;;  %v8358_v44 = vld [vmem:[#allocation6 + $0x140] ss:$20 sps:$4 sm:$0xff]  }
 0x188   :  { %v8279_v45 = vld [vmem:[#allocation2 + $0x74c] ss:$28 sps:$4 sm:$0xff]  }
 0x189   :  { %v8363_v46 = vld [vmem:[#allocation6 + $0x16c] ss:$20 sps:$4 sm:$0xff]  }
 0x18a   :  { %2601 = vmatpush1.bf16.msra.mxu0 %v8202_v47  ;;  %7600 = vmatpush3.bf16.msra.mxu1 %v8281_v49  ;;  %v8277_v47 = vld [vmem:[#allocation2 + $0x748] ss:$28 sps:$4 sm:$0xff]  }
 0x18b   :  { %2602 = vmatprep.subr.bf16.mxu0 %v8209_v48  ;;  %7601 = vmatprep.subr.bf16.mxu1 %v8285_v16  ;;  %v8361_v48 = vld [vmem:[#allocation6 + $0x168] ss:$20 sps:$4 sm:$0xff]  }
 0x18c   :  { %v8284_v49 = vld [vmem:[#allocation2 + $0x784] ss:$28 sps:$4 sm:$0xff]   ;;  %v8369_v16 = vld [vmem:[#allocation6 + $0x194] ss:$20 sps:$4 sm:$0xff]  }
 0x18e   :  { %2603 = vmatpush1.bf16.msra.mxu0 %v8207_v50  ;;  %7602 = vmatpush3.bf16.msra.mxu1 %v8286_v51  ;;  %v8282_v50 = vld [vmem:[#allocation2 + $0x780] ss:$28 sps:$4 sm:$0xff]  }
 0x18f   :  { %2604 = vmatprep.subr.bf16.mxu0 %v8214_v60  ;;  %7603 = vmatprep.subr.bf16.mxu1 %v8290_v20  ;;  %v8367_v60 = vld [vmem:[#allocation6 + $0x190] ss:$20 sps:$4 sm:$0xff]  }
 0x190   :  { %v8289_v51 = vld [vmem:[#allocation2 + $0x7bc] ss:$28 sps:$4 sm:$0xff]  }
 0x191   :  { %v8375_v20 = vld [vmem:[#allocation6 + $0x1bc] ss:$20 sps:$4 sm:$0xff]  }
 0x192   :  { %2605 = vmatpush1.bf16.msra.mxu0 %v8212_v52  ;;  %7604 = vmatpush3.bf16.msra.mxu1 %v8291_v54  ;;  %v8287_v52 = vld [vmem:[#allocation2 + $0x7b8] ss:$28 sps:$4 sm:$0xff]   ;;  %v8381_v54 = vld [vmem:[#allocation6 + $0x1e4] ss:$20 sps:$4 sm:$0xff]  }
 0x193   :  { %2606 = vmatprep.subr.bf16.mxu0 %v8219_v53  ;;  %7605 = vmatprep.subr.bf16.mxu1 %v8295_v55  ;;  %v8294_v53 = vld [vmem:[#allocation2 + $0x7f4] ss:$28 sps:$4 sm:$0xff]  }
 0x194   :  { %v8292_v55 = vld [vmem:[#allocation2 + $0x7f0] ss:$28 sps:$4 sm:$0xff]  }
 0x196   :  { %2607 = vmatpush1.bf16.msra.mxu0 %v8217_v56  ;;  %7606 = vmatpush3.bf16.msra.mxu1 %v8296_v57  ;;  %v8299_v56 = vld [vmem:[#allocation2 + $0x82c] ss:$28 sps:$4 sm:$0xff]  }
 0x197   :  { %2608 = vmatprep.subr.bf16.mxu0 %v8224_v58  ;;  %7607 = vmatprep.subr.bf16.mxu1 %v8300_v59  ;;  %v8387_v57 = vld [vmem:[#allocation6 + $0x20c] ss:$20 sps:$4 sm:$0xff]   ;;  %v8385_v59 = vld [vmem:[#allocation6 + $0x208] ss:$20 sps:$4 sm:$0xff]  }
 0x198   :  { %v8297_v58 = vld [vmem:[#allocation2 + $0x828] ss:$28 sps:$4 sm:$0xff]  }
 0x19a   :  { %2609 = vmatpush1.bf16.msra.mxu0 %v8222_v61  ;;  %7608 = vmatpush3.bf16.msra.mxu1 %v8301_v62  ;;  %v8304_v61 = vld [vmem:[#allocation2 + $0x864] ss:$28 sps:$4 sm:$0xff]   ;;  %v8393_v62 = vld [vmem:[#allocation6 + $0x234] ss:$20 sps:$4 sm:$0xff]  }
 0x19b   :  { %2610 = vmatprep.subr.bf16.mxu0 %v8229_v63  ;;  %7609 = vmatprep.subr.bf16.mxu1 %v8305_v0  ;;  %v8302_v63 = vld [vmem:[#allocation2 + $0x860] ss:$28 sps:$4 sm:$0xff]   ;;  %v8391_v0 = vld [vmem:[#allocation6 + $0x230] ss:$20 sps:$4 sm:$0xff]  }
 0x19e   :  { %2611 = vmatpush1.bf16.msra.mxu0 %v8227_v1  ;;  %7610 = vmatpush3.bf16.msra.mxu1 %v8306_v3  ;;  %v8309_v1 = vld [vmem:[#allocation2 + $0x89c] ss:$28 sps:$4 sm:$0xff]  }
 0x19f   :  { %2612 = vmatprep.subr.bf16.mxu0 %v8234_v2  ;;  %4645 = vmatprep.subr.bf16.mxu1 %v8312_v4  ;;  %v8399_v2 = vld [vmem:[#allocation6 + $0x25c] ss:$20 sps:$4 sm:$0xff]   ;;  %v8397_v4 = vld [vmem:[#allocation6 + $0x258] ss:$20 sps:$4 sm:$0xff]  }
 0x1a0   :  { %v8307_v3 = vld [vmem:[#allocation2 + $0x898] ss:$28 sps:$4 sm:$0xff]  }
 0x1a1   :  { %2791 = vmatmul.mubr.bf16.vlgmr.msra.gmra.mrb[12].mxu1 %v9357_v32 }
 0x1a2   :  { %2613 = vmatpush1.bf16.msra.mxu0 %v8232_v5  ;;  %4646 = vmatpush1.bf16.msra.mxu1 %v8310_v6  ;;  %v8315_v5 = vld [vmem:[#allocation2 + $0x8d4] ss:$28 sps:$4 sm:$0xff]   ;;  %v8405_v6 = vld [vmem:[#allocation6 + $0x284] ss:$20 sps:$4 sm:$0xff]  }
 0x1a3   :  { %2614 = vmatprep.subr.bf16.mxu0 %v8239_v7  ;;  %4647 = vmatprep.subr.bf16.mxu1 %v8318_v8  ;;  %v8313_v7 = vld [vmem:[#allocation2 + $0x8d0] ss:$28 sps:$4 sm:$0xff]  }
 0x1a4   :  { %v8321_v8 = vld [vmem:[#allocation2 + $0x90c] ss:$28 sps:$4 sm:$0xff]  }
 0x1a6   :  { %2615 = vmatpush1.bf16.msra.mxu0 %v8237_v10  ;;  %4648 = vmatpush1.bf16.msra.mxu1 %v8316_v11  ;;  %v8319_v10 = vld [vmem:[#allocation2 + $0x908] ss:$28 sps:$4 sm:$0xff]  }
 0x1a7   :  { %2616 = vmatprep.subr.bf16.mxu0 %v8244_v12  ;;  %4649 = vmatprep.subr.bf16.mxu1 %v8324_v13  ;;  %v8327_v11 = vld [vmem:[#allocation2 + $0x944] ss:$28 sps:$4 sm:$0xff]   ;;  %v8333_v13 = vld [vmem:[#allocation2 + $0x97c] ss:$28 sps:$4 sm:$0xff]  }
 0x1a8   :  { %v8325_v12 = vld [vmem:[#allocation2 + $0x940] ss:$28 sps:$4 sm:$0xff]  }
 0x1aa   :  { %2617 = vmatpush1.bf16.msra.mxu0 %v8242_v14  ;;  %4650 = vmatpush1.bf16.msra.mxu1 %v8322_v15  ;;  %v8331_v14 = vld [vmem:[#allocation2 + $0x978] ss:$28 sps:$4 sm:$0xff]  }
 0x1ab   :  { %2618 = vmatprep.subr.bf16.mxu0 %v8249_v17  ;;  %4651 = vmatprep.subr.bf16.mxu1 %v8330_v18  ;;  %v8339_v15 = vld [vmem:[#allocation2 + $0x9b4] ss:$28 sps:$4 sm:$0xff]   ;;  %v8345_v18 = vld [vmem:[#allocation2 + $0x9ec] ss:$28 sps:$4 sm:$0xff]  }
 0x1ac   :  { %v8337_v17 = vld [vmem:[#allocation2 + $0x9b0] ss:$28 sps:$4 sm:$0xff]  }
 0x1ae   :  { %2619 = vmatpush1.bf16.msra.mxu0 %v8247_v19  ;;  %4652 = vmatpush1.bf16.msra.mxu1 %v8328_v21  ;;  %v8343_v19 = vld [vmem:[#allocation2 + $0x9e8] ss:$28 sps:$4 sm:$0xff]  }
 0x1af   :  { %2620 = vmatprep.subr.bf16.mxu0 %v8254_v22  ;;  %4653 = vmatprep.subr.bf16.mxu1 %v8336_v23  ;;  %v8351_v21 = vld [vmem:[#allocation2 + $0xa24] ss:$28 sps:$4 sm:$0xff]   ;;  %v8357_v23 = vld [vmem:[#allocation2 + $0xa5c] ss:$28 sps:$4 sm:$0xff]  }
 0x1b0   :  { %v8349_v22 = vld [vmem:[#allocation2 + $0xa20] ss:$28 sps:$4 sm:$0xff]  }
 0x1b2   :  { %2621 = vmatpush1.bf16.msra.mxu0 %v8252_v25  ;;  %4654 = vmatpush1.bf16.msra.mxu1 %v8334_v27  ;;  %v8355_v25 = vld [vmem:[#allocation2 + $0xa58] ss:$28 sps:$4 sm:$0xff]  }
 0x1b3   :  { %2622 = vmatprep.subr.bf16.mxu0 %v8259_v28  ;;  %4655 = vmatprep.subr.bf16.mxu1 %v8342_v9  ;;  %v8366_v27 = vld [vmem:[#allocation6 + $0xc] ss:$20 sps:$4 sm:$0xff]   ;;  %v8364_v28 = vld [vmem:[#allocation6 + $0x8] ss:$20 sps:$4 sm:$0xff]  }
 0x1b4   :  { %v8372_v9 = vld [vmem:[#allocation6 + $0x34] ss:$20 sps:$4 sm:$0xff]  }
 0x1b6   :  { %2623 = vmatpush1.bf16.msra.mxu0 %v8257_v30  ;;  %4656 = vmatpush1.bf16.msra.mxu1 %v8340_v31  ;;  %v8370_v30 = vld [vmem:[#allocation6 + $0x30] ss:$20 sps:$4 sm:$0xff]  }
 0x1b7   :  { %2624 = vmatprep.subr.bf16.mxu0 %v8264_v33  ;;  %4657 = vmatprep.subr.bf16.mxu1 %v8348_v34  ;;  %v8378_v31 = vld [vmem:[#allocation6 + $0x5c] ss:$20 sps:$4 sm:$0xff]   ;;  %v8376_v33 = vld [vmem:[#allocation6 + $0x58] ss:$20 sps:$4 sm:$0xff]  }
 0x1b8   :  { %v8384_v34 = vld [vmem:[#allocation6 + $0x84] ss:$20 sps:$4 sm:$0xff]  }
 0x1ba   :  { %2625 = vmatpush1.bf16.msra.mxu0 %v8262_v35  ;;  %4658 = vmatpush1.bf16.msra.mxu1 %v8346_v36  ;;  %v8382_v35 = vld [vmem:[#allocation6 + $0x80] ss:$20 sps:$4 sm:$0xff]  }
 0x1bb   :  { %2626 = vmatprep.subr.bf16.mxu0 %v8269_v37  ;;  %4659 = vmatprep.subr.bf16.mxu1 %v8354_v38  ;;  %v8390_v36 = vld [vmem:[#allocation6 + $0xac] ss:$20 sps:$4 sm:$0xff]   ;;  %v9374_v37 = vsub.s32 0, %v9316_v43  ;;  %v8388_v38 = vld [vmem:[#allocation6 + $0xa8] ss:$20 sps:$4 sm:$0xff]  }
 0x1be   :  { %2627 = vmatpush1.bf16.msra.mxu0 %v8267_v39  ;;  %4660 = vmatpush1.bf16.msra.mxu1 %v8352_v26  ;;  %v9376_v39 = vld [vmem:[#allocation4] sm:$0xff]  ;;  %v9382_v26 = vsub.s32 3, %v9316_v43 }
 0x1bf   :  { %2637 = vmatprep.subr.bf16.mxu0 %v8274_v40  ;;  %4661 = vmatprep.subr.bf16.mxu1 %v8360_v41  ;;  %v8396_v40 = vld [vmem:[#allocation6 + $0xd4] ss:$20 sps:$4 sm:$0xff]   ;;  %v549_v41 = vrot.slane %v9376_v39, %v9374_v37 }
 0x1c1   :  { %2629 = vmatmul.mubr.bf16.vlgmr.msra.gmra.mrb[4].mxu0 %v9340_v24  ;;  %v8373_v24 = vld [vmem:[#allocation6 + $0x1b8] ss:$20 sps:$4 sm:$0xff]  }
 0x1c2   :  { %2638 = vmatpush1.bf16.msra.mxu0 %v8272_v42  ;;  %4662 = vmatpush1.bf16.msra.mxu1 %v8358_v44  ;;  %v561_v44 = vrot.slane %v9376_v39, %v9382_v26 }
 0x1c3   :  { %2639 = vmatprep.subr.bf16.mxu0 %v8279_v45  ;;  %2669 = vmatprep.mubr.bf16.mxu0 %v9351_v29  ;;  %v8379_v29 = vld [vmem:[#allocation6 + $0x1e0] ss:$20 sps:$4 sm:$0xff]   ;;  %v8394_v45 = vld [vmem:[#allocation6 + $0xd0] ss:$20 sps:$4 sm:$0xff]  }
 0x1c4   :  { %4663 = vmatprep.subr.bf16.mxu1 %v8363_v46  ;;  %v8402_v46 = vld [vmem:[#allocation6 + $0xfc] ss:$20 sps:$4 sm:$0xff]  }
 0x1c6   :  { %2640 = vmatpush1.bf16.msra.mxu0 %v8277_v47  ;;  %4664 = vmatpush1.bf16.msra.mxu1 %v8361_v48 }
 0x1c7   :  { %2641 = vmatprep.subr.bf16.mxu0 %v8284_v49  ;;  %4665 = vmatprep.subr.bf16.mxu1 %v8369_v16 }
 0x1ca   :  { %2642 = vmatpush1.bf16.msra.mxu0 %v8282_v50  ;;  %4666 = vmatpush1.bf16.msra.mxu1 %v8367_v60 }
 0x1cb   :  { %2643 = vmatprep.subr.bf16.mxu0 %v8289_v51  ;;  %4667 = vmatprep.subr.bf16.mxu1 %v8375_v20 }
 0x1ce   :  { %2644 = vmatpush1.bf16.msra.mxu0 %v8287_v52  ;;  %4668 = vmatpush1.bf16.msra.mxu1 %v8373_v24  ;;  %v8400_v24 = vld [vmem:[#allocation6 + $0xf8] ss:$20 sps:$4 sm:$0xff]  }
 0x1cf   :  { %2645 = vmatprep.subr.bf16.mxu0 %v8294_v53  ;;  %4669 = vmatprep.subr.bf16.mxu1 %v8381_v54  ;;  %v8408_v54 = vld [vmem:[#allocation6 + $0x124] ss:$20 sps:$4 sm:$0xff]  }
 0x1d2   :  { %2646 = vmatpush1.bf16.msra.mxu0 %v8292_v55  ;;  %4670 = vmatpush1.bf16.msra.mxu1 %v8379_v29 }
 0x1d3   :  { %2647 = vmatprep.subr.bf16.mxu0 %v8299_v56  ;;  %4671 = vmatprep.subr.bf16.mxu1 %v8387_v57 }
 0x1d6   :  { %2648 = vmatpush1.bf16.msra.mxu0 %v8297_v58  ;;  %4672 = vmatpush1.bf16.msra.mxu1 %v8385_v59 }
 0x1d7   :  { %2649 = vmatprep.subr.bf16.mxu0 %v8304_v61  ;;  %4673 = vmatprep.subr.bf16.mxu1 %v8393_v62  ;;  %v8403_v61 = vld [vmem:[#allocation6 + $0x280] ss:$20 sps:$4 sm:$0xff]  }
 0x1d8   :  { %v8406_v62 = vld [vmem:[#allocation6 + $0x120] ss:$20 sps:$4 sm:$0xff]  }
 0x1da   :  { %2650 = vmatpush1.bf16.msra.mxu0 %v8302_v63  ;;  %4674 = vmatpush1.bf16.msra.mxu1 %v8391_v0  ;;  %v8411_v0 = vld [vmem:[#allocation6 + $0x2ac] ss:$20 sps:$4 sm:$0xff]  }
 0x1db   :  { %2651 = vmatprep.subr.bf16.mxu0 %v8309_v1  ;;  %4675 = vmatprep.subr.bf16.mxu1 %v8399_v2  ;;  %v8414_v2 = vld [vmem:[#allocation6 + $0x14c] ss:$20 sps:$4 sm:$0xff]  }
 0x1de   :  { %2652 = vmatpush1.bf16.msra.mxu0 %v8307_v3  ;;  %4676 = vmatpush1.bf16.msra.mxu1 %v8397_v4 }
 0x1df   :  { %2653 = vmatprep.subr.bf16.mxu0 %v8315_v5  ;;  %4686 = vmatprep.subr.bf16.mxu1 %v8405_v6  ;;  %v8409_v5 = vld [vmem:[#allocation6 + $0x2a8] ss:$20 sps:$4 sm:$0xff]  }
 0x1e0   :  { %v8412_v6 = vld [vmem:[#allocation6 + $0x148] ss:$20 sps:$4 sm:$0xff]  }
 0x1e2   :  { %2654 = vmatpush1.bf16.msra.mxu0 %v8313_v7  ;;  %v8417_v7 = vld [vmem:[#allocation6 + $0x2d4] ss:$20 sps:$4 sm:$0xff]  }
 0x1e3   :  { %2655 = vmatprep.subr.bf16.mxu0 %v8321_v8  ;;  %v8420_v8 = vld [vmem:[#allocation6 + $0x174] ss:$20 sps:$4 sm:$0xff]  }
 0x1e6   :  { %2656 = vmatpush1.bf16.msra.mxu0 %v8319_v10  ;;  %v8415_v10 = vld [vmem:[#allocation6 + $0x2d0] ss:$20 sps:$4 sm:$0xff]  }
 0x1e7   :  { %2657 = vmatprep.subr.bf16.mxu0 %v8327_v11  ;;  %v8418_v11 = vld [vmem:[#allocation6 + $0x170] ss:$20 sps:$4 sm:$0xff]  }
 0x1ea   :  { %2658 = vmatpush1.bf16.msra.mxu0 %v8325_v12  ;;  %v8423_v12 = vld [vmem:[#allocation6 + $0x2fc] ss:$20 sps:$4 sm:$0xff]  }
 0x1eb   :  { %2659 = vmatprep.subr.bf16.mxu0 %v8333_v13  ;;  %v8426_v13 = vld [vmem:[#allocation6 + $0x19c] ss:$20 sps:$4 sm:$0xff]  }
 0x1ee   :  { %2660 = vmatpush1.bf16.msra.mxu0 %v8331_v14  ;;  %v8421_v14 = vld [vmem:[#allocation6 + $0x2f8] ss:$20 sps:$4 sm:$0xff]  }
 0x1ef   :  { %2661 = vmatprep.subr.bf16.mxu0 %v8339_v15  ;;  %v8424_v15 = vld [vmem:[#allocation6 + $0x198] ss:$20 sps:$4 sm:$0xff]  }
 0x1f2   :  { %2662 = vmatpush1.bf16.msra.mxu0 %v8337_v17  ;;  %v8429_v17 = vld [vmem:[#allocation6 + $0x324] ss:$20 sps:$4 sm:$0xff]  }
 0x1f3   :  { %2663 = vmatprep.subr.bf16.mxu0 %v8345_v18  ;;  %v8432_v18 = vld [vmem:[#allocation6 + $0x1c4] ss:$20 sps:$4 sm:$0xff]  }
 0x1f6   :  { %2664 = vmatpush1.bf16.msra.mxu0 %v8343_v19  ;;  %v8427_v19 = vld [vmem:[#allocation6 + $0x320] ss:$20 sps:$4 sm:$0xff]  }
 0x1f7   :  { %2665 = vmatprep.subr.bf16.mxu0 %v8351_v21  ;;  %v8430_v21 = vld [vmem:[#allocation6 + $0x1c0] ss:$20 sps:$4 sm:$0xff]  }
 0x1fa   :  { %2666 = vmatpush1.bf16.msra.mxu0 %v8349_v22  ;;  %v8435_v22 = vld [vmem:[#allocation6 + $0x34c] ss:$20 sps:$4 sm:$0xff]  }
 0x1fb   :  { %2667 = vmatprep.subr.bf16.mxu0 %v8357_v23  ;;  %v8438_v23 = vld [vmem:[#allocation6 + $0x1ec] ss:$20 sps:$4 sm:$0xff]  }
 0x1fe   :  { %2668 = vmatpush1.bf16.msra.mxu0 %v8355_v25  ;;  %v8433_v25 = vld [vmem:[#allocation6 + $0x348] ss:$20 sps:$4 sm:$0xff]  }
 0x1ff   :  { %4809 = vmatprep.subr.bf16.mxu0 %v8366_v27  ;;  %v8436_v27 = vld [vmem:[#allocation6 + $0x1e8] ss:$20 sps:$4 sm:$0xff]  }
 0x201   :  { %2670 = vmatmul.mubr.bf16.vlgmr.msra.gmra.mrb[4].mxu0 %v9357_v32  ;;  %v9379_v32 = vsub.s32 1, %v9316_v43 }
 0x202   :  { %4810 = vmatpush1.bf16.msra.mxu0 %v8364_v28  ;;  %v8441_v28 = vld [vmem:[#allocation6 + $0x374] ss:$20 sps:$4 sm:$0xff]  }
 0x203   :  { %4811 = vmatprep.subr.bf16.mxu0 %v8372_v9  ;;  %v553_v42 = vrot.slane %v9376_v39, %v9379_v32  ;;  %v8444_v9 = vld [vmem:[#allocation6 + $0x214] ss:$20 sps:$4 sm:$0xff]  }
 0x206   :  { %4812 = vmatpush1.bf16.msra.mxu0 %v8370_v30  ;;  %v8439_v30 = vld [vmem:[#allocation6 + $0x370] ss:$20 sps:$4 sm:$0xff]  }
 0x207   :  { %4813 = vmatprep.subr.bf16.mxu0 %v8378_v31  ;;  %v8442_v31 = vld [vmem:[#allocation6 + $0x210] ss:$20 sps:$4 sm:$0xff]  }
 0x20a   :  { %4814 = vmatpush1.bf16.msra.mxu0 %v8376_v33  ;;  %v8447_v33 = vld [vmem:[#allocation6 + $0x39c] ss:$20 sps:$4 sm:$0xff]  }
 0x20b   :  { %4815 = vmatprep.subr.bf16.mxu0 %v8384_v34  ;;  %v8450_v34 = vld [vmem:[#allocation6 + $0x23c] ss:$20 sps:$4 sm:$0xff]  }
 0x20e   :  { %4816 = vmatpush1.bf16.msra.mxu0 %v8382_v35  ;;  %v8448_v35 = vld [vmem:[#allocation6 + $0x238] ss:$20 sps:$4 sm:$0xff]  }
 0x20f   :  { %4817 = vmatprep.subr.bf16.mxu0 %v8390_v36 }
 0x212   :  { %4818 = vmatpush1.bf16.msra.mxu0 %v8388_v38  ;;  %v8445_v38 = vld [vmem:[#allocation6 + $0x398] ss:$20 sps:$4 sm:$0xff]  }
 0x213   :  { %4819 = vmatprep.subr.bf16.mxu0 %v8396_v40  ;;  %v8456_v40 = vld [vmem:[#allocation6 + $0x264] ss:$20 sps:$4 sm:$0xff]  }
 0x214   :  { %v2425_v47 = vpop.f32.mrb[0].mxu0  ;;  %v9390_v48 = vpop.f32.mrb[0].mxu1 }
 0x215   :  { %v7756_v49 = vadd.f32 %v2425_v47, %v549_v41  ;;  %v2427_v16 = vpop.f32.mrb[1].mxu0  ;;  %v2550_v50 = vpop.f32.mrb[1].mxu1  ;;  %v8454_v47 = vld [vmem:[#allocation6 + $0x260] ss:$20 sps:$4 sm:$0xff]  }
 0x216   :  { %v7757_v60 = vadd.f32 %v2427_v16, %v553_v42  ;;  %v7759_v51 = vadd.f32 %v2550_v50, %v561_v44  ;;  %v2429_v20 = vpop.f32.mrb[2].mxu0  ;;  %v2552_v52 = vpop.f32.mrb[2].mxu1  ;;  %4820 = vmatpush1.bf16.msra.mxu0 %v8394_v45  ;;  %v8453_v42 = vld [vmem:[#allocation6 + $0x3c4] ss:$20 sps:$4 sm:$0xff]   ;;  %v8462_v16 = vld [vmem:[#allocation6 + $0x28c] ss:$20 sps:$4 sm:$0xff]  }
 0x217   :  { %vm2798_vm0 = vcmp.ge.f32.partialorder %v7756_v49, 0.0  ;;  %v2805_v53 = vmul.f32 0.01, %v7756_v49  ;;  %4821 = vmatprep.subr.bf16.mxu0 %v8402_v46  ;;  %v2430_v57 = vpop.f32.mrb[3].mxu0  ;;  %v2553_v58 = vpop.f32.mrb[3].mxu1 }
 0x218   :  { %vm2799_vm1 = vcmp.ge.f32.partialorder %v7757_v60, 0.0  ;;  %v2806_v55 = vmul.f32 0.01, %v7757_v60  ;;  %vm2801_vm2 = vcmp.ge.f32.partialorder %v7759_v51, 0.0  ;;  %v2808_v29 = vmul.f32 0.01, %v7759_v51 }
 0x219   :  { %v2812_v56 = vsel %vm2798_vm0, %v7756_v49, %v2805_v53  ;;  %v8451_v49 = vld [vmem:[#allocation6 + $0x3c0] ss:$20 sps:$4 sm:$0xff]   ;;  %v8463_v53 = vld [vmem:[#allocation6 + $0x410] ss:$20 sps:$4 sm:$0xff]  }
 0x21a   :  { %4822 = vmatpush1.bf16.msra.mxu0 %v8400_v24  ;;  %v2813_v59 = vsel %vm2799_vm1, %v7757_v60, %v2806_v55  ;;  %v2815_v63 = vsel %vm2801_vm2, %v7759_v51, %v2808_v29  ;;  %v9394_v3 = vpack.c.bf16 %v2812_v56, %v2812_v56  ;;  %v8459_v50 = vld [vmem:[#allocation6 + $0x3ec] ss:$20 sps:$4 sm:$0xff]   ;;  %v8460_v60 = vld [vmem:[#allocation6 + $0x288] ss:$20 sps:$4 sm:$0xff]   ;;  %v8466_v24 = vld [vmem:[#allocation6 + $0x2b0] ss:$20 sps:$4 sm:$0xff]  }
 0x21b   :  { %v9392_v1 = vpack.c.bf16 %v2813_v59, %v2813_v59  ;;  %4823 = vmatprep.subr.bf16.mxu0 %v8408_v54  ;;  %v9398_v4 = vpack.c.bf16 %v2815_v63, %v2815_v63  ;;  %v8457_v51 = vld [vmem:[#allocation6 + $0x3e8] ss:$20 sps:$4 sm:$0xff]   ;;  %v8472_v29 = vld [vmem:[#allocation6 + $0x2d8] ss:$20 sps:$4 sm:$0xff]   ;;  %v8478_v59 = vld [vmem:[#allocation6 + $0x300] ss:$20 sps:$4 sm:$0xff]  }
 0x21c   :  { %v8468_v20 = vld [vmem:[#allocation6 + $0x2b4] ss:$20 sps:$4 sm:$0xff]   ;;  %v8474_v54 = vld [vmem:[#allocation6 + $0x2dc] ss:$20 sps:$4 sm:$0xff]   ;;  %v8469_v56 = vld [vmem:[#allocation6 + $0x438] ss:$20 sps:$4 sm:$0xff]  }
 0x21d   :  { %4677 = vmatprep.mubr.bf16.mxu1 %v9392_v1  ;;  %4841 = vmatprep.mubr.bf16.mxu0 %v9392_v1  ;;  %v8465_v52 = vld [vmem:[#allocation6 + $0x414] ss:$20 sps:$4 sm:$0xff]   ;;  %v8471_v55 = vld [vmem:[#allocation6 + $0x43c] ss:$20 sps:$4 sm:$0xff]   ;;  %v8480_v57 = vld [vmem:[#allocation6 + $0x304] ss:$20 sps:$4 sm:$0xff]  }
 0x21e   :  { %4678 = vmatmul.mubr.bf16.vlgmr.msra.gmra.mrb[16].mxu1 %v9394_v3  ;;  %4824 = vmatpush1.bf16.msra.mxu0 %v8406_v62  ;;  %v8477_v58 = vld [vmem:[#allocation6 + $0x464] ss:$20 sps:$4 sm:$0xff]   ;;  %v8475_v62 = vld [vmem:[#allocation6 + $0x460] ss:$20 sps:$4 sm:$0xff]  }
 0x21f   :  { %4687 = vmatpush1.bf16.msra.mxu1 %v8403_v61  ;;  %4718 = vmatprep.mubr.bf16.mxu1 %v9398_v4  ;;  %v9407_v61 = vsub.s32 2, %v9316_v43  ;;  %v8486_v63 = vld [vmem:[#allocation6 + $0x32c] ss:$20 sps:$4 sm:$0xff]  }
 0x220   :  { %4688 = vmatprep.subr.bf16.mxu1 %v8411_v0  ;;  %4825 = vmatprep.subr.bf16.mxu0 %v8414_v2  ;;  %v8483_v0 = vld [vmem:[#allocation6 + $0x48c] ss:$20 sps:$4 sm:$0xff]   ;;  %v8484_v2 = vld [vmem:[#allocation6 + $0x328] ss:$20 sps:$4 sm:$0xff]  }
 0x222   :  { %4826 = vmatpush1.bf16.msra.mxu0 %v8412_v6  ;;  %v557_v6 = vrot.slane %v9376_v39, %v9407_v61 }
 0x223   :  { %4689 = vmatpush1.bf16.msra.mxu1 %v8409_v5  ;;  %4827 = vmatprep.subr.bf16.mxu0 %v8420_v8  ;;  %v572_v5 = vsub.s32 6, %v9316_v43  ;;  %v8492_v8 = vld [vmem:[#allocation6 + $0x354] ss:$20 sps:$4 sm:$0xff]  }
 0x224   :  { %4690 = vmatprep.subr.bf16.mxu1 %v8417_v7  ;;  %v8481_v7 = vld [vmem:[#allocation6 + $0x488] ss:$20 sps:$4 sm:$0xff]  }
 0x226   :  { %4828 = vmatpush1.bf16.msra.mxu0 %v8418_v11  ;;  %v8490_v11 = vld [vmem:[#allocation6 + $0x350] ss:$20 sps:$4 sm:$0xff]  }
 0x227   :  { %4691 = vmatpush1.bf16.msra.mxu1 %v8415_v10  ;;  %4829 = vmatprep.subr.bf16.mxu0 %v8426_v13  ;;  %v8489_v10 = vld [vmem:[#allocation6 + $0x4b4] ss:$20 sps:$4 sm:$0xff]   ;;  %v7758_v13 = vadd.f32 %v9390_v48, %v557_v6 }
 0x228   :  { %4692 = vmatprep.subr.bf16.mxu1 %v8423_v12  ;;  %v573_v12 = vrot.slane %v9376_v39, %v572_v5  ;;  %v8528_v39 = vld [vmem:[#allocation6 + $0x504] ss:$20 sps:$4 sm:$0xff]  }
 0x229   :  { %vm2800_vm3 = vcmp.ge.f32.partialorder %v7758_v13, 0.0 }
 0x22a   :  { %4830 = vmatpush1.bf16.msra.mxu0 %v8424_v15  ;;  %v8498_v15 = vld [vmem:[#allocation6 + $0x37c] ss:$20 sps:$4 sm:$0xff]  }
 0x22b   :  { %4693 = vmatpush1.bf16.msra.mxu1 %v8421_v14  ;;  %4831 = vmatprep.subr.bf16.mxu0 %v8432_v18  ;;  %v8487_v14 = vld [vmem:[#allocation6 + $0x4b0] ss:$20 sps:$4 sm:$0xff]  }
 0x22c   :  { %4694 = vmatprep.subr.bf16.mxu1 %v8429_v17  ;;  %v8495_v17 = vld [vmem:[#allocation6 + $0x4dc] ss:$20 sps:$4 sm:$0xff]  }
 0x22e   :  { %4832 = vmatpush1.bf16.msra.mxu0 %v8430_v21  ;;  %v2807_v21 = vmul.f32 0.01, %v7758_v13 }
 0x22f   :  { %4695 = vmatpush1.bf16.msra.mxu1 %v8427_v19  ;;  %4833 = vmatprep.subr.bf16.mxu0 %v8438_v23  ;;  %v8496_v23 = vld [vmem:[#allocation6 + $0x378] ss:$20 sps:$4 sm:$0xff]  }
 0x230   :  { %4696 = vmatprep.subr.bf16.mxu1 %v8435_v22  ;;  %v8493_v22 = vld [vmem:[#allocation6 + $0x4d8] ss:$20 sps:$4 sm:$0xff]  }
 0x232   :  { %4834 = vmatpush1.bf16.msra.mxu0 %v8436_v27  ;;  %v8501_v27 = vld [vmem:[#allocation6 + $0x3a4] ss:$20 sps:$4 sm:$0xff]  }
 0x233   :  { %4697 = vmatpush1.bf16.msra.mxu1 %v8433_v25  ;;  %4835 = vmatprep.subr.bf16.mxu0 %v8444_v9 }
 0x234   :  { %4698 = vmatprep.subr.bf16.mxu1 %v8441_v28  ;;  %v7567_v36 = vpop.f32.mrb[4].mxu1 }
 0x235   :  { %v7568_v41 = vpop.f32.mrb[5].mxu1 }
 0x236   :  { %4836 = vmatpush1.bf16.msra.mxu0 %v8442_v31  ;;  %v9402_v44 = vadd.f32 %v7568_v41, %v7567_v36  ;;  %v7570_v45 = vpop.f32.mrb[6].mxu1  ;;  %v2814_v31 = vsel %vm2800_vm3, %v7758_v13, %v2807_v21  ;;  %v8534_v36 = vld [vmem:[#allocation6 + $0x52c] ss:$20 sps:$4 sm:$0xff]   ;;  %v8507_v41 = vld [vmem:[#allocation6 + $0x3f4] ss:$20 sps:$4 sm:$0xff]  }
 0x237   :  { %4699 = vmatpush1.bf16.msra.mxu1 %v8439_v30  ;;  %4837 = vmatprep.subr.bf16.mxu0 %v8450_v34  ;;  %v7571_v46 = vpop.f32.mrb[7].mxu1  ;;  %v8504_v34 = vld [vmem:[#allocation6 + $0x3cc] ss:$20 sps:$4 sm:$0xff]   ;;  %v8540_v45 = vld [vmem:[#allocation6 + $0x554] ss:$20 sps:$4 sm:$0xff]  }
 0x238   :  { %4700 = vmatprep.subr.bf16.mxu1 %v8447_v33  ;;  %v2713_v18 = vadd.f32 %v9402_v44, %v573_v12  ;;  %v8499_v33 = vld [vmem:[#allocation6 + $0x3a0] ss:$20 sps:$4 sm:$0xff]   ;;  %v8505_v44 = vld [vmem:[#allocation6 + $0x3f0] ss:$20 sps:$4 sm:$0xff]   ;;  %v8580_v21 = vld [vmem:[#allocation6 + $0x668] ss:$20 sps:$4 sm:$0xff]  }
 0x239   :  { %v8510_v46 = vld [vmem:[#allocation6 + $0x41c] ss:$20 sps:$4 sm:$0xff]   ;;  %v8576_v12 = vld [vmem:[#allocation6 + $0x644] ss:$20 sps:$4 sm:$0xff]   ;;  %v8523_v13 = vld [vmem:[#allocation6 + $0x4e0] ss:$20 sps:$4 sm:$0xff]  }
 0x23a   :  { %4838 = vmatpush1.bf16.msra.mxu0 %v8448_v35  ;;  %v8526_v35 = vld [vmem:[#allocation6 + $0x500] ss:$20 sps:$4 sm:$0xff]  }
 0x23b   :  { %4701 = vmatpush1.bf16.msra.mxu1 %v8445_v38  ;;  %4839 = vmatprep.subr.bf16.mxu0 %v8456_v40  ;;  %v9417_v38 = vpack.c.bf16 %v2814_v31, %v2814_v31  ;;  %v8502_v40 = vld [vmem:[#allocation6 + $0x3c8] ss:$20 sps:$4 sm:$0xff]   ;;  %v8547_v31 = vld [vmem:[#allocation6 + $0x580] ss:$20 sps:$4 sm:$0xff]  }
 0x23c   :  { %4702 = vmatprep.subr.bf16.mxu1 %v8453_v42  ;;  %v8532_v42 = vld [vmem:[#allocation6 + $0x528] ss:$20 sps:$4 sm:$0xff]  }
 0x23e   :  { %4840 = vmatpush1.bf16.msra.mxu0 %v8454_v47  ;;  %v8538_v47 = vld [vmem:[#allocation6 + $0x550] ss:$20 sps:$4 sm:$0xff]  }
 0x23f   :  { %4703 = vmatpush1.bf16.msra.mxu1 %v8451_v49  ;;  %4850 = vmatprep.subr.bf16.mxu0 %v8462_v16  ;;  %v8508_v49 = vld [vmem:[#allocation6 + $0x418] ss:$20 sps:$4 sm:$0xff]   ;;  %v8546_v16 = vld [vmem:[#allocation6 + $0x57c] ss:$20 sps:$4 sm:$0xff]  }
 0x240   :  { %4704 = vmatprep.subr.bf16.mxu1 %v8459_v50  ;;  %v8513_v50 = vld [vmem:[#allocation6 + $0x444] ss:$20 sps:$4 sm:$0xff]  }
 0x241   :  { %4842 = vmatmul.mubr.bf16.vlgmr.msra.gmra.mrb[8].mxu0 %v9394_v3 }
 0x242   :  { %4851 = vmatpush1.bf16.msra.mxu0 %v8460_v60  ;;  %4882 = vmatprep.mubr.bf16.mxu0 %v9398_v4  ;;  %v8544_v60 = vld [vmem:[#allocation6 + $0x578] ss:$20 sps:$4 sm:$0xff]  }
 0x243   :  { %4705 = vmatpush1.bf16.msra.mxu1 %v8457_v51  ;;  %4852 = vmatprep.subr.bf16.mxu0 %v8468_v20  ;;  %v8511_v51 = vld [vmem:[#allocation6 + $0x440] ss:$20 sps:$4 sm:$0xff]   ;;  %v8552_v20 = vld [vmem:[#allocation6 + $0x5a4] ss:$20 sps:$4 sm:$0xff]  }
 0x244   :  { %4706 = vmatprep.subr.bf16.mxu1 %v8465_v52  ;;  %v8516_v52 = vld [vmem:[#allocation6 + $0x46c] ss:$20 sps:$4 sm:$0xff]  }
 0x246   :  { %4853 = vmatpush1.bf16.msra.mxu0 %v8466_v24  ;;  %v8550_v24 = vld [vmem:[#allocation6 + $0x5a0] ss:$20 sps:$4 sm:$0xff]  }
 0x247   :  { %4707 = vmatpush1.bf16.msra.mxu1 %v8463_v53  ;;  %4854 = vmatprep.subr.bf16.mxu0 %v8474_v54  ;;  %v8514_v53 = vld [vmem:[#allocation6 + $0x468] ss:$20 sps:$4 sm:$0xff]   ;;  %v8558_v54 = vld [vmem:[#allocation6 + $0x5cc] ss:$20 sps:$4 sm:$0xff]  }
 0x248   :  { %4708 = vmatprep.subr.bf16.mxu1 %v8471_v55  ;;  %v8519_v55 = vld [vmem:[#allocation6 + $0x494] ss:$20 sps:$4 sm:$0xff]  }
 0x24a   :  { %4855 = vmatpush1.bf16.msra.mxu0 %v8472_v29  ;;  %v8556_v29 = vld [vmem:[#allocation6 + $0x5c8] ss:$20 sps:$4 sm:$0xff]  }
 0x24b   :  { %4709 = vmatpush1.bf16.msra.mxu1 %v8469_v56  ;;  %4856 = vmatprep.subr.bf16.mxu0 %v8480_v57  ;;  %v8517_v56 = vld [vmem:[#allocation6 + $0x490] ss:$20 sps:$4 sm:$0xff]   ;;  %v8564_v57 = vld [vmem:[#allocation6 + $0x5f4] ss:$20 sps:$4 sm:$0xff]  }
 0x24c   :  { %4710 = vmatprep.subr.bf16.mxu1 %v8477_v58  ;;  %v8522_v58 = vld [vmem:[#allocation6 + $0x4bc] ss:$20 sps:$4 sm:$0xff]  }
 0x24e   :  { %4857 = vmatpush1.bf16.msra.mxu0 %v8478_v59  ;;  %v8562_v59 = vld [vmem:[#allocation6 + $0x5f0] ss:$20 sps:$4 sm:$0xff]  }
 0x24f   :  { %4711 = vmatpush1.bf16.msra.mxu1 %v8475_v62  ;;  %4858 = vmatprep.subr.bf16.mxu0 %v8486_v63  ;;  %v8520_v62 = vld [vmem:[#allocation6 + $0x4b8] ss:$20 sps:$4 sm:$0xff]  }
 0x250   :  { %4712 = vmatprep.subr.bf16.mxu1 %v8483_v0  ;;  %v8570_v0 = vld [vmem:[#allocation6 + $0x61c] ss:$20 sps:$4 sm:$0xff]  }
 0x252   :  { %4859 = vmatpush1.bf16.msra.mxu0 %v8484_v2 }
 0x253   :  { %4713 = vmatpush1.bf16.msra.mxu1 %v8481_v7  ;;  %4860 = vmatprep.subr.bf16.mxu0 %v8492_v8  ;;  %v8525_v7 = vld [vmem:[#allocation6 + $0x4e4] ss:$20 sps:$4 sm:$0xff]  }
 0x254   :  { %4714 = vmatprep.subr.bf16.mxu1 %v8489_v10  ;;  %v7589_v19 = vpop.f32.mrb[8].mxu1  ;;  %v8568_v8 = vld [vmem:[#allocation6 + $0x618] ss:$20 sps:$4 sm:$0xff]  }
 0x255   :  { %v7590_v25 = vpop.f32.mrb[9].mxu1 }
 0x256   :  { %4861 = vmatpush1.bf16.msra.mxu0 %v8490_v11  ;;  %v7591_v28 = vadd.f32 %v7590_v25, %v7589_v19  ;;  %v7592_v48 = vpop.f32.mrb[10].mxu1  ;;  %v8537_v19 = vld [vmem:[#allocation6 + $0x534] ss:$20 sps:$4 sm:$0xff]   ;;  %v8543_v25 = vld [vmem:[#allocation6 + $0x55c] ss:$20 sps:$4 sm:$0xff]  }
 0x257   :  { %4715 = vmatpush1.bf16.msra.mxu1 %v8487_v14  ;;  %4862 = vmatprep.subr.bf16.mxu0 %v8498_v15  ;;  %v7593_v9 = vpop.f32.mrb[11].mxu1  ;;  %v8531_v14 = vld [vmem:[#allocation6 + $0x50c] ss:$20 sps:$4 sm:$0xff]   ;;  %v8549_v48 = vld [vmem:[#allocation6 + $0x584] ss:$20 sps:$4 sm:$0xff]  }
 0x258   :  { %4716 = vmatprep.subr.bf16.mxu1 %v8495_v17  ;;  %v9415_v30 = vadd.f32 %v7591_v28, %v2713_v18  ;;  %v8574_v15 = vld [vmem:[#allocation6 + $0x640] ss:$20 sps:$4 sm:$0xff]   ;;  %v8529_v18 = vld [vmem:[#allocation6 + $0x508] ss:$20 sps:$4 sm:$0xff]   ;;  %v8541_v28 = vld [vmem:[#allocation6 + $0x558] ss:$20 sps:$4 sm:$0xff]  }
 0x259   :  { %v8582_v17 = vld [vmem:[#allocation6 + $0x66c] ss:$20 sps:$4 sm:$0xff]  }
 0x25a   :  { %4863 = vmatpush1.bf16.msra.mxu0 %v8496_v23  ;;  %v8535_v23 = vld [vmem:[#allocation6 + $0x530] ss:$20 sps:$4 sm:$0xff]   ;;  %v8592_v9 = vld [vmem:[#allocation6 + $0x6b8] ss:$20 sps:$4 sm:$0xff]  }
 0x25b   :  { %4717 = vmatpush1.bf16.msra.mxu1 %v8493_v22  ;;  %4864 = vmatprep.subr.bf16.mxu0 %v8501_v27  ;;  %v8588_v22 = vld [vmem:[#allocation6 + $0x694] ss:$20 sps:$4 sm:$0xff]   ;;  %v8586_v27 = vld [vmem:[#allocation6 + $0x690] ss:$20 sps:$4 sm:$0xff]  }
 0x25c   :  { %4727 = vmatprep.subr.bf16.mxu1 %v8528_v39  ;;  %v8594_v39 = vld [vmem:[#allocation6 + $0x6bc] ss:$20 sps:$4 sm:$0xff]  }
 0x25e   :  { %4719 = vmatmul.mubr.bf16.vlgmr.msra.gmra.mrb[16].mxu1 %v9417_v38  ;;  %4865 = vmatpush1.bf16.msra.mxu0 %v8499_v33  ;;  %v8555_v33 = vld [vmem:[#allocation6 + $0x5ac] ss:$20 sps:$4 sm:$0xff]  }
 0x25f   :  { %4866 = vmatprep.subr.bf16.mxu0 %v8504_v34  ;;  %4728 = vmatpush1.bf16.msra.mxu1 %v8526_v35  ;;  %v8598_v34 = vld [vmem:[#allocation6 + $0x6e0] ss:$20 sps:$4 sm:$0xff]  }
 0x260   :  { %4729 = vmatprep.subr.bf16.mxu1 %v8534_v36  ;;  %v8606_v35 = vld [vmem:[#allocation6 + $0x70c] ss:$20 sps:$4 sm:$0xff]   ;;  %v8553_v36 = vld [vmem:[#allocation6 + $0x5a8] ss:$20 sps:$4 sm:$0xff]  }
 0x262   :  { %4867 = vmatpush1.bf16.msra.mxu0 %v8502_v40  ;;  %v8561_v40 = vld [vmem:[#allocation6 + $0x5d4] ss:$20 sps:$4 sm:$0xff]  }
 0x263   :  { %4868 = vmatprep.subr.bf16.mxu0 %v8507_v41  ;;  %4730 = vmatpush1.bf16.msra.mxu1 %v8532_v42  ;;  %v8604_v41 = vld [vmem:[#allocation6 + $0x708] ss:$20 sps:$4 sm:$0xff]  }
 0x264   :  { %4731 = vmatprep.subr.bf16.mxu1 %v8540_v45  ;;  %v8612_v42 = vld [vmem:[#allocation6 + $0x734] ss:$20 sps:$4 sm:$0xff]   ;;  %v8567_v45 = vld [vmem:[#allocation6 + $0x5fc] ss:$20 sps:$4 sm:$0xff]  }
 0x266   :  { %4869 = vmatpush1.bf16.msra.mxu0 %v8505_v44  ;;  %v8559_v44 = vld [vmem:[#allocation6 + $0x5d0] ss:$20 sps:$4 sm:$0xff]  }
 0x267   :  { %4870 = vmatprep.subr.bf16.mxu0 %v8510_v46  ;;  %4732 = vmatpush1.bf16.msra.mxu1 %v8538_v47  ;;  %v8610_v46 = vld [vmem:[#allocation6 + $0x730] ss:$20 sps:$4 sm:$0xff]  }
 0x268   :  { %4733 = vmatprep.subr.bf16.mxu1 %v8546_v16  ;;  %v8618_v47 = vld [vmem:[#allocation6 + $0x75c] ss:$20 sps:$4 sm:$0xff]   ;;  %v8573_v16 = vld [vmem:[#allocation6 + $0x624] ss:$20 sps:$4 sm:$0xff]  }
 0x26a   :  { %4871 = vmatpush1.bf16.msra.mxu0 %v8508_v49  ;;  %v8565_v49 = vld [vmem:[#allocation6 + $0x5f8] ss:$20 sps:$4 sm:$0xff]  }
 0x26b   :  { %4872 = vmatprep.subr.bf16.mxu0 %v8513_v50  ;;  %4734 = vmatpush1.bf16.msra.mxu1 %v8544_v60  ;;  %v8616_v50 = vld [vmem:[#allocation6 + $0x758] ss:$20 sps:$4 sm:$0xff]  }
 0x26c   :  { %4735 = vmatprep.subr.bf16.mxu1 %v8552_v20  ;;  %v8624_v60 = vld [vmem:[#allocation6 + $0x784] ss:$20 sps:$4 sm:$0xff]   ;;  %v8579_v20 = vld [vmem:[#allocation6 + $0x64c] ss:$20 sps:$4 sm:$0xff]  }
 0x26e   :  { %4873 = vmatpush1.bf16.msra.mxu0 %v8511_v51  ;;  %v8571_v51 = vld [vmem:[#allocation6 + $0x620] ss:$20 sps:$4 sm:$0xff]  }
 0x26f   :  { %4874 = vmatprep.subr.bf16.mxu0 %v8516_v52  ;;  %4736 = vmatpush1.bf16.msra.mxu1 %v8550_v24  ;;  %v8577_v52 = vld [vmem:[#allocation6 + $0x648] ss:$20 sps:$4 sm:$0xff]  }
 0x270   :  { %4737 = vmatprep.subr.bf16.mxu1 %v8558_v54  ;;  %v8585_v24 = vld [vmem:[#allocation6 + $0x674] ss:$20 sps:$4 sm:$0xff]   ;;  %v8591_v54 = vld [vmem:[#allocation6 + $0x69c] ss:$20 sps:$4 sm:$0xff]  }
 0x272   :  { %4875 = vmatpush1.bf16.msra.mxu0 %v8514_v53  ;;  %v8583_v53 = vld [vmem:[#allocation6 + $0x670] ss:$20 sps:$4 sm:$0xff]  }
 0x273   :  { %4876 = vmatprep.subr.bf16.mxu0 %v8519_v55  ;;  %4738 = vmatpush1.bf16.msra.mxu1 %v8556_v29  ;;  %v8589_v55 = vld [vmem:[#allocation6 + $0x698] ss:$20 sps:$4 sm:$0xff]  }
 0x274   :  { %v7611_v63 = vpop.f32.mrb[12].mxu1  ;;  %4739 = vmatprep.subr.bf16.mxu1 %v8564_v57  ;;  %v8597_v29 = vld [vmem:[#allocation6 + $0x6c4] ss:$20 sps:$4 sm:$0xff]   ;;  %v8603_v57 = vld [vmem:[#allocation6 + $0x6ec] ss:$20 sps:$4 sm:$0xff]  }
 0x275   :  { %v7612_v2 = vpop.f32.mrb[13].mxu1 }
 0x276   :  { %4877 = vmatpush1.bf16.msra.mxu0 %v8517_v56  ;;  %v7613_v5 = vadd.f32 %v7612_v2, %v7611_v63  ;;  %v7614_v6 = vpop.f32.mrb[14].mxu1  ;;  %v8595_v56 = vld [vmem:[#allocation6 + $0x6c0] ss:$20 sps:$4 sm:$0xff]   ;;  %v8615_v63 = vld [vmem:[#allocation6 + $0x73c] ss:$20 sps:$4 sm:$0xff]  }
 0x277   :  { %4878 = vmatprep.subr.bf16.mxu0 %v8522_v58  ;;  %4740 = vmatpush1.bf16.msra.mxu1 %v8562_v59  ;;  %v7615_v10 = vpop.f32.mrb[15].mxu1  ;;  %v8601_v58 = vld [vmem:[#allocation6 + $0x6e8] ss:$20 sps:$4 sm:$0xff]   ;;  %v8621_v2 = vld [vmem:[#allocation6 + $0x764] ss:$20 sps:$4 sm:$0xff]  }
 0x278   :  { %v9421_v11 = vadd.f32 %v7613_v5, %v9415_v30  ;;  %4741 = vmatprep.subr.bf16.mxu1 %v8570_v0  ;;  %v8600_v30 = vld [vmem:[#allocation6 + $0x6e4] ss:$20 sps:$4 sm:$0xff]   ;;  %v8609_v59 = vld [vmem:[#allocation6 + $0x714] ss:$20 sps:$4 sm:$0xff]   ;;  %v8627_v6 = vld [vmem:[#allocation6 + $0x78c] ss:$20 sps:$4 sm:$0xff]  }
 0x279   :  { %v8613_v0 = vld [vmem:[#allocation6 + $0x738] ss:$20 sps:$4 sm:$0xff]   ;;  %v8619_v5 = vld [vmem:[#allocation6 + $0x760] ss:$20 sps:$4 sm:$0xff]  }
 0x27a   :  { %4879 = vmatpush1.bf16.msra.mxu0 %v8520_v62  ;;  %v8607_v62 = vld [vmem:[#allocation6 + $0x710] ss:$20 sps:$4 sm:$0xff]   ;;  %v8998_v10 = vld [vmem:[#allocation4] sm:$0xff]  ;;  %vm2804_vm6 = vcmp.ge.f32.partialorder %v9421_v11, 0.0 }
 0x27b   :  { %4880 = vmatprep.subr.bf16.mxu0 %v8525_v7  ;;  %4742 = vmatpush1.bf16.msra.mxu1 %v8568_v8  ;;  %v564_v7 = vsub.s32 4, %v9316_v43  ;;  %v568_v8 = vsub.s32 5, %v9316_v43 }
 0x27c   :  { %4743 = vmatprep.subr.bf16.mxu1 %v8576_v12 }
 0x27d   :  { %v565_v12 = vrot.slane %v8998_v10, %v564_v7 }
 0x27e   :  { %4881 = vmatpush1.bf16.msra.mxu0 %v8523_v13  ;;  %v569_v13 = vrot.slane %v8998_v10, %v568_v8  ;;  %v8672_v8 = vld [vmem:[#allocation6 + $0x790] ss:$20 sps:$4 sm:$0xff]   ;;  %v8673_v10 = vld [vmem:[#allocation6 + $0x178] ss:$20 sps:$4 sm:$0xff]  }
 0x27f   :  { %4891 = vmatprep.subr.bf16.mxu0 %v8531_v14  ;;  %4744 = vmatpush1.bf16.msra.mxu1 %v8574_v15 }
 0x280   :  { %4745 = vmatprep.subr.bf16.mxu1 %v8582_v17 }
 0x281   :  { %4883 = vmatmul.mubr.bf16.vlgmr.msra.gmra.mrb[8].mxu0 %v9417_v38 }
 0x282   :  { %4892 = vmatpush1.bf16.msra.mxu0 %v8529_v18 }
 0x283   :  { %4893 = vmatprep.subr.bf16.mxu0 %v8537_v19  ;;  %4746 = vmatpush1.bf16.msra.mxu1 %v8580_v21 }
 0x284   :  { %4747 = vmatprep.subr.bf16.mxu1 %v8588_v22 }
 0x286   :  { %4894 = vmatpush1.bf16.msra.mxu0 %v8535_v23 }
 0x287   :  { %4895 = vmatprep.subr.bf16.mxu0 %v8543_v25  ;;  %4748 = vmatpush1.bf16.msra.mxu1 %v8586_v27 }
 0x288   :  { %4749 = vmatprep.subr.bf16.mxu1 %v8594_v39 }
 0x28a   :  { %4896 = vmatpush1.bf16.msra.mxu0 %v8541_v28  ;;  %v8622_v28 = vld [vmem:[#allocation6 + $0x780] ss:$20 sps:$4 sm:$0xff]  }
 0x28b   :  { %4897 = vmatprep.subr.bf16.mxu0 %v8549_v48  ;;  %4750 = vmatpush1.bf16.msra.mxu1 %v8592_v9  ;;  %v8625_v48 = vld [vmem:[#allocation6 + $0x788] ss:$20 sps:$4 sm:$0xff]  }
 0x28c   :  { %4751 = vmatprep.subr.bf16.mxu1 %v8600_v30  ;;  %v8630_v30 = vld [vmem:[#allocation6 + $0x7ac] ss:$20 sps:$4 sm:$0xff]  }
 0x28e   :  { %4898 = vmatpush1.bf16.msra.mxu0 %v8547_v31  ;;  %v8633_v31 = vld [vmem:[#allocation6 + $0x7b4] ss:$20 sps:$4 sm:$0xff]  }
 0x28f   :  { %4899 = vmatprep.subr.bf16.mxu0 %v8555_v33  ;;  %4752 = vmatpush1.bf16.msra.mxu1 %v8598_v34  ;;  %v8628_v33 = vld [vmem:[#allocation6 + $0x7a8] ss:$20 sps:$4 sm:$0xff]   ;;  %v8631_v34 = vld [vmem:[#allocation6 + $0x7b0] ss:$20 sps:$4 sm:$0xff]  }
 0x290   :  { %4753 = vmatprep.subr.bf16.mxu1 %v8606_v35  ;;  %v8636_v35 = vld [vmem:[#allocation6 + $0x7d4] ss:$20 sps:$4 sm:$0xff]  }
 0x292   :  { %4900 = vmatpush1.bf16.msra.mxu0 %v8553_v36  ;;  %v8639_v36 = vld [vmem:[#allocation6 + $0x7dc] ss:$20 sps:$4 sm:$0xff]  }
 0x293   :  { %4901 = vmatprep.subr.bf16.mxu0 %v8561_v40  ;;  %4754 = vmatpush1.bf16.msra.mxu1 %v8604_v41  ;;  %v9177_v40 = vmov 0   ;;  %v8634_v41 = vld [vmem:[#allocation6 + $0x7d0] ss:$20 sps:$4 sm:$0xff]  }
 0x294   :  { %4755 = vmatprep.subr.bf16.mxu1 %v8612_v42  ;;  %v8637_v42 = vld [vmem:[#allocation6 + $0x7d8] ss:$20 sps:$4 sm:$0xff]  }
 0x296   :  { %4902 = vmatpush1.bf16.msra.mxu0 %v8559_v44  ;;  %v8642_v44 = vld [vmem:[#allocation6 + $0x7fc] ss:$20 sps:$4 sm:$0xff]  }
 0x297   :  { %4903 = vmatprep.subr.bf16.mxu0 %v8567_v45  ;;  %4756 = vmatpush1.bf16.msra.mxu1 %v8610_v46  ;;  %v8645_v45 = vld [vmem:[#allocation6 + $0x804] ss:$20 sps:$4 sm:$0xff]  }
 0x298   :  { %4757 = vmatprep.subr.bf16.mxu1 %v8618_v47  ;;  %v8640_v46 = vld [vmem:[#allocation6 + $0x7f8] ss:$20 sps:$4 sm:$0xff]   ;;  %v8643_v47 = vld [vmem:[#allocation6 + $0x800] ss:$20 sps:$4 sm:$0xff]  }
 0x29a   :  { %4904 = vmatpush1.bf16.msra.mxu0 %v8565_v49  ;;  %v8648_v49 = vld [vmem:[#allocation6 + $0x824] ss:$20 sps:$4 sm:$0xff]  }
 0x29b   :  { %4905 = vmatprep.subr.bf16.mxu0 %v8573_v16  ;;  %4758 = vmatpush1.bf16.msra.mxu1 %v8616_v50  ;;  %v8651_v16 = vld [vmem:[#allocation6 + $0x82c] ss:$20 sps:$4 sm:$0xff]  }
 0x29c   :  { %4768 = vmatprep.subr.bf16.mxu1 %v8624_v60  ;;  %v8646_v50 = vld [vmem:[#allocation6 + $0x820] ss:$20 sps:$4 sm:$0xff]   ;;  %v8649_v60 = vld [vmem:[#allocation6 + $0x828] ss:$20 sps:$4 sm:$0xff]  }
 0x29e   :  { %4906 = vmatpush1.bf16.msra.mxu0 %v8571_v51  ;;  %v8654_v51 = vld [vmem:[#allocation6 + $0x84c] ss:$20 sps:$4 sm:$0xff]  }
 0x29f   :  { %4907 = vmatprep.subr.bf16.mxu0 %v8579_v20  ;;  %v8657_v20 = vld [vmem:[#allocation6 + $0x854] ss:$20 sps:$4 sm:$0xff]  }
 0x2a2   :  { %4908 = vmatpush1.bf16.msra.mxu0 %v8577_v52  ;;  %v8652_v52 = vld [vmem:[#allocation6 + $0x848] ss:$20 sps:$4 sm:$0xff]  }
 0x2a3   :  { %4909 = vmatprep.subr.bf16.mxu0 %v8585_v24  ;;  %v8655_v24 = vld [vmem:[#allocation6 + $0x850] ss:$20 sps:$4 sm:$0xff]  }
 0x2a6   :  { %4910 = vmatpush1.bf16.msra.mxu0 %v8583_v53  ;;  %v8660_v53 = vld [vmem:[#allocation6 + $0x874] ss:$20 sps:$4 sm:$0xff]  }
 0x2a7   :  { %4911 = vmatprep.subr.bf16.mxu0 %v8591_v54  ;;  %v8663_v54 = vld [vmem:[#allocation6 + $0x87c] ss:$20 sps:$4 sm:$0xff]  }
 0x2aa   :  { %4912 = vmatpush1.bf16.msra.mxu0 %v8589_v55  ;;  %v8658_v55 = vld [vmem:[#allocation6 + $0x870] ss:$20 sps:$4 sm:$0xff]  }
 0x2ab   :  { %4913 = vmatprep.subr.bf16.mxu0 %v8597_v29  ;;  %v8661_v29 = vld [vmem:[#allocation6 + $0x878] ss:$20 sps:$4 sm:$0xff]  }
 0x2ae   :  { %4914 = vmatpush1.bf16.msra.mxu0 %v8595_v56  ;;  %v8666_v56 = vld [vmem:[#allocation6 + $0x89c] ss:$20 sps:$4 sm:$0xff]  }
 0x2af   :  { %4915 = vmatprep.subr.bf16.mxu0 %v8603_v57  ;;  %v8669_v57 = vld [vmem:[#allocation6 + $0x8a4] ss:$20 sps:$4 sm:$0xff]  }
 0x2b2   :  { %4916 = vmatpush1.bf16.msra.mxu0 %v8601_v58  ;;  %v2811_v58 = vmul.f32 0.01, %v9421_v11 }
 0x2b3   :  { %4917 = vmatprep.subr.bf16.mxu0 %v8609_v59  ;;  %v8664_v59 = vld [vmem:[#allocation6 + $0x898] ss:$20 sps:$4 sm:$0xff]  }
 0x2b6   :  { %4918 = vmatpush1.bf16.msra.mxu0 %v8607_v62  ;;  %v8667_v62 = vld [vmem:[#allocation6 + $0x8a0] ss:$20 sps:$4 sm:$0xff]  }
 0x2b7   :  { %4919 = vmatprep.subr.bf16.mxu0 %v8615_v63  ;;  %v8670_v63 = vld [vmem:[#allocation6 + $0x150] ss:$20 sps:$4 sm:$0xff]  }
 0x2ba   :  { %4920 = vmatpush1.bf16.msra.mxu0 %v8613_v0  ;;  %v2818_v0 = vsel %vm2804_vm6, %v9421_v11, %v2811_v58  ;;  %v8675_v11 = vld [vmem:[#allocation6 + $0x7b8] ss:$20 sps:$4 sm:$0xff]  }
 0x2bb   :  { %4921 = vmatprep.subr.bf16.mxu0 %v8621_v2  ;;  %v8671_v2 = vld [vmem:[#allocation6 + $0x10] ss:$20 sps:$4 sm:$0xff]  }
 0x2bc   :  { %v8759_v58 = vld [vmem:[#allocation9 + $0xa8] ss:$16 sps:$4 sm:$0xff]  }
 0x2be   :  { %4922 = vmatpush1.bf16.msra.mxu0 %v8619_v5  ;;  %v9441_v5 = vpack.c.bf16 %v2818_v0, %v2818_v0  ;;  %v8765_v0 = vld [vmem:[#allocation9 + $0xc8] ss:$16 sps:$4 sm:$0xff]  }
 0x2bf   :  { %4932 = vmatprep.subr.bf16.mxu0 %v8627_v6  ;;  %v9178_v6 = vmov 0.0  }
 0x2d4   :  { %v2671_v14 = vpop.f32.mrb[4].mxu0 }
 0x2d5   :  { %v7760_v15 = vadd.f32 %v2671_v14, %v565_v12  ;;  %v2673_v17 = vpop.f32.mrb[5].mxu0  ;;  %v8674_v12 = vld [vmem:[#allocation6 + $0x38] ss:$20 sps:$4 sm:$0xff]   ;;  %v8677_v14 = vld [vmem:[#allocation6 + $0x60] ss:$20 sps:$4 sm:$0xff]  }
 0x2d6   :  { %v7761_v18 = vadd.f32 %v2673_v17, %v569_v13  ;;  %v2675_v19 = vpop.f32.mrb[6].mxu0  ;;  %v8676_v13 = vld [vmem:[#allocation6 + $0x1a0] ss:$20 sps:$4 sm:$0xff]   ;;  %v8679_v17 = vld [vmem:[#allocation6 + $0x1c8] ss:$20 sps:$4 sm:$0xff]  }
 0x2d7   :  { %vm2802_vm4 = vcmp.ge.f32.partialorder %v7760_v15, 0.0  ;;  %v2809_v21 = vmul.f32 0.01, %v7760_v15  ;;  %v2676_v22 = vpop.f32.mrb[7].mxu0  ;;  %v8682_v19 = vld [vmem:[#allocation6 + $0x1f0] ss:$20 sps:$4 sm:$0xff]  }
 0x2d8   :  { %vm2803_vm5 = vcmp.ge.f32.partialorder %v7761_v18, 0.0  ;;  %v2810_v23 = vmul.f32 0.01, %v7761_v18  ;;  %v8684_v22 = vld [vmem:[#allocation6 + $0x830] ss:$20 sps:$4 sm:$0xff]  }
 0x2d9   :  { %v2816_v25 = vsel %vm2802_vm4, %v7760_v15, %v2809_v21  ;;  %v8678_v15 = vld [vmem:[#allocation6 + $0x7e0] ss:$20 sps:$4 sm:$0xff]   ;;  %v8683_v21 = vld [vmem:[#allocation6 + $0xb0] ss:$20 sps:$4 sm:$0xff]  }
 0x2da   :  { %v2817_v27 = vsel %vm2803_vm5, %v7761_v18, %v2810_v23  ;;  %v9430_v9 = vpack.c.bf16 %v2816_v25, %v2816_v25  ;;  %v8680_v18 = vld [vmem:[#allocation6 + $0x88] ss:$20 sps:$4 sm:$0xff]   ;;  %v8685_v23 = vld [vmem:[#allocation6 + $0x218] ss:$20 sps:$4 sm:$0xff]  }
 0x2db   :  { %v9428_v39 = vpack.c.bf16 %v2817_v27, %v2817_v27  ;;  %v8686_v25 = vld [vmem:[#allocation6 + $0xd8] ss:$20 sps:$4 sm:$0xff]  }
 0x2dc   :  { %v8687_v27 = vld [vmem:[#allocation6 + $0x858] ss:$20 sps:$4 sm:$0xff]  }
 0x2dd   :  { %4759 = vmatprep.mubr.bf16.mxu1 %v9428_v39  ;;  %4923 = vmatprep.mubr.bf16.mxu0 %v9428_v39 }
 0x2de   :  { %4760 = vmatmul.mubr.bf16.vlgmr.msra.gmra.mrb[16].mxu1 %v9430_v9  ;;  %4924 = vmatmul.mubr.bf16.vlgmr.msra.gmra.mrb[8].mxu0 %v9430_v9 }
 0x2df   :  { %4769 = vmatpush1.bf16.msra.mxu1 %v8622_v28  ;;  %4933 = vmatpush1.bf16.msra.mxu0 %v8625_v48  ;;  %v8688_v28 = vld [vmem:[#allocation6 + $0x240] ss:$20 sps:$4 sm:$0xff]  }
 0x2e0   :  { %4770 = vmatprep.subr.bf16.mxu1 %v8630_v30  ;;  %4934 = vmatprep.subr.bf16.mxu0 %v8633_v31  ;;  %v8689_v48 = vld [vmem:[#allocation6 + $0x100] ss:$20 sps:$4 sm:$0xff]   ;;  %v8691_v31 = vld [vmem:[#allocation6 + $0x268] ss:$20 sps:$4 sm:$0xff]  }
 0x2e1   :  { %4800 = vmatprep.mubr.bf16.mxu1 %v9177_v40  ;;  %4964 = vmatprep.mubr.bf16.mxu0 %v9177_v40  ;;  %v8690_v30 = vld [vmem:[#allocation6 + $0x880] ss:$20 sps:$4 sm:$0xff]  }
 0x2e3   :  { %4771 = vmatpush1.bf16.msra.mxu1 %v8628_v33  ;;  %4935 = vmatpush1.bf16.msra.mxu0 %v8631_v34  ;;  %v8692_v33 = vld [vmem:[#allocation6 + $0x128] ss:$20 sps:$4 sm:$0xff]  }
 0x2e4   :  { %4772 = vmatprep.subr.bf16.mxu1 %v8636_v35  ;;  %4936 = vmatprep.subr.bf16.mxu0 %v8639_v36  ;;  %v8693_v34 = vld [vmem:[#allocation6 + $0x8a8] ss:$20 sps:$4 sm:$0xff]   ;;  %v8694_v35 = vld [vmem:[#allocation6 + $0x3d0] ss:$20 sps:$4 sm:$0xff]  }
 0x2e5   :  { %v8731_v36 = vld [vmem:[#allocation9 + $0xc] ss:$16 sps:$4 sm:$0xff]  }
 0x2e7   :  { %4773 = vmatpush1.bf16.msra.mxu1 %v8634_v41  ;;  %4937 = vmatpush1.bf16.msra.mxu0 %v8637_v42  ;;  %v8695_v41 = vld [vmem:[#allocation6 + $0x290] ss:$20 sps:$4 sm:$0xff]   ;;  %v8696_v42 = vld [vmem:[#allocation6 + $0x3f8] ss:$20 sps:$4 sm:$0xff]  }
 0x2e8   :  { %4774 = vmatprep.subr.bf16.mxu1 %v8642_v44  ;;  %4938 = vmatprep.subr.bf16.mxu0 %v8645_v45  ;;  %v8729_v44 = vld [vmem:[#allocation9 + $0x8] ss:$16 sps:$4 sm:$0xff]   ;;  %v8737_v45 = vld [vmem:[#allocation9 + $0x2c] ss:$16 sps:$4 sm:$0xff]  }
 0x2eb   :  { %4775 = vmatpush1.bf16.msra.mxu1 %v8640_v46  ;;  %4939 = vmatpush1.bf16.msra.mxu0 %v8643_v47  ;;  %v8697_v46 = vld [vmem:[#allocation6 + $0x2b8] ss:$20 sps:$4 sm:$0xff]   ;;  %v8698_v47 = vld [vmem:[#allocation6 + $0x420] ss:$20 sps:$4 sm:$0xff]  }
 0x2ec   :  { %4776 = vmatprep.subr.bf16.mxu1 %v8648_v49  ;;  %4940 = vmatprep.subr.bf16.mxu0 %v8651_v16  ;;  %v8735_v49 = vld [vmem:[#allocation9 + $0x28] ss:$16 sps:$4 sm:$0xff]   ;;  %v8743_v16 = vld [vmem:[#allocation9 + $0x4c] ss:$16 sps:$4 sm:$0xff]  }
 0x2ef   :  { %4777 = vmatpush1.bf16.msra.mxu1 %v8646_v50  ;;  %4941 = vmatpush1.bf16.msra.mxu0 %v8649_v60  ;;  %v8699_v50 = vld [vmem:[#allocation6 + $0x2e0] ss:$20 sps:$4 sm:$0xff]   ;;  %v8700_v60 = vld [vmem:[#allocation6 + $0x448] ss:$20 sps:$4 sm:$0xff]  }
 0x2f0   :  { %4778 = vmatprep.subr.bf16.mxu1 %v8654_v51  ;;  %4942 = vmatprep.subr.bf16.mxu0 %v8657_v20  ;;  %v8741_v51 = vld [vmem:[#allocation9 + $0x48] ss:$16 sps:$4 sm:$0xff]  }
 0x2f1   :  { %v8701_v20 = vld [vmem:[#allocation6 + $0x308] ss:$20 sps:$4 sm:$0xff]  }
 0x2f3   :  { %4779 = vmatpush1.bf16.msra.mxu1 %v8652_v52  ;;  %4943 = vmatpush1.bf16.msra.mxu0 %v8655_v24  ;;  %v8702_v52 = vld [vmem:[#allocation6 + $0x470] ss:$20 sps:$4 sm:$0xff]  }
 0x2f4   :  { %4780 = vmatprep.subr.bf16.mxu1 %v8660_v53  ;;  %4944 = vmatprep.subr.bf16.mxu0 %v8663_v54  ;;  %v8755_v24 = vld [vmem:[#allocation9 + $0x8c] ss:$16 sps:$4 sm:$0xff]   ;;  %v8704_v54 = vld [vmem:[#allocation6 + $0x498] ss:$20 sps:$4 sm:$0xff]  }
 0x2f5   :  { %v8703_v53 = vld [vmem:[#allocation6 + $0x330] ss:$20 sps:$4 sm:$0xff]  }
 0x2f7   :  { %4781 = vmatpush1.bf16.msra.mxu1 %v8658_v55  ;;  %4945 = vmatpush1.bf16.msra.mxu0 %v8661_v29  ;;  %v8753_v55 = vld [vmem:[#allocation9 + $0x88] ss:$16 sps:$4 sm:$0xff]   ;;  %v8761_v29 = vld [vmem:[#allocation9 + $0xac] ss:$16 sps:$4 sm:$0xff]  }
 0x2f8   :  { %4782 = vmatprep.subr.bf16.mxu1 %v8666_v56  ;;  %4946 = vmatprep.subr.bf16.mxu0 %v8669_v57  ;;  %v8705_v56 = vld [vmem:[#allocation6 + $0x358] ss:$20 sps:$4 sm:$0xff]   ;;  %v8706_v57 = vld [vmem:[#allocation6 + $0x4c0] ss:$20 sps:$4 sm:$0xff]  }
 0x2fb   :  { %4783 = vmatpush1.bf16.msra.mxu1 %v8664_v59  ;;  %4947 = vmatpush1.bf16.msra.mxu0 %v8667_v62  ;;  %v8767_v59 = vld [vmem:[#allocation9 + $0xcc] ss:$16 sps:$4 sm:$0xff]  }
 0x2fc   :  { %7617 = vmatprep.subr.bf16.mxu1 %v8670_v63  ;;  %7736 = vmatprep.subr.bf16.mxu0 %v9178_v6  ;;  %v8707_v62 = vld [vmem:[#allocation6 + $0x380] ss:$20 sps:$4 sm:$0xff]   ;;  %v8708_v63 = vld [vmem:[#allocation6 + $0x4e8] ss:$20 sps:$4 sm:$0xff]  }
 0x2fe   :  { %4801 = vmatmul.mubr.bf16.vlgmr.msra.gmra.mrb[16].mxu1 %v9441_v5  ;;  %4965 = vmatmul.mubr.bf16.vlgmr.msra.gmra.mrb[8].mxu0 %v9441_v5 }
 0x2ff   :  { %7618 = vmatpush3.bf16.msra.mxu1 %v8671_v2  ;;  %5005 = vmatprep.mubr.bf16.mxu1 %v9392_v1  ;;  %v8681_v1 = vld [vmem:[#allocation6 + $0x808] ss:$20 sps:$4 sm:$0xff]   ;;  %v8773_v2 = vld [vmem:[#allocation9 + $0xec] ss:$16 sps:$4 sm:$0xff]  }
 0x300   :  { %7737 = vmatpush3.bf16.msra.mxu0 %v8672_v8  ;;  %7619 = vmatprep.subr.bf16.mxu1 %v8673_v10  ;;  %v8771_v8 = vld [vmem:[#allocation9 + $0xe8] ss:$16 sps:$4 sm:$0xff]   ;;  %v8779_v10 = vld [vmem:[#allocation9 + $0x10c] ss:$16 sps:$4 sm:$0xff]  }
 0x301   :  { %7738 = vmatprep.subr.bf16.mxu0 %v9178_v6  ;;  %7752 = vmatprep.mubr.msk.bf16.mxu0 %vm9179_vm7, %v9178_v6 }
 0x303   :  { %7620 = vmatpush3.bf16.msra.mxu1 %v8674_v12  ;;  %v8711_v12 = vld [vmem:[#allocation6 + $0x510] ss:$20 sps:$4 sm:$0xff]  }
 0x304   :  { %7739 = vmatpush3.bf16.msra.mxu0 %v8675_v11  ;;  %7621 = vmatprep.subr.bf16.mxu1 %v8676_v13  ;;  %v8712_v11 = vld [vmem:[#allocation6 + $0x678] ss:$20 sps:$4 sm:$0xff]  }
 0x305   :  { %7740 = vmatprep.subr.bf16.mxu0 %v9178_v6  ;;  %v8777_v13 = vld [vmem:[#allocation9 + $0x108] ss:$16 sps:$4 sm:$0xff]  }
 0x307   :  { %7622 = vmatpush3.bf16.msra.mxu1 %v8677_v14  ;;  %v8785_v14 = vld [vmem:[#allocation9 + $0x12c] ss:$16 sps:$4 sm:$0xff]  }
 0x308   :  { %7741 = vmatpush3.bf16.msra.mxu0 %v8678_v15  ;;  %7623 = vmatprep.subr.bf16.mxu1 %v8679_v17  ;;  %v8713_v15 = vld [vmem:[#allocation6 + $0x538] ss:$20 sps:$4 sm:$0xff]   ;;  %v8714_v17 = vld [vmem:[#allocation6 + $0x6a0] ss:$20 sps:$4 sm:$0xff]  }
 0x309   :  { %7742 = vmatprep.subr.bf16.mxu0 %v9178_v6 }
 0x30b   :  { %7624 = vmatpush3.bf16.msra.mxu1 %v8680_v18  ;;  %v8783_v18 = vld [vmem:[#allocation9 + $0x128] ss:$16 sps:$4 sm:$0xff]  }
 0x30c   :  { %7743 = vmatpush3.bf16.msra.mxu0 %v8681_v1  ;;  %7625 = vmatprep.subr.bf16.mxu1 %v8682_v19  ;;  %v8791_v1 = vld [vmem:[#allocation9 + $0x14c] ss:$16 sps:$4 sm:$0xff]  }
 0x30d   :  { %7744 = vmatprep.subr.bf16.mxu0 %v9178_v6  ;;  %v8715_v19 = vld [vmem:[#allocation6 + $0x560] ss:$20 sps:$4 sm:$0xff]  }
 0x30f   :  { %7626 = vmatpush3.bf16.msra.mxu1 %v8683_v21  ;;  %v8716_v21 = vld [vmem:[#allocation6 + $0x6c8] ss:$20 sps:$4 sm:$0xff]  }
 0x310   :  { %7745 = vmatpush3.bf16.msra.mxu0 %v8684_v22  ;;  %7627 = vmatprep.subr.bf16.mxu1 %v8685_v23  ;;  %v8789_v22 = vld [vmem:[#allocation9 + $0x148] ss:$16 sps:$4 sm:$0xff]  }
 0x311   :  { %7746 = vmatprep.subr.bf16.mxu0 %v9178_v6  ;;  %v8717_v23 = vld [vmem:[#allocation6 + $0x588] ss:$20 sps:$4 sm:$0xff]  }
 0x313   :  { %7628 = vmatpush3.bf16.msra.mxu1 %v8686_v25  ;;  %v8718_v25 = vld [vmem:[#allocation6 + $0x6f0] ss:$20 sps:$4 sm:$0xff]  }
 0x314   :  { %7747 = vmatpush3.bf16.msra.mxu0 %v8687_v27  ;;  %7629 = vmatprep.subr.bf16.mxu1 %v8688_v28  ;;  %v8803_v27 = vld [vmem:[#allocation9 + $0x18c] ss:$16 sps:$4 sm:$0xff]  }
 0x315   :  { %7748 = vmatprep.subr.bf16.mxu0 %v9178_v6  ;;  %v8719_v28 = vld [vmem:[#allocation6 + $0x5b0] ss:$20 sps:$4 sm:$0xff]  }
 0x317   :  { %7630 = vmatpush3.bf16.msra.mxu1 %v8689_v48  ;;  %v8720_v48 = vld [vmem:[#allocation6 + $0x718] ss:$20 sps:$4 sm:$0xff]  }
 0x318   :  { %7749 = vmatpush3.bf16.msra.mxu0 %v8690_v30  ;;  %7631 = vmatprep.subr.bf16.mxu1 %v8691_v31  ;;  %v8801_v30 = vld [vmem:[#allocation9 + $0x188] ss:$16 sps:$4 sm:$0xff]   ;;  %v8809_v31 = vld [vmem:[#allocation9 + $0x1ac] ss:$16 sps:$4 sm:$0xff]  }
 0x319   :  { %7750 = vmatprep.subr.bf16.mxu0 %v9178_v6  ;;  %v8710_v6 = vld [vmem:[#allocation6 + $0x650] ss:$20 sps:$4 sm:$0xff]  }
 0x31b   :  { %7632 = vmatpush3.bf16.msra.mxu1 %v8692_v33  ;;  %v8721_v33 = vld [vmem:[#allocation6 + $0x5d8] ss:$20 sps:$4 sm:$0xff]  }
 0x31c   :  { %7751 = vmatpush3.bf16.msra.mxu0 %v8693_v34  ;;  %7639 = vmatprep.subr.bf16.mxu1 %v8694_v35  ;;  %v8722_v34 = vld [vmem:[#allocation6 + $0x740] ss:$20 sps:$4 sm:$0xff]  }
 0x31d   :  { %6258 = vmatprep.subr.bf16.mxu0 %v8731_v36  ;;  %v8807_v35 = vld [vmem:[#allocation9 + $0x1a8] ss:$16 sps:$4 sm:$0xff]   ;;  %v8815_v36 = vld [vmem:[#allocation9 + $0x1cc] ss:$16 sps:$4 sm:$0xff]  }
 0x31e   :  { %5006 = vmatmul.mubr.bf16.vlgmr.msra.gmra.mrb[20].mxu1 %v9394_v3  ;;  %v8749_v3 = vld [vmem:[#allocation9 + $0x6c] ss:$16 sps:$4 sm:$0xff]  }
 0x31f   :  { %7753 = vmatmul.mubr.bf16.vlgmr.msra.gmra.mrb[12].mxu0 %v9441_v5  ;;  %7640 = vmatpush3.bf16.msra.mxu1 %v8695_v41  ;;  %v8709_v5 = vld [vmem:[#allocation6 + $0x3a8] ss:$20 sps:$4 sm:$0xff]   ;;  %v8723_v41 = vld [vmem:[#allocation6 + $0x600] ss:$20 sps:$4 sm:$0xff]  }
 0x320   :  { %5045 = vmatprep.mubr.bf16.mxu1 %v9398_v4  ;;  %7641 = vmatprep.subr.bf16.mxu1 %v8696_v42  ;;  %v8747_v4 = vld [vmem:[#allocation9 + $0x68] ss:$16 sps:$4 sm:$0xff]  }
 0x321   :  { %6259 = vmatpush1.bf16.msra.mxu0 %v8729_v44  ;;  %v8724_v42 = vld [vmem:[#allocation6 + $0x768] ss:$20 sps:$4 sm:$0xff]  }
 0x322   :  { %6260 = vmatprep.subr.bf16.mxu0 %v8737_v45  ;;  %v8813_v44 = vld [vmem:[#allocation9 + $0x1c8] ss:$16 sps:$4 sm:$0xff]   ;;  %v8821_v45 = vld [vmem:[#allocation9 + $0x1ec] ss:$16 sps:$4 sm:$0xff]  }
 0x323   :  { %7642 = vmatpush3.bf16.msra.mxu1 %v8697_v46  ;;  %v8725_v46 = vld [vmem:[#allocation6 + $0x628] ss:$20 sps:$4 sm:$0xff]  }
 0x324   :  { %7643 = vmatprep.subr.bf16.mxu1 %v8698_v47  ;;  %v8728_v47 = vld [vmem:[#allocation9 + $0x4] ss:$16 sps:$4 sm:$0xff]  }
 0x325   :  { %6261 = vmatpush1.bf16.msra.mxu0 %v8735_v49  ;;  %v8819_v49 = vld [vmem:[#allocation9 + $0x1e8] ss:$16 sps:$4 sm:$0xff]  }
 0x326   :  { %6262 = vmatprep.subr.bf16.mxu0 %v8743_v16  ;;  %v8726_v16 = vld [vmem:[#allocation9] ss:$16 sps:$4 sm:$0xff]  }
 0x327   :  { %7644 = vmatpush3.bf16.msra.mxu1 %v8699_v50  ;;  %v8827_v50 = vld [vmem:[#allocation9 + $0x20c] ss:$16 sps:$4 sm:$0xff]  }
 0x328   :  { %7645 = vmatprep.subr.bf16.mxu1 %v8700_v60  ;;  %v8734_v60 = vld [vmem:[#allocation9 + $0x24] ss:$16 sps:$4 sm:$0xff]  }
 0x329   :  { %6263 = vmatpush1.bf16.msra.mxu0 %v8741_v51  ;;  %v8732_v51 = vld [vmem:[#allocation9 + $0x20] ss:$16 sps:$4 sm:$0xff]  }
 0x32a   :  { %6264 = vmatprep.subr.bf16.mxu0 %v8749_v3  ;;  %v8740_v3 = vld [vmem:[#allocation9 + $0x44] ss:$16 sps:$4 sm:$0xff]  }
 0x32b   :  { %7646 = vmatpush3.bf16.msra.mxu1 %v8701_v20  ;;  %v8738_v20 = vld [vmem:[#allocation9 + $0x40] ss:$16 sps:$4 sm:$0xff]  }
 0x32c   :  { %7647 = vmatprep.subr.bf16.mxu1 %v8702_v52  ;;  %v8746_v52 = vld [vmem:[#allocation9 + $0x64] ss:$16 sps:$4 sm:$0xff]  }
 0x32d   :  { %6265 = vmatpush1.bf16.msra.mxu0 %v8747_v4  ;;  %v8744_v4 = vld [vmem:[#allocation9 + $0x60] ss:$16 sps:$4 sm:$0xff]  }
 0x32e   :  { %6266 = vmatprep.subr.bf16.mxu0 %v8755_v24  ;;  %v8752_v24 = vld [vmem:[#allocation9 + $0x84] ss:$16 sps:$4 sm:$0xff]  }
 0x32f   :  { %7648 = vmatpush3.bf16.msra.mxu1 %v8703_v53  ;;  %v8750_v53 = vld [vmem:[#allocation9 + $0x80] ss:$16 sps:$4 sm:$0xff]  }
 0x330   :  { %7649 = vmatprep.subr.bf16.mxu1 %v8704_v54  ;;  %v8758_v54 = vld [vmem:[#allocation9 + $0xa4] ss:$16 sps:$4 sm:$0xff]  }
 0x331   :  { %6267 = vmatpush1.bf16.msra.mxu0 %v8753_v55  ;;  %v8756_v55 = vld [vmem:[#allocation9 + $0xa0] ss:$16 sps:$4 sm:$0xff]  }
 0x332   :  { %6268 = vmatprep.subr.bf16.mxu0 %v8761_v29  ;;  %v8762_v29 = vld [vmem:[#allocation9 + $0xc0] ss:$16 sps:$4 sm:$0xff]  }
 0x333   :  { %7650 = vmatpush3.bf16.msra.mxu1 %v8705_v56  ;;  %v8770_v56 = vld [vmem:[#allocation9 + $0xe4] ss:$16 sps:$4 sm:$0xff]  }
 0x334   :  { %7651 = vmatprep.subr.bf16.mxu1 %v8706_v57  ;;  %v8768_v57 = vld [vmem:[#allocation9 + $0xe0] ss:$16 sps:$4 sm:$0xff]  }
 0x335   :  { %6269 = vmatpush1.bf16.msra.mxu0 %v8759_v58  ;;  %v8776_v58 = vld [vmem:[#allocation9 + $0x104] ss:$16 sps:$4 sm:$0xff]  }
 0x336   :  { %6270 = vmatprep.subr.bf16.mxu0 %v8767_v59  ;;  %v8774_v59 = vld [vmem:[#allocation9 + $0x100] ss:$16 sps:$4 sm:$0xff]  }
 0x337   :  { %7652 = vmatpush3.bf16.msra.mxu1 %v8707_v62  ;;  %v8782_v62 = vld [vmem:[#allocation9 + $0x124] ss:$16 sps:$4 sm:$0xff]  }
 0x338   :  { %7653 = vmatprep.subr.bf16.mxu1 %v8708_v63  ;;  %v8780_v63 = vld [vmem:[#allocation9 + $0x120] ss:$16 sps:$4 sm:$0xff]  }
 0x339   :  { %6271 = vmatpush1.bf16.msra.mxu0 %v8765_v0  ;;  %v8788_v0 = vld [vmem:[#allocation9 + $0x144] ss:$16 sps:$4 sm:$0xff]  }
 0x33a   :  { %6272 = vmatprep.subr.bf16.mxu0 %v8773_v2  ;;  %v8786_v2 = vld [vmem:[#allocation9 + $0x140] ss:$16 sps:$4 sm:$0xff]  }
 0x33b   :  { %7654 = vmatpush3.bf16.msra.mxu1 %v8709_v5  ;;  %v8794_v5 = vld [vmem:[#allocation9 + $0x164] ss:$16 sps:$4 sm:$0xff]  }
 0x33c   :  { %7661 = vmatprep.subr.bf16.mxu1 %v8710_v6  ;;  %v8792_v6 = vld [vmem:[#allocation9 + $0x160] ss:$16 sps:$4 sm:$0xff]  }
 0x33d   :  { %6273 = vmatpush1.bf16.msra.mxu0 %v8771_v8  ;;  %v8800_v8 = vld [vmem:[#allocation9 + $0x184] ss:$16 sps:$4 sm:$0xff]  }
 0x33e   :  { %5046 = vmatmul.mubr.bf16.vlgmr.msra.gmra.mrb[24].mxu1 %v9417_v38  ;;  %6274 = vmatprep.subr.bf16.mxu0 %v8779_v10  ;;  %v8797_v38 = vld [vmem:[#allocation9 + $0x16c] ss:$16 sps:$4 sm:$0xff]   ;;  %v8798_v10 = vld [vmem:[#allocation9 + $0x180] ss:$16 sps:$4 sm:$0xff]  }
 0x33f   :  { %7662 = vmatpush3.bf16.msra.mxu1 %v8711_v12  ;;  %5085 = vmatprep.mubr.bf16.mxu1 %v9428_v39  ;;  %v8795_v39 = vld [vmem:[#allocation9 + $0x168] ss:$16 sps:$4 sm:$0xff]   ;;  %v8806_v12 = vld [vmem:[#allocation9 + $0x1a4] ss:$16 sps:$4 sm:$0xff]  }
 0x340   :  { %7663 = vmatprep.subr.bf16.mxu1 %v8712_v11  ;;  %v8804_v11 = vld [vmem:[#allocation9 + $0x1a0] ss:$16 sps:$4 sm:$0xff]  }
 0x341   :  { %6275 = vmatpush1.bf16.msra.mxu0 %v8777_v13  ;;  %v8812_v13 = vld [vmem:[#allocation9 + $0x1c4] ss:$16 sps:$4 sm:$0xff]  }
 0x342   :  { %6276 = vmatprep.subr.bf16.mxu0 %v8785_v14  ;;  %v8810_v14 = vld [vmem:[#allocation9 + $0x1c0] ss:$16 sps:$4 sm:$0xff]  }
 0x343   :  { %7664 = vmatpush3.bf16.msra.mxu1 %v8713_v15  ;;  %v8818_v15 = vld [vmem:[#allocation9 + $0x1e4] ss:$16 sps:$4 sm:$0xff]  }
 0x344   :  { %7665 = vmatprep.subr.bf16.mxu1 %v8714_v17  ;;  %v8816_v17 = vld [vmem:[#allocation9 + $0x1e0] ss:$16 sps:$4 sm:$0xff]  }
 0x345   :  { %6277 = vmatpush1.bf16.msra.mxu0 %v8783_v18  ;;  %v8824_v18 = vld [vmem:[#allocation9 + $0x204] ss:$16 sps:$4 sm:$0xff]  }
 0x346   :  { %6278 = vmatprep.subr.bf16.mxu0 %v8791_v1  ;;  %v9452_v1 = vld [vmem:[#allocation7] sm:$0x1f] }
 0x347   :  { %7666 = vmatpush3.bf16.msra.mxu1 %v8715_v19  ;;  %v3167_v19 = vrot.slane %v9452_v1, %v9374_v37 }
 0x348   :  { %7667 = vmatprep.subr.bf16.mxu1 %v8716_v21  ;;  %v3171_v21 = vrot.slane %v9452_v1, %v9379_v32 }
 0x349   :  { %6279 = vmatpush1.bf16.msra.mxu0 %v8789_v22  ;;  %v3179_v22 = vrot.slane %v9452_v1, %v9382_v26 }
 0x34a   :  { %6280 = vmatprep.subr.bf16.mxu0 %v8797_v38 }
 0x34b   :  { %7668 = vmatpush3.bf16.msra.mxu1 %v8717_v23 }
 0x34c   :  { %7669 = vmatprep.subr.bf16.mxu1 %v8718_v25 }
 0x34d   :  { %6281 = vmatpush1.bf16.msra.mxu0 %v8795_v39 }
 0x34e   :  { %6282 = vmatprep.subr.bf16.mxu0 %v8803_v27 }
 0x34f   :  { %7670 = vmatpush3.bf16.msra.mxu1 %v8719_v28 }
 0x350   :  { %7671 = vmatprep.subr.bf16.mxu1 %v8720_v48 }
 0x351   :  { %6283 = vmatpush1.bf16.msra.mxu0 %v8801_v30 }
 0x352   :  { %6284 = vmatprep.subr.bf16.mxu0 %v8809_v31 }
 0x353   :  { %7672 = vmatpush3.bf16.msra.mxu1 %v8721_v33 }
 0x354   :  { %7673 = vmatprep.subr.bf16.mxu1 %v8722_v34 }
 0x355   :  { %6285 = vmatpush1.bf16.msra.mxu0 %v8807_v35 }
 0x356   :  { %6286 = vmatprep.subr.bf16.mxu0 %v8815_v36 }
 0x357   :  { %7674 = vmatpush3.bf16.msra.mxu1 %v8723_v41 }
 0x358   :  { %7675 = vmatprep.subr.bf16.mxu1 %v8724_v42 }
 0x359   :  { %6287 = vmatpush1.bf16.msra.mxu0 %v8813_v44 }
 0x35a   :  { %6288 = vmatprep.subr.bf16.mxu0 %v8821_v45 }
 0x35b   :  { %7676 = vmatpush3.bf16.msra.mxu1 %v8725_v46  ;;  %v8822_v46 = vld [vmem:[#allocation9 + $0x200] ss:$16 sps:$4 sm:$0xff]  }
 0x35c   :  { %6135 = vmatprep.subr.bf16.mxu1 %v8728_v47  ;;  %v8825_v47 = vld [vmem:[#allocation9 + $0x208] ss:$16 sps:$4 sm:$0xff]  }
 0x35d   :  { %6289 = vmatpush1.bf16.msra.mxu0 %v8819_v49 }
 0x35e   :  { %5086 = vmatmul.mubr.bf16.vlgmr.msra.gmra.mrb[28].mxu1 %v9430_v9  ;;  %6299 = vmatprep.subr.bf16.mxu0 %v8827_v50  ;;  %v8764_v9 = vld [vmem:[#allocation9 + $0xc4] ss:$16 sps:$4 sm:$0xff]  }
 0x35f   :  { %6136 = vmatpush1.bf16.msra.mxu1 %v8726_v16  ;;  %v8830_v50 = vld [vmem:[#allocation9 + $0x224] ss:$16 sps:$4 sm:$0xff]  }
 0x360   :  { %6137 = vmatprep.subr.bf16.mxu1 %v8734_v60  ;;  %v8833_v60 = vld [vmem:[#allocation9 + $0x22c] ss:$16 sps:$4 sm:$0xff]  }
 0x363   :  { %6138 = vmatpush1.bf16.msra.mxu1 %v8732_v51 }
 0x364   :  { %6139 = vmatprep.subr.bf16.mxu1 %v8740_v3  ;;  %v8828_v3 = vld [vmem:[#allocation9 + $0x220] ss:$16 sps:$4 sm:$0xff]  }
 0x367   :  { %6140 = vmatpush1.bf16.msra.mxu1 %v8738_v20  ;;  %v8831_v20 = vld [vmem:[#allocation9 + $0x228] ss:$16 sps:$4 sm:$0xff]  }
 0x368   :  { %6141 = vmatprep.subr.bf16.mxu1 %v8746_v52  ;;  %v8836_v52 = vld [vmem:[#allocation9 + $0x244] ss:$16 sps:$4 sm:$0xff]  }
 0x36b   :  { %6142 = vmatpush1.bf16.msra.mxu1 %v8744_v4  ;;  %v8839_v4 = vld [vmem:[#allocation9 + $0x24c] ss:$16 sps:$4 sm:$0xff]  }
 0x36c   :  { %6143 = vmatprep.subr.bf16.mxu1 %v8752_v24  ;;  %v8834_v24 = vld [vmem:[#allocation9 + $0x240] ss:$16 sps:$4 sm:$0xff]  }
 0x36f   :  { %6144 = vmatpush1.bf16.msra.mxu1 %v8750_v53  ;;  %v8837_v53 = vld [vmem:[#allocation9 + $0x248] ss:$16 sps:$4 sm:$0xff]  }
 0x370   :  { %6145 = vmatprep.subr.bf16.mxu1 %v8758_v54  ;;  %v8842_v54 = vld [vmem:[#allocation9 + $0x264] ss:$16 sps:$4 sm:$0xff]  }
 0x373   :  { %6146 = vmatpush1.bf16.msra.mxu1 %v8756_v55  ;;  %v8845_v55 = vld [vmem:[#allocation9 + $0x26c] ss:$16 sps:$4 sm:$0xff]  }
 0x374   :  { %6147 = vmatprep.subr.bf16.mxu1 %v8764_v9  ;;  %v8840_v9 = vld [vmem:[#allocation9 + $0x260] ss:$16 sps:$4 sm:$0xff]  }
 0x377   :  { %6148 = vmatpush1.bf16.msra.mxu1 %v8762_v29  ;;  %v8843_v29 = vld [vmem:[#allocation9 + $0x268] ss:$16 sps:$4 sm:$0xff]  }
 0x378   :  { %6149 = vmatprep.subr.bf16.mxu1 %v8770_v56  ;;  %v8848_v56 = vld [vmem:[#allocation9 + $0x284] ss:$16 sps:$4 sm:$0xff]  }
 0x37b   :  { %6150 = vmatpush1.bf16.msra.mxu1 %v8768_v57  ;;  %v8851_v57 = vld [vmem:[#allocation9 + $0x28c] ss:$16 sps:$4 sm:$0xff]  }
 0x37c   :  { %6151 = vmatprep.subr.bf16.mxu1 %v8776_v58  ;;  %v8846_v58 = vld [vmem:[#allocation9 + $0x280] ss:$16 sps:$4 sm:$0xff]  }
 0x37f   :  { %6152 = vmatpush1.bf16.msra.mxu1 %v8774_v59  ;;  %v8849_v59 = vld [vmem:[#allocation9 + $0x288] ss:$16 sps:$4 sm:$0xff]  }
 0x380   :  { %6153 = vmatprep.subr.bf16.mxu1 %v8782_v62  ;;  %v8854_v62 = vld [vmem:[#allocation9 + $0x2a4] ss:$16 sps:$4 sm:$0xff]  }
 0x383   :  { %6154 = vmatpush1.bf16.msra.mxu1 %v8780_v63  ;;  %v8857_v63 = vld [vmem:[#allocation9 + $0x2ac] ss:$16 sps:$4 sm:$0xff]  }
 0x384   :  { %6155 = vmatprep.subr.bf16.mxu1 %v8788_v0  ;;  %v8852_v0 = vld [vmem:[#allocation9 + $0x2a0] ss:$16 sps:$4 sm:$0xff]  }
 0x387   :  { %6156 = vmatpush1.bf16.msra.mxu1 %v8786_v2  ;;  %v8855_v2 = vld [vmem:[#allocation9 + $0x2a8] ss:$16 sps:$4 sm:$0xff]  }
 0x388   :  { %6157 = vmatprep.subr.bf16.mxu1 %v8794_v5  ;;  %v8860_v5 = vld [vmem:[#allocation9 + $0x2c4] ss:$16 sps:$4 sm:$0xff]  }
 0x38b   :  { %6158 = vmatpush1.bf16.msra.mxu1 %v8792_v6  ;;  %v8863_v6 = vld [vmem:[#allocation9 + $0x2cc] ss:$16 sps:$4 sm:$0xff]  }
 0x38c   :  { %6159 = vmatprep.subr.bf16.mxu1 %v8800_v8  ;;  %v8858_v8 = vld [vmem:[#allocation9 + $0x2c0] ss:$16 sps:$4 sm:$0xff]  }
 0x38f   :  { %6160 = vmatpush1.bf16.msra.mxu1 %v8798_v10  ;;  %v8861_v10 = vld [vmem:[#allocation9 + $0x2c8] ss:$16 sps:$4 sm:$0xff]  }
 0x390   :  { %6161 = vmatprep.subr.bf16.mxu1 %v8806_v12 }
 0x393   :  { %6162 = vmatpush1.bf16.msra.mxu1 %v8804_v11  ;;  %v8866_v11 = vld [vmem:[#allocation9 + $0x2e4] ss:$16 sps:$4 sm:$0xff]  }
 0x394   :  { %6163 = vmatprep.subr.bf16.mxu1 %v8812_v13  ;;  %v8869_v13 = vld [vmem:[#allocation9 + $0x2ec] ss:$16 sps:$4 sm:$0xff]  }
 0x397   :  { %6164 = vmatpush1.bf16.msra.mxu1 %v8810_v14 }
 0x398   :  { %6165 = vmatprep.subr.bf16.mxu1 %v8818_v15 }
 0x39b   :  { %6166 = vmatpush1.bf16.msra.mxu1 %v8816_v17 }
 0x39c   :  { %6176 = vmatprep.subr.bf16.mxu1 %v8824_v18 }
 0x3d1   :  { %v4802_v38 = vpop.f32.mrb[16].mxu1  ;;  %v9460_v23 = vpop.f32.mrb[8].mxu0 }
 0x3d2   :  { %v7762_v25 = vadd.f32 %v4802_v38, %v3167_v19  ;;  %v4804_v39 = vpop.f32.mrb[17].mxu1  ;;  %v4968_v27 = vpop.f32.mrb[9].mxu0  ;;  %v8864_v38 = vld [vmem:[#allocation9 + $0x2e0] ss:$16 sps:$4 sm:$0xff]  }
 0x3d3   :  { %v7763_v28 = vadd.f32 %v4804_v39, %v3171_v21  ;;  %v7765_v48 = vadd.f32 %v4968_v27, %v3179_v22  ;;  %v4806_v30 = vpop.f32.mrb[18].mxu1  ;;  %v4970_v31 = vpop.f32.mrb[10].mxu0  ;;  %v8872_v27 = vld [vmem:[#allocation9 + $0x304] ss:$16 sps:$4 sm:$0xff]  }
 0x3d4   :  { %vm5133_vm8 = vcmp.ge.f32.partialorder %v7762_v25, 0.0  ;;  %v5138_v33 = vmul.f32 0.01, %v7762_v25  ;;  %v4807_v41 = vpop.f32.mrb[19].mxu1  ;;  %v4971_v42 = vpop.f32.mrb[11].mxu0 }
 0x3d5   :  { %vm5134_vm9 = vcmp.ge.f32.partialorder %v7763_v28, 0.0  ;;  %v5139_v34 = vmul.f32 0.01, %v7763_v28  ;;  %vm5136_vm10 = vcmp.ge.f32.partialorder %v7765_v48, 0.0  ;;  %v5141_v35 = vmul.f32 0.01, %v7765_v48 }
 0x3d6   :  { %v5143_v36 = vsel %vm5133_vm8, %v7762_v25, %v5138_v33  ;;  %v8867_v25 = vld [vmem:[#allocation9 + $0x2e8] ss:$16 sps:$4 sm:$0xff]   ;;  %v8878_v31 = vld [vmem:[#allocation9 + $0x324] ss:$16 sps:$4 sm:$0xff]   ;;  %v8881_v33 = vld [vmem:[#allocation9 + $0x32c] ss:$16 sps:$4 sm:$0xff]  }
 0x3d7   :  { %v5144_v44 = vsel %vm5134_vm9, %v7763_v28, %v5139_v34  ;;  %v5146_v49 = vsel %vm5136_vm10, %v7765_v48, %v5141_v35  ;;  %v5148_v16 = vpack.c.bf16 %v5143_v36, %v5143_v36  ;;  %v8875_v28 = vld [vmem:[#allocation9 + $0x30c] ss:$16 sps:$4 sm:$0xff]   ;;  %v8870_v48 = vld [vmem:[#allocation9 + $0x300] ss:$16 sps:$4 sm:$0xff]   ;;  %v8873_v30 = vld [vmem:[#allocation9 + $0x308] ss:$16 sps:$4 sm:$0xff]  }
 0x3d8   :  { %v5149_v45 = vpack.c.bf16 %v5144_v44, %v5144_v44  ;;  %v5151_v51 = vpack.c.bf16 %v5146_v49, %v5146_v49  ;;  %v8876_v34 = vld [vmem:[#allocation9 + $0x320] ss:$16 sps:$4 sm:$0xff]   ;;  %v8879_v35 = vld [vmem:[#allocation9 + $0x328] ss:$16 sps:$4 sm:$0xff]   ;;  %v8884_v36 = vld [vmem:[#allocation9 + $0x344] ss:$16 sps:$4 sm:$0xff]  }
 0x3d9   :  { %v8887_v41 = vld [vmem:[#allocation9 + $0x34c] ss:$16 sps:$4 sm:$0xff]   ;;  %v8882_v42 = vld [vmem:[#allocation9 + $0x340] ss:$16 sps:$4 sm:$0xff]   ;;  %v8885_v44 = vld [vmem:[#allocation9 + $0x348] ss:$16 sps:$4 sm:$0xff]  }
 0x3da   :  { %6167 = vmatprep.mubr.bf16.mxu1 %v5149_v45  ;;  %6290 = vmatprep.mubr.bf16.mxu0 %v5149_v45  ;;  %v8890_v45 = vld [vmem:[#allocation9 + $0x364] ss:$16 sps:$4 sm:$0xff]   ;;  %v8891_v49 = vld [vmem:[#allocation9 + $0x368] ss:$16 sps:$4 sm:$0xff]  }
 0x3db   :  { %6168 = vmatmul.mubr.bf16.vlgmr.msra.gmra.mrb[32].mxu1 %v5148_v16  ;;  %6291 = vmatmul.mubr.bf16.vlgmr.msra.gmra.mrb[16].mxu0 %v5148_v16  ;;  %v8896_v16 = vld [vmem:[#allocation9 + $0x384] ss:$16 sps:$4 sm:$0xff]  }
 0x3dc   :  { %6177 = vmatpush1.bf16.msra.mxu1 %v8822_v46  ;;  %6300 = vmatpush1.bf16.msra.mxu0 %v8825_v47  ;;  %v8893_v46 = vld [vmem:[#allocation9 + $0x36c] ss:$16 sps:$4 sm:$0xff]   ;;  %v8888_v47 = vld [vmem:[#allocation9 + $0x360] ss:$16 sps:$4 sm:$0xff]  }
 0x3dd   :  { %6208 = vmatprep.mubr.bf16.mxu1 %v5151_v51  ;;  %6331 = vmatprep.mubr.bf16.mxu0 %v5151_v51  ;;  %v8897_v51 = vld [vmem:[#allocation9 + $0x388] ss:$16 sps:$4 sm:$0xff]  }
 0x3de   :  { %6178 = vmatprep.subr.bf16.mxu1 %v8830_v50  ;;  %6301 = vmatprep.subr.bf16.mxu0 %v8833_v60  ;;  %v8899_v50 = vld [vmem:[#allocation9 + $0x38c] ss:$16 sps:$4 sm:$0xff]   ;;  %v8894_v60 = vld [vmem:[#allocation9 + $0x380] ss:$16 sps:$4 sm:$0xff]  }
 0x3e0   :  { %6179 = vmatpush1.bf16.msra.mxu1 %v8828_v3  ;;  %6302 = vmatpush1.bf16.msra.mxu0 %v8831_v20  ;;  %v8902_v3 = vld [vmem:[#allocation9 + $0x3a4] ss:$16 sps:$4 sm:$0xff]   ;;  %v8905_v20 = vld [vmem:[#allocation9 + $0x3ac] ss:$16 sps:$4 sm:$0xff]  }
 0x3e1   :  { %6180 = vmatprep.subr.bf16.mxu1 %v8836_v52  ;;  %6303 = vmatprep.subr.bf16.mxu0 %v8839_v4  ;;  %v3175_v52 = vrot.slane %v9452_v1, %v9407_v61  ;;  %v8900_v4 = vld [vmem:[#allocation9 + $0x3a0] ss:$16 sps:$4 sm:$0xff]  }
 0x3e4   :  { %6181 = vmatpush1.bf16.msra.mxu1 %v8834_v24  ;;  %6304 = vmatpush1.bf16.msra.mxu0 %v8837_v53  ;;  %v8903_v24 = vld [vmem:[#allocation9 + $0x3a8] ss:$16 sps:$4 sm:$0xff]   ;;  %v8908_v53 = vld [vmem:[#allocation9 + $0x3c4] ss:$16 sps:$4 sm:$0xff]  }
 0x3e5   :  { %6182 = vmatprep.subr.bf16.mxu1 %v8842_v54  ;;  %6305 = vmatprep.subr.bf16.mxu0 %v8845_v55  ;;  %v8911_v54 = vld [vmem:[#allocation9 + $0x3cc] ss:$16 sps:$4 sm:$0xff]   ;;  %v7764_v55 = vadd.f32 %v9460_v23, %v3175_v52  ;;  %v8963_v52 = vld [vmem:[#allocation9 + $0x4e8] ss:$16 sps:$4 sm:$0xff]  }
 0x3e7   :  { %vm5135_vm11 = vcmp.ge.f32.partialorder %v7764_v55, 0.0 }
 0x3e8   :  { %6183 = vmatpush1.bf16.msra.mxu1 %v8840_v9  ;;  %6306 = vmatpush1.bf16.msra.mxu0 %v8843_v29  ;;  %v3183_v9 = vrot.slane %v9452_v1, %v564_v7  ;;  %v8906_v29 = vld [vmem:[#allocation9 + $0x3c0] ss:$16 sps:$4 sm:$0xff]   ;;  %v8915_v1 = vld [vmem:[#allocation9 + $0x3e8] ss:$16 sps:$4 sm:$0xff]  }
 0x3e9   :  { %6184 = vmatprep.subr.bf16.mxu1 %v8848_v56  ;;  %6307 = vmatprep.subr.bf16.mxu0 %v8851_v57  ;;  %v8909_v56 = vld [vmem:[#allocation9 + $0x3c8] ss:$16 sps:$4 sm:$0xff]   ;;  %v8912_v7 = vld [vmem:[#allocation9 + $0x3e0] ss:$16 sps:$4 sm:$0xff]  }
 0x3ec   :  { %6185 = vmatpush1.bf16.msra.mxu1 %v8846_v58  ;;  %6308 = vmatpush1.bf16.msra.mxu0 %v8849_v59  ;;  %v8914_v58 = vld [vmem:[#allocation9 + $0x3e4] ss:$16 sps:$4 sm:$0xff]   ;;  %v8917_v59 = vld [vmem:[#allocation9 + $0x3ec] ss:$16 sps:$4 sm:$0xff]  }
 0x3ed   :  { %6186 = vmatprep.subr.bf16.mxu1 %v8854_v62  ;;  %6309 = vmatprep.subr.bf16.mxu0 %v8857_v63  ;;  %v5140_v62 = vmul.f32 0.01, %v7764_v55 }
 0x3f0   :  { %6187 = vmatpush1.bf16.msra.mxu1 %v8852_v0  ;;  %6310 = vmatpush1.bf16.msra.mxu0 %v8855_v2 }
 0x3f1   :  { %v7633_v12 = vpop.f32.mrb[20].mxu1  ;;  %6188 = vmatprep.subr.bf16.mxu1 %v8860_v5  ;;  %6311 = vmatprep.subr.bf16.mxu0 %v8863_v6  ;;  %v8920_v6 = vld [vmem:[#allocation9 + $0x404] ss:$16 sps:$4 sm:$0xff]  }
 0x3f2   :  { %v9462_v14 = vpop.f32.mrb[12].mxu0  ;;  %v7634_v15 = vpop.f32.mrb[21].mxu1 }
 0x3f3   :  { %v9464_v17 = vadd.f32 %v7634_v15, %v7633_v12  ;;  %v7754_v18 = vpop.f32.mrb[13].mxu0  ;;  %v7636_v19 = vpop.f32.mrb[22].mxu1  ;;  %v8918_v12 = vld [vmem:[#allocation9 + $0x400] ss:$16 sps:$4 sm:$0xff]   ;;  %v8926_v15 = vld [vmem:[#allocation9 + $0x424] ss:$16 sps:$4 sm:$0xff]  }
 0x3f4   :  { %v5130_v21 = vpop.f32.mrb[14].mxu0  ;;  %6189 = vmatpush1.bf16.msra.mxu1 %v8858_v8  ;;  %6312 = vmatpush1.bf16.msra.mxu0 %v8861_v10  ;;  %v7637_v22 = vpop.f32.mrb[23].mxu1  ;;  %v8923_v8 = vld [vmem:[#allocation9 + $0x40c] ss:$16 sps:$4 sm:$0xff]   ;;  %v5145_v10 = vsel %vm5135_vm11, %v7764_v55, %v5140_v62  ;;  %v8924_v18 = vld [vmem:[#allocation9 + $0x420] ss:$16 sps:$4 sm:$0xff]  }
 0x3f5   :  { %v7755_v39 = vpop.f32.mrb[15].mxu0  ;;  %6190 = vmatprep.subr.bf16.mxu1 %v8866_v11  ;;  %6313 = vmatprep.subr.bf16.mxu0 %v8869_v13  ;;  %v5008_v0 = vadd.f32 %v9464_v17, %v3183_v9  ;;  %v8921_v11 = vld [vmem:[#allocation9 + $0x408] ss:$16 sps:$4 sm:$0xff]   ;;  %v5150_v13 = vpack.c.bf16 %v5145_v10, %v5145_v10  ;;  %v8929_v17 = vld [vmem:[#allocation9 + $0x42c] ss:$16 sps:$4 sm:$0xff]  }
 0x3f6   :  { %v8927_v19 = vld [vmem:[#allocation9 + $0x428] ss:$16 sps:$4 sm:$0xff]   ;;  %v8932_v21 = vld [vmem:[#allocation9 + $0x444] ss:$16 sps:$4 sm:$0xff]   ;;  %v8935_v22 = vld [vmem:[#allocation9 + $0x44c] ss:$16 sps:$4 sm:$0xff]  }
 0x3f7   :  { %v8938_v39 = vld [vmem:[#allocation9 + $0x464] ss:$16 sps:$4 sm:$0xff]   ;;  %v8972_v62 = vld [vmem:[#allocation12 + $0x8] sm:$0xff]  }
 0x3f8   :  { %6191 = vmatpush1.bf16.msra.mxu1 %v8864_v38  ;;  %6314 = vmatpush1.bf16.msra.mxu0 %v8867_v25  ;;  %v8930_v38 = vld [vmem:[#allocation9 + $0x440] ss:$16 sps:$4 sm:$0xff]   ;;  %v8933_v25 = vld [vmem:[#allocation9 + $0x448] ss:$16 sps:$4 sm:$0xff]  }
 0x3f9   :  { %6192 = vmatprep.subr.bf16.mxu1 %v8872_v27  ;;  %6315 = vmatprep.subr.bf16.mxu0 %v8875_v28  ;;  %v8941_v27 = vld [vmem:[#allocation9 + $0x46c] ss:$16 sps:$4 sm:$0xff]   ;;  %v8936_v28 = vld [vmem:[#allocation9 + $0x460] ss:$16 sps:$4 sm:$0xff]   ;;  %v8984_v10 = vld [vmem:[#allocation12 + $0x20] sm:$0xff]  }
 0x3fc   :  { %6193 = vmatpush1.bf16.msra.mxu1 %v8870_v48  ;;  %6316 = vmatpush1.bf16.msra.mxu0 %v8873_v30  ;;  %v8939_v48 = vld [vmem:[#allocation9 + $0x468] ss:$16 sps:$4 sm:$0xff]   ;;  %v8944_v30 = vld [vmem:[#allocation9 + $0x484] ss:$16 sps:$4 sm:$0xff]  }
 0x3fd   :  { %6194 = vmatprep.subr.bf16.mxu1 %v8878_v31  ;;  %6317 = vmatprep.subr.bf16.mxu0 %v8881_v33  ;;  %v8947_v31 = vld [vmem:[#allocation9 + $0x48c] ss:$16 sps:$4 sm:$0xff]   ;;  %v8942_v33 = vld [vmem:[#allocation9 + $0x480] ss:$16 sps:$4 sm:$0xff]  }
 0x400   :  { %6195 = vmatpush1.bf16.msra.mxu1 %v8876_v34  ;;  %6318 = vmatpush1.bf16.msra.mxu0 %v8879_v35  ;;  %v8950_v34 = vld [vmem:[#allocation9 + $0x4a4] ss:$16 sps:$4 sm:$0xff]   ;;  %v8953_v35 = vld [vmem:[#allocation9 + $0x4ac] ss:$16 sps:$4 sm:$0xff]  }
 0x401   :  { %6196 = vmatprep.subr.bf16.mxu1 %v8884_v36  ;;  %6319 = vmatprep.subr.bf16.mxu0 %v8887_v41  ;;  %v8948_v36 = vld [vmem:[#allocation9 + $0x4a0] ss:$16 sps:$4 sm:$0xff]   ;;  %v8951_v41 = vld [vmem:[#allocation9 + $0x4a8] ss:$16 sps:$4 sm:$0xff]  }
 0x404   :  { %6197 = vmatpush1.bf16.msra.mxu1 %v8882_v42  ;;  %6320 = vmatpush1.bf16.msra.mxu0 %v8885_v44  ;;  %v8956_v42 = vld [vmem:[#allocation9 + $0x4c4] ss:$16 sps:$4 sm:$0xff]   ;;  %v8959_v44 = vld [vmem:[#allocation9 + $0x4cc] ss:$16 sps:$4 sm:$0xff]  }
 0x405   :  { %6198 = vmatprep.subr.bf16.mxu1 %v8890_v45  ;;  %6321 = vmatprep.subr.bf16.mxu0 %v8893_v46  ;;  %v8954_v45 = vld [vmem:[#allocation9 + $0x4c0] ss:$16 sps:$4 sm:$0xff]   ;;  %v8957_v46 = vld [vmem:[#allocation9 + $0x4c8] ss:$16 sps:$4 sm:$0xff]  }
 0x408   :  { %6199 = vmatpush1.bf16.msra.mxu1 %v8888_v47  ;;  %6322 = vmatpush1.bf16.msra.mxu0 %v8891_v49  ;;  %v8962_v49 = vld [vmem:[#allocation9 + $0x4e4] ss:$16 sps:$4 sm:$0xff]  }
 0x409   :  { %6200 = vmatprep.subr.bf16.mxu1 %v8896_v16  ;;  %6323 = vmatprep.subr.bf16.mxu0 %v8899_v50  ;;  %v8965_v16 = vld [vmem:[#allocation9 + $0x4ec] ss:$16 sps:$4 sm:$0xff]  }
 0x40c   :  { %6201 = vmatpush1.bf16.msra.mxu1 %v8894_v60  ;;  %6324 = vmatpush1.bf16.msra.mxu0 %v8897_v51 }
 0x40d   :  { %6202 = vmatprep.subr.bf16.mxu1 %v8902_v3  ;;  %6325 = vmatprep.subr.bf16.mxu0 %v8905_v20  ;;  %v8960_v20 = vld [vmem:[#allocation9 + $0x4e0] ss:$16 sps:$4 sm:$0xff]  }
 0x410   :  { %6203 = vmatpush1.bf16.msra.mxu1 %v8900_v4  ;;  %6326 = vmatpush1.bf16.msra.mxu0 %v8903_v24  ;;  %v8966_v24 = vld [vmem:[#allocation12 + $0x40] sm:$0xff]  }
 0x411   :  { %v7655_v57 = vpop.f32.mrb[24].mxu1  ;;  %6204 = vmatprep.subr.bf16.mxu1 %v8908_v53  ;;  %6327 = vmatprep.subr.bf16.mxu0 %v8911_v54  ;;  %v8967_v53 = vld [vmem:[#allocation12 + $0xc0] sm:$0xff]  }
 0x412   :  { %v7656_v63 = vpop.f32.mrb[25].mxu1 }
 0x413   :  { %v7657_v2 = vadd.f32 %v7656_v63, %v7655_v57  ;;  %v7658_v23 = vpop.f32.mrb[26].mxu1  ;;  %v8973_v63 = vld [vmem:[#allocation12 + $0x88] sm:$0xff]  }
 0x414   :  { %6205 = vmatpush1.bf16.msra.mxu1 %v8906_v29  ;;  %6328 = vmatpush1.bf16.msra.mxu0 %v8909_v56  ;;  %v7659_v43 = vpop.f32.mrb[27].mxu1  ;;  %v8968_v29 = vld [vmem:[#allocation12] sm:$0xff]   ;;  %v8977_v23 = vld [vmem:[#allocation12 + $0x90] sm:$0xff]  }
 0x415   :  { %v9473_v5 = vadd.f32 %v7657_v2, %v5008_v0  ;;  %6206 = vmatprep.subr.bf16.mxu1 %v8914_v58  ;;  %6329 = vmatprep.subr.bf16.mxu0 %v8917_v59  ;;  %v8969_v56 = vld [vmem:[#allocation12 + $0x80] sm:$0xff]   ;;  %v8970_v58 = vld [vmem:[#allocation12 + $0x48] sm:$0xff]   ;;  %v8975_v0 = vld [vmem:[#allocation12 + $0xd0] sm:$0xff]  }
 0x416   :  { %v8971_v59 = vld [vmem:[#allocation12 + $0xc8] sm:$0xff]   ;;  %v8976_v2 = vld [vmem:[#allocation12 + $0x10] sm:$0xff]   ;;  %v8978_v43 = vld [vmem:[#allocation12 + $0x58] sm:$0xff]  }
 0x418   :  { %6207 = vmatpush1.bf16.msra.mxu1 %v8912_v7  ;;  %6330 = vmatpush1.bf16.msra.mxu0 %v8915_v1  ;;  %v8979_v7 = vld [vmem:[#allocation12 + $0xd8] sm:$0xff]  }
 0x419   :  { %6217 = vmatprep.subr.bf16.mxu1 %v8920_v6  ;;  %6340 = vmatprep.subr.bf16.mxu0 %v8923_v8  ;;  %v8980_v1 = vld [vmem:[#allocation12 + $0x18] sm:$0xff]   ;;  %v8982_v6 = vld [vmem:[#allocation12 + $0x60] sm:$0xff]  }
 0x41a   :  { %v8983_v8 = vld [vmem:[#allocation12 + $0xe0] sm:$0xff]  }
 0x41b   :  { %6209 = vmatmul.mubr.bf16.vlgmr.msra.gmra.mrb[32].mxu1 %v5150_v13  ;;  %6332 = vmatmul.mubr.bf16.vlgmr.msra.gmra.mrb[16].mxu0 %v5150_v13  ;;  %v8987_v13 = vld [vmem:[#allocation12 + $0xe8] sm:$0xff]  }
 0x41c   :  { %6218 = vmatpush1.bf16.msra.mxu1 %v8918_v12  ;;  %6341 = vmatpush1.bf16.msra.mxu0 %v8921_v11  ;;  %v8985_v12 = vld [vmem:[#allocation12 + $0xa0] sm:$0xff]   ;;  %v8986_v11 = vld [vmem:[#allocation12 + $0x68] sm:$0xff]  }
 0x41d   :  { %6219 = vmatprep.subr.bf16.mxu1 %v8926_v15  ;;  %6342 = vmatprep.subr.bf16.mxu0 %v8929_v17  ;;  %v8988_v15 = vld [vmem:[#allocation12 + $0x28] sm:$0xff]  }
 0x41e   :  { %6249 = vmatprep.mubr.bf16.mxu1 %v9177_v40  ;;  %6372 = vmatprep.mubr.bf16.mxu0 %v9177_v40  ;;  %v8945_v40 = vld [vmem:[#allocation9 + $0x488] ss:$16 sps:$4 sm:$0xff]   ;;  %v8989_v17 = vld [vmem:[#allocation12 + $0xa8] sm:$0xff]  }
 0x420   :  { %6220 = vmatpush1.bf16.msra.mxu1 %v8924_v18  ;;  %6343 = vmatpush1.bf16.msra.mxu0 %v8927_v19  ;;  %v8990_v18 = vld [vmem:[#allocation12 + $0x70] sm:$0xff]  }
 0x421   :  { %6221 = vmatprep.subr.bf16.mxu1 %v8932_v21  ;;  %6344 = vmatprep.subr.bf16.mxu0 %v8935_v22  ;;  %v8991_v19 = vld [vmem:[#allocation12 + $0xf0] sm:$0xff]  }
 0x422   :  { %v8992_v21 = vld [vmem:[#allocation12 + $0x30] sm:$0xff]  }
 0x423   :  { %v8993_v22 = vld [vmem:[#allocation12 + $0xb0] sm:$0xff]  }
 0x424   :  { %6222 = vmatpush1.bf16.msra.mxu1 %v8930_v38  ;;  %6345 = vmatpush1.bf16.msra.mxu0 %v8933_v25  ;;  %v8994_v38 = vld [vmem:[#allocation12 + $0x78] sm:$0xff]  }
 0x425   :  { %6223 = vmatprep.subr.bf16.mxu1 %v8938_v39  ;;  %6346 = vmatprep.subr.bf16.mxu0 %v8941_v27  ;;  %v8995_v25 = vld [vmem:[#allocation12 + $0xf8] sm:$0xff]  }
 0x426   :  { %v8996_v39 = vld [vmem:[#allocation12 + $0x38] sm:$0xff]  }
 0x427   :  { %v8997_v27 = vld [vmem:[#allocation12 + $0xb8] sm:$0xff]  }
 0x428   :  { %6224 = vmatpush1.bf16.msra.mxu1 %v8936_v28  ;;  %6347 = vmatpush1.bf16.msra.mxu0 %v8939_v48  ;;  %v5313_v28 = vld [vmem:[#allocation10] sm:$0xf] }
 0x429   :  { %6225 = vmatprep.subr.bf16.mxu1 %v8944_v30  ;;  %6348 = vmatprep.subr.bf16.mxu0 %v8947_v31  ;;  %v5318_v48 = vrot.slane %v5313_v28, %v9374_v37  ;;  %v5326_v30 = vrot.slane %v5313_v28, %v9407_v61  ;;  %v5322_v31 = vrot.slane %v5313_v28, %v9379_v32 }
 0x42c   :  { %6226 = vmatpush1.bf16.msra.mxu1 %v8942_v33  ;;  %6349 = vmatpush1.bf16.msra.mxu0 %v8945_v40  ;;  %v5330_v33 = vrot.slane %v5313_v28, %v9382_v26 }
 0x42d   :  { %6227 = vmatprep.subr.bf16.mxu1 %v8950_v34  ;;  %6350 = vmatprep.subr.bf16.mxu0 %v8953_v35 }
 0x430   :  { %6228 = vmatpush1.bf16.msra.mxu1 %v8948_v36  ;;  %6351 = vmatpush1.bf16.msra.mxu0 %v8951_v41 }
 0x431   :  { %v7677_v47 = vpop.f32.mrb[28].mxu1  ;;  %6229 = vmatprep.subr.bf16.mxu1 %v8956_v42  ;;  %6352 = vmatprep.subr.bf16.mxu0 %v8959_v44 }
 0x432   :  { %v7678_v50 = vpop.f32.mrb[29].mxu1 }
 0x433   :  { %v7679_v60 = vadd.f32 %v7678_v50, %v7677_v47  ;;  %v7680_v51 = vpop.f32.mrb[30].mxu1 }
 0x434   :  { %v7681_v3 = vpop.f32.mrb[31].mxu1  ;;  %6230 = vmatpush1.bf16.msra.mxu1 %v8954_v45  ;;  %6353 = vmatpush1.bf16.msra.mxu0 %v8957_v46 }
 0x435   :  { %v5088_v4 = vadd.f32 %v7679_v60, %v9473_v5  ;;  %6231 = vmatprep.subr.bf16.mxu1 %v8962_v49  ;;  %6354 = vmatprep.subr.bf16.mxu0 %v8965_v16  ;;  %v8981_v5 = vld [vmem:[#allocation12 + $0x98] sm:$0xff]  }
 0x437   :  { %v5128_v54 = vadd.f32 %v9462_v14, %v5088_v4  ;;  %v8974_v14 = vld [vmem:[#allocation12 + $0x50] sm:$0xff]  }
 0x438   :  { %6232 = vmatpush1.bf16.msra.mxu1 %v8960_v20  ;;  %6355 = vmatpush1.bf16.msra.mxu0 %v8963_v52 }
 0x439   :  { %vm5137_vm12 = vcmp.ge.f32.partialorder %v5128_v54, 0.0  ;;  %v5142_v55 = vmul.f32 0.01, %v5128_v54  ;;  %7692 = vmatprep.subr.bf16.mxu1 %v8966_v24  ;;  %7714 = vmatprep.subr.bf16.mxu0 %v8967_v53 }
 0x43b   :  { %v5147_v9 = vsel %vm5137_vm12, %v5128_v54, %v5142_v55 }
 0x43c   :  { %v5152_v57 = vpack.c.bf16 %v5147_v9, %v5147_v9 }
 0x43e   :  { %6250 = vmatmul.mubr.bf16.vlgmr.msra.gmra.mrb[32].mxu1 %v5152_v57  ;;  %6373 = vmatmul.mubr.bf16.vlgmr.msra.gmra.mrb[16].mxu0 %v5152_v57 }
 0x43f   :  { %7693 = vmatpush3.bf16.msra.mxu1 %v8968_v29  ;;  %7715 = vmatpush3.bf16.msra.mxu0 %v8969_v56 }
 0x440   :  { %7694 = vmatprep.subr.bf16.mxu1 %v8970_v58  ;;  %7716 = vmatprep.subr.bf16.mxu0 %v8971_v59 }
 0x443   :  { %7695 = vmatpush3.bf16.msra.mxu1 %v8972_v62  ;;  %7717 = vmatpush3.bf16.msra.mxu0 %v8973_v63 }
 0x444   :  { %7696 = vmatprep.subr.bf16.mxu1 %v8974_v14  ;;  %7718 = vmatprep.subr.bf16.mxu0 %v8975_v0 }
 0x447   :  { %7697 = vmatpush3.bf16.msra.mxu1 %v8976_v2  ;;  %7719 = vmatpush3.bf16.msra.mxu0 %v8977_v23 }
 0x448   :  { %7698 = vmatprep.subr.bf16.mxu1 %v8978_v43  ;;  %7720 = vmatprep.subr.bf16.mxu0 %v8979_v7 }
 0x44b   :  { %7699 = vmatpush3.bf16.msra.mxu1 %v8980_v1  ;;  %7721 = vmatpush3.bf16.msra.mxu0 %v8981_v5 }
 0x44c   :  { %7700 = vmatprep.subr.bf16.mxu1 %v8982_v6  ;;  %7722 = vmatprep.subr.bf16.mxu0 %v8983_v8 }
 0x44f   :  { %7701 = vmatpush3.bf16.msra.mxu1 %v8984_v10  ;;  %7723 = vmatpush3.bf16.msra.mxu0 %v8985_v12 }
 0x450   :  { %7702 = vmatprep.subr.bf16.mxu1 %v8986_v11  ;;  %7724 = vmatprep.subr.bf16.mxu0 %v8987_v13 }
 0x453   :  { %7703 = vmatpush3.bf16.msra.mxu1 %v8988_v15  ;;  %7725 = vmatpush3.bf16.msra.mxu0 %v8989_v17 }
 0x454   :  { %7704 = vmatprep.subr.bf16.mxu1 %v8990_v18  ;;  %7726 = vmatprep.subr.bf16.mxu0 %v8991_v19 }
 0x457   :  { %7705 = vmatpush3.bf16.msra.mxu1 %v8992_v21  ;;  %7727 = vmatpush3.bf16.msra.mxu0 %v8993_v22 }
 0x458   :  { %7706 = vmatprep.subr.bf16.mxu1 %v8994_v38  ;;  %7728 = vmatprep.subr.bf16.mxu0 %v8995_v25 }
 0x45b   :  { %7707 = vmatpush3.bf16.msra.mxu1 %v8996_v39  ;;  %7729 = vmatpush3.bf16.msra.mxu0 %v8997_v27 }
 0x511   :  { %v6251_v40 = vpop.f32.mrb[32].mxu1  ;;  %v6374_v34 = vpop.f32.mrb[16].mxu0 }
 0x512   :  { %v7766_v35 = vadd.f32 %v6251_v40, %v5318_v48  ;;  %v7768_v36 = vadd.f32 %v6374_v34, %v5326_v30  ;;  %v6253_v41 = vpop.f32.mrb[33].mxu1  ;;  %v6376_v42 = vpop.f32.mrb[17].mxu0 }
 0x513   :  { %v7767_v44 = vadd.f32 %v6253_v41, %v5322_v31  ;;  %v7769_v45 = vadd.f32 %v6376_v42, %v5330_v33  ;;  %v6255_v46 = vpop.f32.mrb[34].mxu1  ;;  %v6378_v47 = vpop.f32.mrb[18].mxu0 }
 0x514   :  { %vm6381_vm13 = vcmp.ge.f32.partialorder %v7766_v35, 0.0  ;;  %v6385_v49 = vmul.f32 0.01, %v7766_v35  ;;  %vm6383_vm14 = vcmp.ge.f32.partialorder %v7768_v36, 0.0  ;;  %v6387_v37 = vmul.f32 0.01, %v7768_v36 }
 0x515   :  { %vm6382_vm15 = vcmp.ge.f32.partialorder %v7767_v44, 0.0  ;;  %v6386_v61 = vmul.f32 0.01, %v7767_v44  ;;  %vm6384_vm0 = vcmp.ge.f32.partialorder %v7769_v45, 0.0  ;;  %v6388_v32 = vmul.f32 0.01, %v7769_v45 }
 0x516   :  { %v6389_v16 = vsel %vm6381_vm13, %v7766_v35, %v6385_v49  ;;  %v6391_v26 = vsel %vm6383_vm14, %v7768_v36, %v6387_v37  ;;  %v6256_v50 = vpop.f32.mrb[35].mxu1  ;;  %v6379_v60 = vpop.f32.mrb[19].mxu0 }
 0x517   :  { %v6390_v51 = vsel %vm6382_vm15, %v7767_v44, %v6386_v61  ;;  %v6392_v3 = vsel %vm6384_vm0, %v7769_v45, %v6388_v32  ;;  %v6393_v4 = vpack.c.bf16 %v6389_v16, %v6389_v16  ;;  %v6395_v24 = vpack.c.bf16 %v6391_v26, %v6391_v26 }
 0x518   :  { %v6394_v20 = vpack.c.bf16 %v6390_v51, %v6390_v51  ;;  %v6396_v52 = vpack.c.bf16 %v6392_v3, %v6392_v3 }
 0x51a   :  { %6685 = vmatprep.mubr.bf16.mxu1 %v6394_v20  ;;  %6725 = vmatprep.mubr.bf16.mxu0 %v6396_v52 }
 0x51b   :  { %6686 = vmatmul.mubr.bf16.vlgmr.msra.gmra.mrb[36].mxu1 %v6393_v4  ;;  %6726 = vmatmul.mubr.bf16.vlgmr.msra.gmra.mrb[20].mxu0 %v6395_v24 }
 0x5ee   :  { %v7708_v53 = vpop.f32.mrb[36].mxu1  ;;  %v7730_v54 = vpop.f32.mrb[20].mxu0 }
 0x5ef   :  { %v7709_v55 = vpop.f32.mrb[37].mxu1  ;;  %v7731_v9 = vpop.f32.mrb[21].mxu0 }
 0x5f0   :  { %v7710_v29 = vadd.f32 %v7709_v55, %v7708_v53  ;;  %v7732_v56 = vadd.f32 %v7731_v9, %v7730_v54  ;;  %v7711_v57 = vpop.f32.mrb[38].mxu1  ;;  %v7733_v58 = vpop.f32.mrb[22].mxu0 }
 0x5f1   :  { %v7712_v59 = vpop.f32.mrb[39].mxu1  ;;  %v7734_v62 = vpop.f32.mrb[23].mxu0 }
 0x5f2   :  { %v6728_v63 = vadd.f32 %v7732_v56, %v7710_v29 }
 0x5f4   :  { %6733 = vst [vmem:[%s9494_s8] sm:$0x3] %v6728_v63 }
 0x5f5   :  { %6738 = vsyncpa [#allocation3], 1 }
 0x5f6   :  { %6739 = vsyncpa [#allocation5], 1 }
 0x5f7   :  { %6740 = vsyncpa [#allocation8], 1 }
 0x5f8   :  { %6741 = vsyncpa [#allocation11], 1 }

</bundles_post_ra>
